<compile_context>
chip_gen: v6e
topology: v6e:2x2x1
jax: 0.10.0
libtpu: 0.0.40
codegen_flags: <defaults>
</compile_context>

<pallas_src>
import functools
import math

import jax
import jax.numpy as jnp
from jax import lax
from jax.experimental import pallas as pl
from jax.experimental.pallas import tpu as pltpu


def _lstm_attn_kernel(x_ref, w1_ref, b1_ref, w2_ref, b2_ref,
                      wih_ref, whh_ref, bias_ref,
                      hseq_ref, hfin_ref, cfin_ref,
                      gi_scratch,
                      *, hidden_size: int, r: int, t_chunk: int,
                      approx_recip: bool):
    Bt, T, D = x_ref.shape
    HS = hidden_size
    f32 = jnp.float32
    cdt = wih_ref.dtype                       # bulk-matmul compute dtype

    x = x_ref[...]                            # (Bt, T, D), float32

    # ------------- attention scores (kept in f32: they feed an exp) ---------
    x2d = x.reshape(Bt * T, D)
    a1 = jnp.tanh(jnp.dot(x2d, w1_ref[...], preferred_element_type=f32)
                  + b1_ref[...])                                  # (Bt*T, d_a)
    scores = (jnp.dot(a1, w2_ref[...], preferred_element_type=f32)
              + b2_ref[...]).reshape(Bt, T, r)                    # (Bt, T, r)

    # Per-(b, j) global max: softmax is shift-invariant, so the per-prefix
    # softmax below is mathematically identical to the reference prefix max.
    # scores are bounded by tanh(.) @ w2 so the dynamic range is modest; the
    # epsilon clamp below guards the pathological full-underflow case.
    m = jnp.max(scores, axis=1, keepdims=True)                    # (Bt, 1, r)
    e = jnp.exp(scores - m)                                       # (Bt, T, r)

    # Prefix-sum denominators for every t: log-depth doubling scan (pure VPU
    # adds) — no O(T^2) matmul, no (Bt, T, T) broadcast tensor.
    denom = e
    shift = 1
    while shift < T:
        shifted = jnp.concatenate(
            [jnp.zeros((Bt, shift, r), f32), denom[:, :T - shift, :]], axis=1)
        denom = denom + shifted
        shift *= 2
    denom = jnp.maximum(denom, 1e-30)                             # NaN guard
    if approx_recip:
        inv_denom = pl.reciprocal(denom, approx=True)             # EUP slot
    else:
        inv_denom = 1.0 / denom

    # Combined attention weight of x[:, s, :] inside M_t:
    #   w_att[b, t, s] = (1/r) * sum_j e[b, s, j] / denom[b, t, j]   (s <= t)
    row = lax.broadcasted_iota(jnp.int32, (T, T), 0)
    col = lax.broadcasted_iota(jnp.int32, (T, T), 1)
    causal = col <= row                                           # s <= t
    w_att = jnp.einsum("btr,bsr->bts", inv_denom, e,
                       preferred_element_type=f32) * (1.0 / r)
    w_att = jnp.where(causal[None, :, :], w_att, 0.0)
    # TODO(synk): for very long T on v7x (64 MiB VMEM), block this (Bt, T, T)
    #             tensor over t-chunks or switch to the rank-r cumulative
    #             formulation (prefix sum of e[...,None]*x) to avoid it.

    # All M_t in one batched MXU matmul (compute_dtype inputs, f32 acc).
    M_all = jnp.einsum("bts,bsd->btd", w_att.astype(cdt), x.astype(cdt),
                       preferred_element_type=f32)                # (Bt, T, D)

    # Input contribution to the gates: ONE big pre-loop matmul + bias.
    gates_in = (jnp.dot(M_all.reshape(Bt * T, D).astype(cdt), wih_ref[...],
                        preferred_element_type=f32)
                + bias_ref[...]).reshape(Bt, T, 4 * HS)
    # Park it in VMEM scratch so the serial loop reads small slices instead of
    # keeping the full (Bt, T, 4HS) tensor live in vregs.
    gi_scratch[...] = gates_in

    # ONE fused recurrent gate matmul per step: (Bt,HS) x (HS,4HS).
    whh = whh_ref[...]
    # NOTE: at production keep HS a multiple of 128 so the per-gate slices of
    #       the fused (Bt, 4HS) result are lane-aligned vreg subranges.

    def step(gi_t, h, c):
        g = gi_t + jnp.dot(h.astype(cdt), whh, preferred_element_type=f32)
        i_t = jax.nn.sigmoid(g[:, 0 * HS:1 * HS])
        f_t = jax.nn.sigmoid(g[:, 1 * HS:2 * HS])
        g_t = jnp.tanh(g[:, 2 * HS:3 * HS])
        o_t = jax.nn.sigmoid(g[:, 3 * HS:4 * HS])
        c = f_t * c + i_t * g_t
        h = o_t * jnp.tanh(c)
        return h, c

    h = jnp.zeros((Bt, HS), f32)
    c = jnp.zeros((Bt, HS), f32)

    if t_chunk >= T:
        # Small T: fully unrolled; ONE lane/sublane-dense store for all hseq.
        hs = []
        for t in range(T):
            h, c = step(gi_scratch[:, t, :], h, c)
            hs.append(h)
        hseq_ref[...] = jnp.stack(hs, axis=1).astype(hseq_ref.dtype)
    else:
        # Larger T: fori_loop over t-chunks bounds live ranges / imem; the
        # inner chunk is unrolled and flushed with one block store per chunk.
        n_chunks = T // t_chunk

        def chunk_body(ci, carry):
            h, c = carry
            t0 = pl.multiple_of(ci * t_chunk, t_chunk)
            gi_chunk = gi_scratch[:, pl.ds(t0, t_chunk), :]
            hs = []
            for k in range(t_chunk):
                h, c = step(gi_chunk[:, k, :], h, c)
                hs.append(h)
            hseq_ref[:, pl.ds(t0, t_chunk), :] = (
                jnp.stack(hs, axis=1).astype(hseq_ref.dtype))
            return h, c

        h, c = lax.fori_loop(0, n_chunks, chunk_body, (h, c))

    hfin_ref[...] = h
    cfin_ref[...] = c


def _pick_b_tile(B):
    """Largest multiple-of-8 divisor of B up to 64 (full batch if B <= 64)."""
    cap = 64
    if B <= cap:
        return B
    candidates = [d for d in range(8, cap + 1, 8) if B % d == 0]
    return max(candidates) if candidates else B


def _default_vmem_limit_bytes():
    phys = None
    try:
        info = pltpu.get_tpu_info()
        phys = getattr(info, "vmem_capacity_bytes", None)
    except Exception:
        phys = None
    if not phys:
        phys = 64 * 1024 * 1024          # conservative (v7x-sized) fallback
    # Leave ~1/8 headroom for Mosaic-internal scratch; cap per review:
    # ~112 MiB on 128-MiB v5e/v6e, ~56 MiB on 64-MiB v7x.
    return int(min(112 * 1024 * 1024, (phys * 7) // 8))


def lstm_with_input_cell_attention(x, params, *, hidden_size: int, r: int,
                                   b_tile=None,
                                   compute_dtype=jnp.bfloat16,
                                   out_dtype=jnp.float32,
                                   approx_recip: bool = False,
                                   max_unrolled_steps: int = 32,
                                   t_chunk=None,
                                   vmem_limit_bytes=None,
                                   single_buffer_weights: bool = True):
    """x: (B, T, D) float32.  Returns (hidden_seq (B,T,HS), (h_T, c_T))."""
    B, T, D = x.shape
    HS = hidden_size
    if b_tile is None:
        b_tile = _pick_b_tile(B)
    assert B % b_tile == 0, "batch must divide evenly into b_tile blocks"
    # NOTE: when b_tile < B it should be a multiple of 8 so the (b_tile, HS)
    #       final-state blocks satisfy the (8, 128) sublane constraint.
    grid = (B // b_tile,)

    if t_chunk is None:
        t_chunk = T if (T <= max_unrolled_steps or T % 8 != 0) else 8
    t_chunk = min(int(t_chunk), T)
    assert T % t_chunk == 0, "t_chunk must divide T"

    if vmem_limit_bytes is None:
        vmem_limit_bytes = _default_vmem_limit_bytes()

    cdt = jnp.dtype(compute_dtype)
    # x and the score-path weights stay f32 (scores feed an exp); only the
    # bulk matmul weights run in compute_dtype (f32 accumulation everywhere).
    xk = x.astype(jnp.float32)
    wih = params["w_iBarh"].astype(cdt)
    whh = params["w_hh"].astype(cdt)
    w1 = params["w1"].astype(jnp.float32)
    w2 = params["w2"].astype(jnp.float32)
    b1 = params["b1"].astype(jnp.float32).reshape(1, -1)
    b2 = params["b2"].astype(jnp.float32).reshape(1, -1)
    bias = params["bias"].astype(jnp.float32).reshape(1, -1)

    kernel = functools.partial(_lstm_attn_kernel, hidden_size=HS, r=r,
                               t_chunk=t_chunk, approx_recip=approx_recip)

    def _wspec(arr, mode):
        nd = arr.ndim
        if mode is None:
            return pl.BlockSpec(arr.shape, lambda i, _nd=nd: (0,) * _nd)
        return pl.BlockSpec(arr.shape, lambda i, _nd=nd: (0,) * _nd,
                            pipeline_mode=mode)

    def _build(weight_mode):
        in_specs = [
            pl.BlockSpec((b_tile, T, D), lambda i: (i, 0, 0)),   # x: B-tiled
            _wspec(w1, weight_mode), _wspec(b1, weight_mode),
            _wspec(w2, weight_mode), _wspec(b2, weight_mode),
            _wspec(wih, weight_mode), _wspec(whh, weight_mode),
            _wspec(bias, weight_mode),
        ]
        out_specs = (
            pl.BlockSpec((b_tile, T, HS), lambda i: (i, 0, 0)),
            pl.BlockSpec((b_tile, HS), lambda i: (i, 0)),
            pl.BlockSpec((b_tile, HS), lambda i: (i, 0)),
        )
        return pl.pallas_call(
            kernel,
            grid=grid,
            in_specs=in_specs,
            out_specs=out_specs,
            out_shape=(
                jax.ShapeDtypeStruct((B, T, HS), jnp.dtype(out_dtype)),
                jax.ShapeDtypeStruct((B, HS), jnp.float32),
                jax.ShapeDtypeStruct((B, HS), jnp.float32),
            ),
            scratch_shapes=[pltpu.VMEM((b_tile, T, 4 * HS), jnp.float32)],
            compiler_params=pltpu.CompilerParams(
                # Batch recurrences are independent -> shard the batch grid.
                # TODO(synk): on v7x verify with xprof that both TensorCores
                #             are active; if one is idle, switch this axis to
                #             pltpu.CORE_PARALLEL and keep grid >= 2.
                dimension_semantics=("parallel",),
                vmem_limit_bytes=vmem_limit_bytes,
            ),
        )

    args = (xk, w1, b1, w2, b2, wih, whh, bias)
    if single_buffer_weights:
        try:
            # Grid-invariant weight index_maps: single-buffer them so default
            # double-buffering doesn't duplicate W_iBarh / W_hh in VMEM.
            hseq, h_fin, c_fin = _build(pl.Buffered(1))(*args)
        except Exception:
            # TODO(synk): pl.Buffered(1) pipeline_mode unsupported on this
            #             jax version; fall back to default pipelining.
            hseq, h_fin, c_fin = _build(None)(*args)
    else:
        hseq, h_fin, c_fin = _build(None)(*args)
    return hseq, (h_fin, c_fin)


def _xavier_uniform(key, shape):
    fan_in, fan_out = shape
    bound = math.sqrt(6.0 / (fan_in + fan_out))
    return jax.random.uniform(key, shape, jnp.float32, -bound, bound)


def init_params(key, input_sz, hidden_sz, r, d_a):
    """Mirrors init_weights: xavier_uniform for >=2-D params, zeros for 1-D."""
    k1, k2, k3, k4 = jax.random.split(key, 4)
    return {
        "w_iBarh": _xavier_uniform(k1, (input_sz, hidden_sz * 4)),
        "w_hh":    _xavier_uniform(k2, (hidden_sz, hidden_sz * 4)),
        "bias":    jnp.zeros((hidden_sz * 4,), jnp.float32),
        "w1":      _xavier_uniform(k3, (input_sz, d_a)),
        "b1":      jnp.zeros((d_a,), jnp.float32),
        "w2":      _xavier_uniform(k4, (d_a, r)),
        "b2":      jnp.zeros((r,), jnp.float32),
    }


def _reference(x, params, hidden_size, r):
    """Pure-JAX reference mirroring the PyTorch forward loop exactly."""
    B, T, D = x.shape
    HS = hidden_size
    h = jnp.zeros((B, HS), jnp.float32)
    c = jnp.zeros((B, HS), jnp.float32)
    outs = []
    for t in range(T):
        H = x[:, :t + 1, :]
        s = jnp.tanh(H @ params["w1"] + params["b1"]) @ params["w2"] + params["b2"]
        att = jax.nn.softmax(s, axis=1)                      # softmax over time
        matrixM = jnp.einsum("btr,btd->brd", att, H)
        M = jnp.sum(matrixM, axis=1) / r
        gates = M @ params["w_iBarh"] + h @ params["w_hh"] + params["bias"]
        i_t = jax.nn.sigmoid(gates[:, :HS])
        f_t = jax.nn.sigmoid(gates[:, HS:2 * HS])
        g_t = jnp.tanh(gates[:, 2 * HS:3 * HS])
        o_t = jax.nn.sigmoid(gates[:, 3 * HS:])
        c = f_t * c + i_t * g_t
        h = o_t * jnp.tanh(c)
        outs.append(h)
    return jnp.stack(outs, axis=1), (h, c)


if __name__ == "__main__":
    B, T, D = 2, 8, 16
    HS, R, D_A = 32, 10, 30

    key = jax.random.PRNGKey(0)
    kx, kp, kx2 = jax.random.split(key, 3)
    x = jax.random.normal(kx, (B, T, D), jnp.float32)
    params = init_params(kp, D, HS, R, D_A)

    ref_seq, (ref_h, ref_c) = _reference(x, params, HS, R)

    # (1) exact path: f32 matmuls everywhere, fully-unrolled recurrence.
    seq, (h_t, c_t) = lstm_with_input_cell_attention(
        x, params, hidden_size=HS, r=R, compute_dtype=jnp.float32)
    jax.block_until_ready((seq, h_t, c_t))
    assert seq.shape == (B, T, HS)
    assert h_t.shape == (B, HS) and c_t.shape == (B, HS)
    assert jnp.allclose(seq, ref_seq, atol=1e-4, rtol=1e-4)
    assert jnp.allclose(h_t, ref_h, atol=1e-4, rtol=1e-4)
    assert jnp.allclose(c_t, ref_c, atol=1e-4, rtol=1e-4)

    # (2) default fast path: bf16 bulk matmuls (f32 scores / f32 accumulation).
    seq_b, (h_b, c_b) = lstm_with_input_cell_attention(
        x, params, hidden_size=HS, r=R)
    jax.block_until_ready((seq_b, h_b, c_b))
    assert jnp.allclose(seq_b, ref_seq, atol=6e-2, rtol=6e-2)
    assert jnp.allclose(h_b, ref_h, atol=6e-2, rtol=6e-2)

    # (3) chunked fori_loop recurrence path (longer T, forced chunking), f32.
    T2 = 24
    x2 = jax.random.normal(kx2, (B, T2, D), jnp.float32)
    ref2_seq, (ref2_h, ref2_c) = _reference(x2, params, HS, R)
    seq2, (h2, c2) = lstm_with_input_cell_attention(
        x2, params, hidden_size=HS, r=R, compute_dtype=jnp.float32,
        max_unrolled_steps=0)
    jax.block_until_ready((seq2, h2, c2))
    assert seq2.shape == (B, T2, HS)
    assert jnp.allclose(seq2, ref2_seq, atol=1e-4, rtol=1e-4)
    assert jnp.allclose(h2, ref2_h, atol=1e-4, rtol=1e-4)
    assert jnp.allclose(c2, ref2_c, atol=1e-4, rtol=1e-4)

    print("KERNEL_OK")
</pallas_src>

<mosaic_0001>
module attributes {stable_mosaic.version = 11 : i64} {
  func.func @_lstm_attn_kernel(%arg0: i32, %arg1: memref<2x8x16xf32, #tpu.memory_space<vmem>>, %arg2: memref<16x30xf32, #tpu.memory_space<vmem>>, %arg3: memref<1x30xf32, #tpu.memory_space<vmem>>, %arg4: memref<30x10xf32, #tpu.memory_space<vmem>>, %arg5: memref<1x10xf32, #tpu.memory_space<vmem>>, %arg6: memref<16x128xf32, #tpu.memory_space<vmem>>, %arg7: memref<32x128xf32, #tpu.memory_space<vmem>>, %arg8: memref<1x128xf32, #tpu.memory_space<vmem>>, %arg9: memref<2x8x32xf32, #tpu.memory_space<vmem>>, %arg10: memref<2x32xf32, #tpu.memory_space<vmem>>, %arg11: memref<2x32xf32, #tpu.memory_space<vmem>>, %arg12: memref<2x8x128xf32, #tpu.memory_space<vmem>>) attributes {dimension_semantics = [#tpu.dimension_semantics<parallel>], iteration_bounds = array<i64: 1>, scalar_prefetch = 0 : i64, scratch_operands = 1 : i64, tpu.core_type = #tpu.core_type<tc>, window_params = [{transform_indices = @transform_0, window_bounds = array<i64: 2, 8, 16>}, {pipeline_mode = #tpu.pipeline_mode<synchronous>, transform_indices = @transform_1, window_bounds = array<i64: 16, 30>}, {pipeline_mode = #tpu.pipeline_mode<synchronous>, transform_indices = @transform_2, window_bounds = array<i64: 1, 30>}, {pipeline_mode = #tpu.pipeline_mode<synchronous>, transform_indices = @transform_3, window_bounds = array<i64: 30, 10>}, {pipeline_mode = #tpu.pipeline_mode<synchronous>, transform_indices = @transform_4, window_bounds = array<i64: 1, 10>}, {pipeline_mode = #tpu.pipeline_mode<synchronous>, transform_indices = @transform_5, window_bounds = array<i64: 16, 128>}, {pipeline_mode = #tpu.pipeline_mode<synchronous>, transform_indices = @transform_6, window_bounds = array<i64: 32, 128>}, {pipeline_mode = #tpu.pipeline_mode<synchronous>, transform_indices = @transform_7, window_bounds = array<i64: 1, 128>}, {transform_indices = @transform_8, window_bounds = array<i64: 2, 8, 32>}, {transform_indices = @transform_9, window_bounds = array<i64: 2, 32>}, {transform_indices = @transform_10, window_bounds = array<i64: 2, 32>}]} {
    %c0 = arith.constant 0 : index
    %c0_0 = arith.constant 0 : index
    %c0_1 = arith.constant 0 : index
    %0 = vector.load %arg1[%c0, %c0_0, %c0_1] : memref<2x8x16xf32, #tpu.memory_space<vmem>>, vector<2x8x16xf32>
    %1 = vector.shape_cast %0 : vector<2x8x16xf32> to vector<16x16xf32>
    %c0_2 = arith.constant 0 : index
    %c0_3 = arith.constant 0 : index
    %2 = vector.load %arg2[%c0_2, %c0_3] : memref<16x30xf32, #tpu.memory_space<vmem>>, vector<16x30xf32>
    %cst = arith.constant dense<0.000000e+00> : vector<16x30xf32>
    %3 = tpu.matmul %1, %2, %cst {dimension_numbers = #tpu.dot_dimension_numbers<[1], [0], [0], [1], [0, 0, 1, 1], [], []>} : vector<16x16xf32>, vector<16x30xf32>, vector<16x30xf32> -> vector<16x30xf32>
    %c0_4 = arith.constant 0 : index
    %c0_5 = arith.constant 0 : index
    %4 = vector.load %arg3[%c0_4, %c0_5] : memref<1x30xf32, #tpu.memory_space<vmem>>, vector<1x30xf32>
    %5 = vector.broadcast %4 : vector<1x30xf32> to vector<16x30xf32>
    %6 = arith.addf %3, %5 : vector<16x30xf32>
    %7 = math.tanh %6 : vector<16x30xf32>
    %c0_6 = arith.constant 0 : index
    %c0_7 = arith.constant 0 : index
    %8 = vector.load %arg4[%c0_6, %c0_7] : memref<30x10xf32, #tpu.memory_space<vmem>>, vector<30x10xf32>
    %cst_8 = arith.constant dense<0.000000e+00> : vector<16x10xf32>
    %9 = tpu.matmul %7, %8, %cst_8 {dimension_numbers = #tpu.dot_dimension_numbers<[1], [0], [0], [1], [0, 0, 1, 1], [], []>} : vector<16x30xf32>, vector<30x10xf32>, vector<16x10xf32> -> vector<16x10xf32>
    %c0_9 = arith.constant 0 : index
    %c0_10 = arith.constant 0 : index
    %10 = vector.load %arg5[%c0_9, %c0_10] : memref<1x10xf32, #tpu.memory_space<vmem>>, vector<1x10xf32>
    %11 = vector.broadcast %10 : vector<1x10xf32> to vector<16x10xf32>
    %12 = arith.addf %9, %11 : vector<16x10xf32>
    %13 = vector.shape_cast %12 : vector<16x10xf32> to vector<2x8x10xf32>
    %cst_11 = arith.constant dense<0xFF800000> : vector<2x10xf32>
    %14 = vector.multi_reduction <maximumf>, %13, %cst_11 [1] : vector<2x8x10xf32> to vector<2x10xf32>
    %15 = vector.shape_cast %14 : vector<2x10xf32> to vector<2x1x10xf32>
    %16 = vector.broadcast %15 : vector<2x1x10xf32> to vector<2x8x10xf32>
    %17 = arith.subf %13, %16 : vector<2x8x10xf32>
    %18 = math.exp %17 : vector<2x8x10xf32>
    %cst_12 = arith.constant 0.000000e+00 : f32
    %19 = vector.broadcast %cst_12 : f32 to vector<2x1x10xf32>
    %20 = vector.extract_strided_slice %18 {offsets = [0, 0, 0], sizes = [2, 7, 10], strides = [1, 1, 1]} : vector<2x8x10xf32> to vector<2x7x10xf32>
    %21 = tpu.concatenate %19, %20 in 1 : vector<2x1x10xf32>, vector<2x7x10xf32> -> vector<2x8x10xf32>
    %22 = arith.addf %18, %21 : vector<2x8x10xf32>
    %cst_13 = arith.constant 0.000000e+00 : f32
    %23 = vector.broadcast %cst_13 : f32 to vector<2x2x10xf32>
    %24 = vector.extract_strided_slice %22 {offsets = [0, 0, 0], sizes = [2, 6, 10], strides = [1, 1, 1]} : vector<2x8x10xf32> to vector<2x6x10xf32>
    %25 = tpu.concatenate %23, %24 in 1 : vector<2x2x10xf32>, vector<2x6x10xf32> -> vector<2x8x10xf32>
    %26 = arith.addf %22, %25 : vector<2x8x10xf32>
    %cst_14 = arith.constant 0.000000e+00 : f32
    %27 = vector.broadcast %cst_14 : f32 to vector<2x4x10xf32>
    %28 = vector.extract_strided_slice %26 {offsets = [0, 0, 0], sizes = [2, 4, 10], strides = [1, 1, 1]} : vector<2x8x10xf32> to vector<2x4x10xf32>
    %29 = tpu.concatenate %27, %28 in 1 : vector<2x4x10xf32>, vector<2x4x10xf32> -> vector<2x8x10xf32>
    %30 = arith.addf %26, %29 : vector<2x8x10xf32>
    %cst_15 = arith.constant 1.000000e-30 : f32
    %31 = vector.broadcast %cst_15 : f32 to vector<2x8x10xf32>
    %32 = arith.maximumf %30, %31 : vector<2x8x10xf32>
    %cst_16 = arith.constant 1.000000e+00 : f32
    %33 = vector.broadcast %cst_16 : f32 to vector<2x8x10xf32>
    %34 = arith.divf %33, %32 : vector<2x8x10xf32>
    %35 = tpu.iota {dimensions = array<i32: 0>} : vector<8x8xi32>
    %36 = tpu.iota {dimensions = array<i32: 1>} : vector<8x8xi32>
    %37 = arith.cmpi sle, %36, %35 : vector<8x8xi32>
    "tpu.trace_start"() <{level = 10 : i32, message = "btr,bsr->bts"}> : () -> ()
    %cst_17 = arith.constant dense<0.000000e+00> : vector<2x8x8xf32>
    %38 = tpu.matmul %34, %18, %cst_17 {dimension_numbers = #tpu.dot_dimension_numbers<[2], [2], [1], [1], [0, 0, 0, 1, 1, 1], [0], [0]>} : vector<2x8x10xf32>, vector<2x8x10xf32>, vector<2x8x8xf32> -> vector<2x8x8xf32>
    "tpu.trace_stop"() : () -> ()
    %cst_18 = arith.constant 1.000000e-01 : f32
    %39 = vector.broadcast %cst_18 : f32 to vector<2x8x8xf32>
    %40 = arith.mulf %38, %39 : vector<2x8x8xf32>
    %41 = vector.shape_cast %37 : vector<8x8xi1> to vector<1x8x8xi1>
    %cst_19 = arith.constant 0.000000e+00 : f32
    %42 = vector.shape_cast %41 : vector<1x8x8xi1> to vector<1x8x8xi1>
    %43 = vector.broadcast %42 : vector<1x8x8xi1> to vector<2x8x8xi1>
    %44 = vector.broadcast %cst_19 : f32 to vector<2x8x8xf32>
    %45 = arith.select %43, %40, %44 : vector<2x8x8xi1>, vector<2x8x8xf32>
    "tpu.trace_start"() <{level = 10 : i32, message = "bts,bsd->btd"}> : () -> ()
    %cst_20 = arith.constant dense<0.000000e+00> : vector<2x8x16xf32>
    %46 = tpu.matmul %45, %0, %cst_20 {dimension_numbers = #tpu.dot_dimension_numbers<[2], [1], [1], [2], [0, 0, 0, 1, 1, 2], [0], [0]>} : vector<2x8x8xf32>, vector<2x8x16xf32>, vector<2x8x16xf32> -> vector<2x8x16xf32>
    "tpu.trace_stop"() : () -> ()
    %47 = vector.shape_cast %46 : vector<2x8x16xf32> to vector<16x16xf32>
    %c0_21 = arith.constant 0 : index
    %c0_22 = arith.constant 0 : index
    %48 = vector.load %arg6[%c0_21, %c0_22] : memref<16x128xf32, #tpu.memory_space<vmem>>, vector<16x128xf32>
    %cst_23 = arith.constant dense<0.000000e+00> : vector<16x128xf32>
    %49 = tpu.matmul %47, %48, %cst_23 {dimension_numbers = #tpu.dot_dimension_numbers<[1], [0], [0], [1], [0, 0, 1, 1], [], []>} : vector<16x16xf32>, vector<16x128xf32>, vector<16x128xf32> -> vector<16x128xf32>
    %c0_24 = arith.constant 0 : index
    %c0_25 = arith.constant 0 : index
    %50 = vector.load %arg8[%c0_24, %c0_25] : memref<1x128xf32, #tpu.memory_space<vmem>>, vector<1x128xf32>
    %51 = vector.broadcast %50 : vector<1x128xf32> to vector<16x128xf32>
    %52 = arith.addf %49, %51 : vector<16x128xf32>
    %53 = vector.shape_cast %52 : vector<16x128xf32> to vector<2x8x128xf32>
    %c0_26 = arith.constant 0 : index
    %c0_27 = arith.constant 0 : index
    %c0_28 = arith.constant 0 : index
    %54 = vector.load %arg12[%c0_26, %c0_27, %c0_28] : memref<2x8x128xf32, #tpu.memory_space<vmem>>, vector<2x8x128xf32>
    tpu.vector_store %arg12[%c0_26, %c0_27, %c0_28], %53 {strides = array<i32>} : memref<2x8x128xf32, #tpu.memory_space<vmem>>, vector<2x8x128xf32>,
    %c0_29 = arith.constant 0 : index
    %c0_30 = arith.constant 0 : index
    %55 = vector.load %arg7[%c0_29, %c0_30] : memref<32x128xf32, #tpu.memory_space<vmem>>, vector<32x128xf32>
    %cst_31 = arith.constant 0.000000e+00 : f32
    %56 = vector.broadcast %cst_31 : f32 to vector<2x32xf32>
    %cst_32 = arith.constant 0.000000e+00 : f32
    %57 = vector.broadcast %cst_32 : f32 to vector<2x32xf32>
    %c0_33 = arith.constant 0 : index
    %c0_34 = arith.constant 0 : index
    %c0_35 = arith.constant 0 : index
    %58 = vector.load %arg12[%c0_33, %c0_34, %c0_35] : memref<2x8x128xf32, #tpu.memory_space<vmem>>, vector<2x1x128xf32>
    %59 = vector.shape_cast %58 : vector<2x1x128xf32> to vector<2x128xf32>
    %cst_36 = arith.constant dense<0.000000e+00> : vector<2x128xf32>
    %60 = tpu.matmul %56, %55, %cst_36 {dimension_numbers = #tpu.dot_dimension_numbers<[1], [0], [0], [1], [0, 0, 1, 1], [], []>} : vector<2x32xf32>, vector<32x128xf32>, vector<2x128xf32> -> vector<2x128xf32>
    %61 = arith.addf %59, %60 : vector<2x128xf32>
    %62 = vector.extract_strided_slice %61 {offsets = [0, 0], sizes = [2, 32], strides = [1, 1]} : vector<2x128xf32> to vector<2x32xf32>
    %63 = arith.negf %62 : vector<2x32xf32>
    %64 = math.exp %63 : vector<2x32xf32>
    %cst_37 = arith.constant 1.000000e+00 : f32
    %65 = vector.broadcast %cst_37 : f32 to vector<2x32xf32>
    %66 = arith.addf %65, %64 : vector<2x32xf32>
    %67 = arith.divf %65, %66 : vector<2x32xf32>
    %68 = vector.extract_strided_slice %61 {offsets = [0, 32], sizes = [2, 32], strides = [1, 1]} : vector<2x128xf32> to vector<2x32xf32>
    %69 = arith.negf %68 : vector<2x32xf32>
    %70 = math.exp %69 : vector<2x32xf32>
    %cst_38 = arith.constant 1.000000e+00 : f32
    %71 = vector.broadcast %cst_38 : f32 to vector<2x32xf32>
    %72 = arith.addf %71, %70 : vector<2x32xf32>
    %73 = arith.divf %71, %72 : vector<2x32xf32>
    %74 = vector.extract_strided_slice %61 {offsets = [0, 64], sizes = [2, 32], strides = [1, 1]} : vector<2x128xf32> to vector<2x32xf32>
    %75 = math.tanh %74 : vector<2x32xf32>
    %76 = vector.extract_strided_slice %61 {offsets = [0, 96], sizes = [2, 32], strides = [1, 1]} : vector<2x128xf32> to vector<2x32xf32>
    %77 = arith.negf %76 : vector<2x32xf32>
    %78 = math.exp %77 : vector<2x32xf32>
    %cst_39 = arith.constant 1.000000e+00 : f32
    %79 = vector.broadcast %cst_39 : f32 to vector<2x32xf32>
    %80 = arith.addf %79, %78 : vector<2x32xf32>
    %81 = arith.divf %79, %80 : vector<2x32xf32>
    %82 = arith.mulf %73, %57 : vector<2x32xf32>
    %83 = arith.mulf %67, %75 : vector<2x32xf32>
    %84 = arith.addf %82, %83 : vector<2x32xf32>
    %85 = math.tanh %84 : vector<2x32xf32>
    %86 = arith.mulf %81, %85 : vector<2x32xf32>
    %c0_40 = arith.constant 0 : index
    %c1 = arith.constant 1 : index
    %c0_41 = arith.constant 0 : index
    %87 = vector.load %arg12[%c0_40, %c1, %c0_41] : memref<2x8x128xf32, #tpu.memory_space<vmem>>, vector<2x1x128xf32>
    %88 = vector.shape_cast %87 : vector<2x1x128xf32> to vector<2x128xf32>
    %cst_42 = arith.constant dense<0.000000e+00> : vector<2x128xf32>
    %89 = tpu.matmul %86, %55, %cst_42 {dimension_numbers = #tpu.dot_dimension_numbers<[1], [0], [0], [1], [0, 0, 1, 1], [], []>} : vector<2x32xf32>, vector<32x128xf32>, vector<2x128xf32> -> vector<2x128xf32>
    %90 = arith.addf %88, %89 : vector<2x128xf32>
    %91 = vector.extract_strided_slice %90 {offsets = [0, 0], sizes = [2, 32], strides = [1, 1]} : vector<2x128xf32> to vector<2x32xf32>
    %92 = arith.negf %91 : vector<2x32xf32>
    %93 = math.exp %92 : vector<2x32xf32>
    %cst_43 = arith.constant 1.000000e+00 : f32
    %94 = vector.broadcast %cst_43 : f32 to vector<2x32xf32>
    %95 = arith.addf %94, %93 : vector<2x32xf32>
    %96 = arith.divf %94, %95 : vector<2x32xf32>
    %97 = vector.extract_strided_slice %90 {offsets = [0, 32], sizes = [2, 32], strides = [1, 1]} : vector<2x128xf32> to vector<2x32xf32>
    %98 = arith.negf %97 : vector<2x32xf32>
    %99 = math.exp %98 : vector<2x32xf32>
    %cst_44 = arith.constant 1.000000e+00 : f32
    %100 = vector.broadcast %cst_44 : f32 to vector<2x32xf32>
    %101 = arith.addf %100, %99 : vector<2x32xf32>
    %102 = arith.divf %100, %101 : vector<2x32xf32>
    %103 = vector.extract_strided_slice %90 {offsets = [0, 64], sizes = [2, 32], strides = [1, 1]} : vector<2x128xf32> to vector<2x32xf32>
    %104 = math.tanh %103 : vector<2x32xf32>
    %105 = vector.extract_strided_slice %90 {offsets = [0, 96], sizes = [2, 32], strides = [1, 1]} : vector<2x128xf32> to vector<2x32xf32>
    %106 = arith.negf %105 : vector<2x32xf32>
    %107 = math.exp %106 : vector<2x32xf32>
    %cst_45 = arith.constant 1.000000e+00 : f32
    %108 = vector.broadcast %cst_45 : f32 to vector<2x32xf32>
    %109 = arith.addf %108, %107 : vector<2x32xf32>
    %110 = arith.divf %108, %109 : vector<2x32xf32>
    %111 = arith.mulf %102, %84 : vector<2x32xf32>
    %112 = arith.mulf %96, %104 : vector<2x32xf32>
    %113 = arith.addf %111, %112 : vector<2x32xf32>
    %114 = math.tanh %113 : vector<2x32xf32>
    %115 = arith.mulf %110, %114 : vector<2x32xf32>
    %c0_46 = arith.constant 0 : index
    %c2 = arith.constant 2 : index
    %c0_47 = arith.constant 0 : index
    %116 = vector.load %arg12[%c0_46, %c2, %c0_47] : memref<2x8x128xf32, #tpu.memory_space<vmem>>, vector<2x1x128xf32>
    %117 = vector.shape_cast %116 : vector<2x1x128xf32> to vector<2x128xf32>
    %cst_48 = arith.constant dense<0.000000e+00> : vector<2x128xf32>
    %118 = tpu.matmul %115, %55, %cst_48 {dimension_numbers = #tpu.dot_dimension_numbers<[1], [0], [0], [1], [0, 0, 1, 1], [], []>} : vector<2x32xf32>, vector<32x128xf32>, vector<2x128xf32> -> vector<2x128xf32>
    %119 = arith.addf %117, %118 : vector<2x128xf32>
    %120 = vector.extract_strided_slice %119 {offsets = [0, 0], sizes = [2, 32], strides = [1, 1]} : vector<2x128xf32> to vector<2x32xf32>
    %121 = arith.negf %120 : vector<2x32xf32>
    %122 = math.exp %121 : vector<2x32xf32>
    %cst_49 = arith.constant 1.000000e+00 : f32
    %123 = vector.broadcast %cst_49 : f32 to vector<2x32xf32>
    %124 = arith.addf %123, %122 : vector<2x32xf32>
    %125 = arith.divf %123, %124 : vector<2x32xf32>
    %126 = vector.extract_strided_slice %119 {offsets = [0, 32], sizes = [2, 32], strides = [1, 1]} : vector<2x128xf32> to vector<2x32xf32>
    %127 = arith.negf %126 : vector<2x32xf32>
    %128 = math.exp %127 : vector<2x32xf32>
    %cst_50 = arith.constant 1.000000e+00 : f32
    %129 = vector.broadcast %cst_50 : f32 to vector<2x32xf32>
    %130 = arith.addf %129, %128 : vector<2x32xf32>
    %131 = arith.divf %129, %130 : vector<2x32xf32>
    %132 = vector.extract_strided_slice %119 {offsets = [0, 64], sizes = [2, 32], strides = [1, 1]} : vector<2x128xf32> to vector<2x32xf32>
    %133 = math.tanh %132 : vector<2x32xf32>
    %134 = vector.extract_strided_slice %119 {offsets = [0, 96], sizes = [2, 32], strides = [1, 1]} : vector<2x128xf32> to vector<2x32xf32>
    %135 = arith.negf %134 : vector<2x32xf32>
    %136 = math.exp %135 : vector<2x32xf32>
    %cst_51 = arith.constant 1.000000e+00 : f32
    %137 = vector.broadcast %cst_51 : f32 to vector<2x32xf32>
    %138 = arith.addf %137, %136 : vector<2x32xf32>
    %139 = arith.divf %137, %138 : vector<2x32xf32>
    %140 = arith.mulf %131, %113 : vector<2x32xf32>
    %141 = arith.mulf %125, %133 : vector<2x32xf32>
    %142 = arith.addf %140, %141 : vector<2x32xf32>
    %143 = math.tanh %142 : vector<2x32xf32>
    %144 = arith.mulf %139, %143 : vector<2x32xf32>
    %c0_52 = arith.constant 0 : index
    %c3 = arith.constant 3 : index
    %c0_53 = arith.constant 0 : index
    %145 = vector.load %arg12[%c0_52, %c3, %c0_53] : memref<2x8x128xf32, #tpu.memory_space<vmem>>, vector<2x1x128xf32>
    %146 = vector.shape_cast %145 : vector<2x1x128xf32> to vector<2x128xf32>
    %cst_54 = arith.constant dense<0.000000e+00> : vector<2x128xf32>
    %147 = tpu.matmul %144, %55, %cst_54 {dimension_numbers = #tpu.dot_dimension_numbers<[1], [0], [0], [1], [0, 0, 1, 1], [], []>} : vector<2x32xf32>, vector<32x128xf32>, vector<2x128xf32> -> vector<2x128xf32>
    %148 = arith.addf %146, %147 : vector<2x128xf32>
    %149 = vector.extract_strided_slice %148 {offsets = [0, 0], sizes = [2, 32], strides = [1, 1]} : vector<2x128xf32> to vector<2x32xf32>
    %150 = arith.negf %149 : vector<2x32xf32>
    %151 = math.exp %150 : vector<2x32xf32>
    %cst_55 = arith.constant 1.000000e+00 : f32
    %152 = vector.broadcast %cst_55 : f32 to vector<2x32xf32>
    %153 = arith.addf %152, %151 : vector<2x32xf32>
    %154 = arith.divf %152, %153 : vector<2x32xf32>
    %155 = vector.extract_strided_slice %148 {offsets = [0, 32], sizes = [2, 32], strides = [1, 1]} : vector<2x128xf32> to vector<2x32xf32>
    %156 = arith.negf %155 : vector<2x32xf32>
    %157 = math.exp %156 : vector<2x32xf32>
    %cst_56 = arith.constant 1.000000e+00 : f32
    %158 = vector.broadcast %cst_56 : f32 to vector<2x32xf32>
    %159 = arith.addf %158, %157 : vector<2x32xf32>
    %160 = arith.divf %158, %159 : vector<2x32xf32>
    %161 = vector.extract_strided_slice %148 {offsets = [0, 64], sizes = [2, 32], strides = [1, 1]} : vector<2x128xf32> to vector<2x32xf32>
    %162 = math.tanh %161 : vector<2x32xf32>
    %163 = vector.extract_strided_slice %148 {offsets = [0, 96], sizes = [2, 32], strides = [1, 1]} : vector<2x128xf32> to vector<2x32xf32>
    %164 = arith.negf %163 : vector<2x32xf32>
    %165 = math.exp %164 : vector<2x32xf32>
    %cst_57 = arith.constant 1.000000e+00 : f32
    %166 = vector.broadcast %cst_57 : f32 to vector<2x32xf32>
    %167 = arith.addf %166, %165 : vector<2x32xf32>
    %168 = arith.divf %166, %167 : vector<2x32xf32>
    %169 = arith.mulf %160, %142 : vector<2x32xf32>
    %170 = arith.mulf %154, %162 : vector<2x32xf32>
    %171 = arith.addf %169, %170 : vector<2x32xf32>
    %172 = math.tanh %171 : vector<2x32xf32>
    %173 = arith.mulf %168, %172 : vector<2x32xf32>
    %c0_58 = arith.constant 0 : index
    %c4 = arith.constant 4 : index
    %c0_59 = arith.constant 0 : index
    %174 = vector.load %arg12[%c0_58, %c4, %c0_59] : memref<2x8x128xf32, #tpu.memory_space<vmem>>, vector<2x1x128xf32>
    %175 = vector.shape_cast %174 : vector<2x1x128xf32> to vector<2x128xf32>
    %cst_60 = arith.constant dense<0.000000e+00> : vector<2x128xf32>
    %176 = tpu.matmul %173, %55, %cst_60 {dimension_numbers = #tpu.dot_dimension_numbers<[1], [0], [0], [1], [0, 0, 1, 1], [], []>} : vector<2x32xf32>, vector<32x128xf32>, vector<2x128xf32> -> vector<2x128xf32>
    %177 = arith.addf %175, %176 : vector<2x128xf32>
    %178 = vector.extract_strided_slice %177 {offsets = [0, 0], sizes = [2, 32], strides = [1, 1]} : vector<2x128xf32> to vector<2x32xf32>
    %179 = arith.negf %178 : vector<2x32xf32>
    %180 = math.exp %179 : vector<2x32xf32>
    %cst_61 = arith.constant 1.000000e+00 : f32
    %181 = vector.broadcast %cst_61 : f32 to vector<2x32xf32>
    %182 = arith.addf %181, %180 : vector<2x32xf32>
    %183 = arith.divf %181, %182 : vector<2x32xf32>
    %184 = vector.extract_strided_slice %177 {offsets = [0, 32], sizes = [2, 32], strides = [1, 1]} : vector<2x128xf32> to vector<2x32xf32>
    %185 = arith.negf %184 : vector<2x32xf32>
    %186 = math.exp %185 : vector<2x32xf32>
    %cst_62 = arith.constant 1.000000e+00 : f32
    %187 = vector.broadcast %cst_62 : f32 to vector<2x32xf32>
    %188 = arith.addf %187, %186 : vector<2x32xf32>
    %189 = arith.divf %187, %188 : vector<2x32xf32>
    %190 = vector.extract_strided_slice %177 {offsets = [0, 64], sizes = [2, 32], strides = [1, 1]} : vector<2x128xf32> to vector<2x32xf32>
    %191 = math.tanh %190 : vector<2x32xf32>
    %192 = vector.extract_strided_slice %177 {offsets = [0, 96], sizes = [2, 32], strides = [1, 1]} : vector<2x128xf32> to vector<2x32xf32>
    %193 = arith.negf %192 : vector<2x32xf32>
    %194 = math.exp %193 : vector<2x32xf32>
    %cst_63 = arith.constant 1.000000e+00 : f32
    %195 = vector.broadcast %cst_63 : f32 to vector<2x32xf32>
    %196 = arith.addf %195, %194 : vector<2x32xf32>
    %197 = arith.divf %195, %196 : vector<2x32xf32>
    %198 = arith.mulf %189, %171 : vector<2x32xf32>
    %199 = arith.mulf %183, %191 : vector<2x32xf32>
    %200 = arith.addf %198, %199 : vector<2x32xf32>
    %201 = math.tanh %200 : vector<2x32xf32>
    %202 = arith.mulf %197, %201 : vector<2x32xf32>
    %c0_64 = arith.constant 0 : index
    %c5 = arith.constant 5 : index
    %c0_65 = arith.constant 0 : index
    %203 = vector.load %arg12[%c0_64, %c5, %c0_65] : memref<2x8x128xf32, #tpu.memory_space<vmem>>, vector<2x1x128xf32>
    %204 = vector.shape_cast %203 : vector<2x1x128xf32> to vector<2x128xf32>
    %cst_66 = arith.constant dense<0.000000e+00> : vector<2x128xf32>
    %205 = tpu.matmul %202, %55, %cst_66 {dimension_numbers = #tpu.dot_dimension_numbers<[1], [0], [0], [1], [0, 0, 1, 1], [], []>} : vector<2x32xf32>, vector<32x128xf32>, vector<2x128xf32> -> vector<2x128xf32>
    %206 = arith.addf %204, %205 : vector<2x128xf32>
    %207 = vector.extract_strided_slice %206 {offsets = [0, 0], sizes = [2, 32], strides = [1, 1]} : vector<2x128xf32> to vector<2x32xf32>
    %208 = arith.negf %207 : vector<2x32xf32>
    %209 = math.exp %208 : vector<2x32xf32>
    %cst_67 = arith.constant 1.000000e+00 : f32
    %210 = vector.broadcast %cst_67 : f32 to vector<2x32xf32>
    %211 = arith.addf %210, %209 : vector<2x32xf32>
    %212 = arith.divf %210, %211 : vector<2x32xf32>
    %213 = vector.extract_strided_slice %206 {offsets = [0, 32], sizes = [2, 32], strides = [1, 1]} : vector<2x128xf32> to vector<2x32xf32>
    %214 = arith.negf %213 : vector<2x32xf32>
    %215 = math.exp %214 : vector<2x32xf32>
    %cst_68 = arith.constant 1.000000e+00 : f32
    %216 = vector.broadcast %cst_68 : f32 to vector<2x32xf32>
    %217 = arith.addf %216, %215 : vector<2x32xf32>
    %218 = arith.divf %216, %217 : vector<2x32xf32>
    %219 = vector.extract_strided_slice %206 {offsets = [0, 64], sizes = [2, 32], strides = [1, 1]} : vector<2x128xf32> to vector<2x32xf32>
    %220 = math.tanh %219 : vector<2x32xf32>
    %221 = vector.extract_strided_slice %206 {offsets = [0, 96], sizes = [2, 32], strides = [1, 1]} : vector<2x128xf32> to vector<2x32xf32>
    %222 = arith.negf %221 : vector<2x32xf32>
    %223 = math.exp %222 : vector<2x32xf32>
    %cst_69 = arith.constant 1.000000e+00 : f32
    %224 = vector.broadcast %cst_69 : f32 to vector<2x32xf32>
    %225 = arith.addf %224, %223 : vector<2x32xf32>
    %226 = arith.divf %224, %225 : vector<2x32xf32>
    %227 = arith.mulf %218, %200 : vector<2x32xf32>
    %228 = arith.mulf %212, %220 : vector<2x32xf32>
    %229 = arith.addf %227, %228 : vector<2x32xf32>
    %230 = math.tanh %229 : vector<2x32xf32>
    %231 = arith.mulf %226, %230 : vector<2x32xf32>
    %c0_70 = arith.constant 0 : index
    %c6 = arith.constant 6 : index
    %c0_71 = arith.constant 0 : index
    %232 = vector.load %arg12[%c0_70, %c6, %c0_71] : memref<2x8x128xf32, #tpu.memory_space<vmem>>, vector<2x1x128xf32>
    %233 = vector.shape_cast %232 : vector<2x1x128xf32> to vector<2x128xf32>
    %cst_72 = arith.constant dense<0.000000e+00> : vector<2x128xf32>
    %234 = tpu.matmul %231, %55, %cst_72 {dimension_numbers = #tpu.dot_dimension_numbers<[1], [0], [0], [1], [0, 0, 1, 1], [], []>} : vector<2x32xf32>, vector<32x128xf32>, vector<2x128xf32> -> vector<2x128xf32>
    %235 = arith.addf %233, %234 : vector<2x128xf32>
    %236 = vector.extract_strided_slice %235 {offsets = [0, 0], sizes = [2, 32], strides = [1, 1]} : vector<2x128xf32> to vector<2x32xf32>
    %237 = arith.negf %236 : vector<2x32xf32>
    %238 = math.exp %237 : vector<2x32xf32>
    %cst_73 = arith.constant 1.000000e+00 : f32
    %239 = vector.broadcast %cst_73 : f32 to vector<2x32xf32>
    %240 = arith.addf %239, %238 : vector<2x32xf32>
    %241 = arith.divf %239, %240 : vector<2x32xf32>
    %242 = vector.extract_strided_slice %235 {offsets = [0, 32], sizes = [2, 32], strides = [1, 1]} : vector<2x128xf32> to vector<2x32xf32>
    %243 = arith.negf %242 : vector<2x32xf32>
    %244 = math.exp %243 : vector<2x32xf32>
    %cst_74 = arith.constant 1.000000e+00 : f32
    %245 = vector.broadcast %cst_74 : f32 to vector<2x32xf32>
    %246 = arith.addf %245, %244 : vector<2x32xf32>
    %247 = arith.divf %245, %246 : vector<2x32xf32>
    %248 = vector.extract_strided_slice %235 {offsets = [0, 64], sizes = [2, 32], strides = [1, 1]} : vector<2x128xf32> to vector<2x32xf32>
    %249 = math.tanh %248 : vector<2x32xf32>
    %250 = vector.extract_strided_slice %235 {offsets = [0, 96], sizes = [2, 32], strides = [1, 1]} : vector<2x128xf32> to vector<2x32xf32>
    %251 = arith.negf %250 : vector<2x32xf32>
    %252 = math.exp %251 : vector<2x32xf32>
    %cst_75 = arith.constant 1.000000e+00 : f32
    %253 = vector.broadcast %cst_75 : f32 to vector<2x32xf32>
    %254 = arith.addf %253, %252 : vector<2x32xf32>
    %255 = arith.divf %253, %254 : vector<2x32xf32>
    %256 = arith.mulf %247, %229 : vector<2x32xf32>
    %257 = arith.mulf %241, %249 : vector<2x32xf32>
    %258 = arith.addf %256, %257 : vector<2x32xf32>
    %259 = math.tanh %258 : vector<2x32xf32>
    %260 = arith.mulf %255, %259 : vector<2x32xf32>
    %c0_76 = arith.constant 0 : index
    %c7 = arith.constant 7 : index
    %c0_77 = arith.constant 0 : index
    %261 = vector.load %arg12[%c0_76, %c7, %c0_77] : memref<2x8x128xf32, #tpu.memory_space<vmem>>, vector<2x1x128xf32>
    %262 = vector.shape_cast %261 : vector<2x1x128xf32> to vector<2x128xf32>
    %cst_78 = arith.constant dense<0.000000e+00> : vector<2x128xf32>
    %263 = tpu.matmul %260, %55, %cst_78 {dimension_numbers = #tpu.dot_dimension_numbers<[1], [0], [0], [1], [0, 0, 1, 1], [], []>} : vector<2x32xf32>, vector<32x128xf32>, vector<2x128xf32> -> vector<2x128xf32>
    %264 = arith.addf %262, %263 : vector<2x128xf32>
    %265 = vector.extract_strided_slice %264 {offsets = [0, 0], sizes = [2, 32], strides = [1, 1]} : vector<2x128xf32> to vector<2x32xf32>
    %266 = arith.negf %265 : vector<2x32xf32>
    %267 = math.exp %266 : vector<2x32xf32>
    %cst_79 = arith.constant 1.000000e+00 : f32
    %268 = vector.broadcast %cst_79 : f32 to vector<2x32xf32>
    %269 = arith.addf %268, %267 : vector<2x32xf32>
    %270 = arith.divf %268, %269 : vector<2x32xf32>
    %271 = vector.extract_strided_slice %264 {offsets = [0, 32], sizes = [2, 32], strides = [1, 1]} : vector<2x128xf32> to vector<2x32xf32>
    %272 = arith.negf %271 : vector<2x32xf32>
    %273 = math.exp %272 : vector<2x32xf32>
    %cst_80 = arith.constant 1.000000e+00 : f32
    %274 = vector.broadcast %cst_80 : f32 to vector<2x32xf32>
    %275 = arith.addf %274, %273 : vector<2x32xf32>
    %276 = arith.divf %274, %275 : vector<2x32xf32>
    %277 = vector.extract_strided_slice %264 {offsets = [0, 64], sizes = [2, 32], strides = [1, 1]} : vector<2x128xf32> to vector<2x32xf32>
    %278 = math.tanh %277 : vector<2x32xf32>
    %279 = vector.extract_strided_slice %264 {offsets = [0, 96], sizes = [2, 32], strides = [1, 1]} : vector<2x128xf32> to vector<2x32xf32>
    %280 = arith.negf %279 : vector<2x32xf32>
    %281 = math.exp %280 : vector<2x32xf32>
    %cst_81 = arith.constant 1.000000e+00 : f32
    %282 = vector.broadcast %cst_81 : f32 to vector<2x32xf32>
    %283 = arith.addf %282, %281 : vector<2x32xf32>
    %284 = arith.divf %282, %283 : vector<2x32xf32>
    %285 = arith.mulf %276, %258 : vector<2x32xf32>
    %286 = arith.mulf %270, %278 : vector<2x32xf32>
    %287 = arith.addf %285, %286 : vector<2x32xf32>
    %288 = math.tanh %287 : vector<2x32xf32>
    %289 = arith.mulf %284, %288 : vector<2x32xf32>
    %290 = vector.shape_cast %86 : vector<2x32xf32> to vector<2x1x32xf32>
    %291 = vector.shape_cast %115 : vector<2x32xf32> to vector<2x1x32xf32>
    %292 = vector.shape_cast %144 : vector<2x32xf32> to vector<2x1x32xf32>
    %293 = vector.shape_cast %173 : vector<2x32xf32> to vector<2x1x32xf32>
    %294 = vector.shape_cast %202 : vector<2x32xf32> to vector<2x1x32xf32>
    %295 = vector.shape_cast %231 : vector<2x32xf32> to vector<2x1x32xf32>
    %296 = vector.shape_cast %260 : vector<2x32xf32> to vector<2x1x32xf32>
    %297 = vector.shape_cast %289 : vector<2x32xf32> to vector<2x1x32xf32>
    %298 = tpu.concatenate %290, %291, %292, %293, %294, %295, %296, %297 in 1 : vector<2x1x32xf32>, vector<2x1x32xf32>, vector<2x1x32xf32>, vector<2x1x32xf32>, vector<2x1x32xf32>, vector<2x1x32xf32>, vector<2x1x32xf32>, vector<2x1x32xf32> -> vector<2x8x32xf32>
    %c0_82 = arith.constant 0 : index
    %c0_83 = arith.constant 0 : index
    %c0_84 = arith.constant 0 : index
    %299 = vector.load %arg9[%c0_82, %c0_83, %c0_84] : memref<2x8x32xf32, #tpu.memory_space<vmem>>, vector<2x8x32xf32>
    tpu.vector_store %arg9[%c0_82, %c0_83, %c0_84], %298 {strides = array<i32>} : memref<2x8x32xf32, #tpu.memory_space<vmem>>, vector<2x8x32xf32>,
    %c0_85 = arith.constant 0 : index
    %c0_86 = arith.constant 0 : index
    %300 = vector.load %arg10[%c0_85, %c0_86] : memref<2x32xf32, #tpu.memory_space<vmem>>, vector<2x32xf32>
    tpu.vector_store %arg10[%c0_85, %c0_86], %289 {strides = array<i32>} : memref<2x32xf32, #tpu.memory_space<vmem>>, vector<2x32xf32>,
    %c0_87 = arith.constant 0 : index
    %c0_88 = arith.constant 0 : index
    %301 = vector.load %arg11[%c0_87, %c0_88] : memref<2x32xf32, #tpu.memory_space<vmem>>, vector<2x32xf32>
    tpu.vector_store %arg11[%c0_87, %c0_88], %287 {strides = array<i32>} : memref<2x32xf32, #tpu.memory_space<vmem>>, vector<2x32xf32>,
    return
  }
  func.func @transform_0(%arg0: i32) -> (i32, i32, i32) {
    %c0_i32 = arith.constant 0 : i32
    %c0_i32_0 = arith.constant 0 : i32
    %c0_i32_1 = arith.constant 0 : i32
    return %arg0, %c0_i32, %c0_i32_0 : i32, i32, i32
  }
  func.func @transform_1(%arg0: i32) -> (i32, i32) {
    %c0_i32 = arith.constant 0 : i32
    %c0_i32_0 = arith.constant 0 : i32
    %c0_i32_1 = arith.constant 0 : i32
    return %c0_i32, %c0_i32_0 : i32, i32
  }
  func.func @transform_2(%arg0: i32) -> (i32, i32) {
    %c0_i32 = arith.constant 0 : i32
    %c0_i32_0 = arith.constant 0 : i32
    %c0_i32_1 = arith.constant 0 : i32
    return %c0_i32, %c0_i32_0 : i32, i32
  }
  func.func @transform_3(%arg0: i32) -> (i32, i32) {
    %c0_i32 = arith.constant 0 : i32
    %c0_i32_0 = arith.constant 0 : i32
    %c0_i32_1 = arith.constant 0 : i32
    return %c0_i32, %c0_i32_0 : i32, i32
  }
  func.func @transform_4(%arg0: i32) -> (i32, i32) {
    %c0_i32 = arith.constant 0 : i32
    %c0_i32_0 = arith.constant 0 : i32
    %c0_i32_1 = arith.constant 0 : i32
    return %c0_i32, %c0_i32_0 : i32, i32
  }
  func.func @transform_5(%arg0: i32) -> (i32, i32) {
    %c0_i32 = arith.constant 0 : i32
    %c0_i32_0 = arith.constant 0 : i32
    %c0_i32_1 = arith.constant 0 : i32
    return %c0_i32, %c0_i32_0 : i32, i32
  }
  func.func @transform_6(%arg0: i32) -> (i32, i32) {
    %c0_i32 = arith.constant 0 : i32
    %c0_i32_0 = arith.constant 0 : i32
    %c0_i32_1 = arith.constant 0 : i32
    return %c0_i32, %c0_i32_0 : i32, i32
  }
  func.func @transform_7(%arg0: i32) -> (i32, i32) {
    %c0_i32 = arith.constant 0 : i32
    %c0_i32_0 = arith.constant 0 : i32
    %c0_i32_1 = arith.constant 0 : i32
    return %c0_i32, %c0_i32_0 : i32, i32
  }
  func.func @transform_8(%arg0: i32) -> (i32, i32, i32) {
    %c0_i32 = arith.constant 0 : i32
    %c0_i32_0 = arith.constant 0 : i32
    %c0_i32_1 = arith.constant 0 : i32
    return %arg0, %c0_i32, %c0_i32_0 : i32, i32, i32
  }
  func.func @transform_9(%arg0: i32) -> (i32, i32) {
    %c0_i32 = arith.constant 0 : i32
    %c0_i32_0 = arith.constant 0 : i32
    return %arg0, %c0_i32 : i32, i32
  }
  func.func @transform_10(%arg0: i32) -> (i32, i32) {
    %c0_i32 = arith.constant 0 : i32
    %c0_i32_0 = arith.constant 0 : i32
    return %arg0, %c0_i32 : i32, i32
  }
}

module attributes {stable_mosaic.version = 11 : i64} {
  func.func @_lstm_attn_kernel(%arg0: i32, %arg1: memref<2x8x16xf32, #tpu.memory_space<vmem>>, %arg2: memref<16x30xf32, #tpu.memory_space<vmem>>, %arg3: memref<1x30xf32, #tpu.memory_space<vmem>>, %arg4: memref<30x10xf32, #tpu.memory_space<vmem>>, %arg5: memref<1x10xf32, #tpu.memory_space<vmem>>, %arg6: memref<16x128xf32, #tpu.memory_space<vmem>>, %arg7: memref<32x128xf32, #tpu.memory_space<vmem>>, %arg8: memref<1x128xf32, #tpu.memory_space<vmem>>, %arg9: memref<2x8x32xf32, #tpu.memory_space<vmem>>, %arg10: memref<2x32xf32, #tpu.memory_space<vmem>>, %arg11: memref<2x32xf32, #tpu.memory_space<vmem>>, %arg12: memref<2x8x128xf32, #tpu.memory_space<vmem>>) attributes {dimension_semantics = [#tpu.dimension_semantics<parallel>], iteration_bounds = array<i64: 1>, scalar_prefetch = 0 : i64, scratch_operands = 1 : i64, tpu.core_type = #tpu.core_type<tc>, window_params = [{transform_indices = @transform_0, window_bounds = array<i64: 2, 8, 16>}, {pipeline_mode = #tpu.pipeline_mode<synchronous>, transform_indices = @transform_1, window_bounds = array<i64: 16, 30>}, {pipeline_mode = #tpu.pipeline_mode<synchronous>, transform_indices = @transform_2, window_bounds = array<i64: 1, 30>}, {pipeline_mode = #tpu.pipeline_mode<synchronous>, transform_indices = @transform_3, window_bounds = array<i64: 30, 10>}, {pipeline_mode = #tpu.pipeline_mode<synchronous>, transform_indices = @transform_4, window_bounds = array<i64: 1, 10>}, {pipeline_mode = #tpu.pipeline_mode<synchronous>, transform_indices = @transform_5, window_bounds = array<i64: 16, 128>}, {pipeline_mode = #tpu.pipeline_mode<synchronous>, transform_indices = @transform_6, window_bounds = array<i64: 32, 128>}, {pipeline_mode = #tpu.pipeline_mode<synchronous>, transform_indices = @transform_7, window_bounds = array<i64: 1, 128>}, {transform_indices = @transform_8, window_bounds = array<i64: 2, 8, 32>}, {transform_indices = @transform_9, window_bounds = array<i64: 2, 32>}, {transform_indices = @transform_10, window_bounds = array<i64: 2, 32>}]} {
    %c0 = arith.constant 0 : index
    %c0_0 = arith.constant 0 : index
    %c0_1 = arith.constant 0 : index
    %0 = vector.load %arg1[%c0, %c0_0, %c0_1] : memref<2x8x16xf32, #tpu.memory_space<vmem>>, vector<2x8x16xf32>
    %1 = vector.shape_cast %0 : vector<2x8x16xf32> to vector<16x16xf32>
    %c0_2 = arith.constant 0 : index
    %c0_3 = arith.constant 0 : index
    %2 = vector.load %arg2[%c0_2, %c0_3] : memref<16x30xf32, #tpu.memory_space<vmem>>, vector<16x30xf32>
    %cst = arith.constant dense<0.000000e+00> : vector<16x30xf32>
    %3 = tpu.matmul %1, %2, %cst {dimension_numbers = #tpu.dot_dimension_numbers<[1], [0], [0], [1], [0, 0, 1, 1], [], []>} : vector<16x16xf32>, vector<16x30xf32>, vector<16x30xf32> -> vector<16x30xf32>
    %c0_4 = arith.constant 0 : index
    %c0_5 = arith.constant 0 : index
    %4 = vector.load %arg3[%c0_4, %c0_5] : memref<1x30xf32, #tpu.memory_space<vmem>>, vector<1x30xf32>
    %5 = vector.broadcast %4 : vector<1x30xf32> to vector<16x30xf32>
    %6 = arith.addf %3, %5 : vector<16x30xf32>
    %7 = math.tanh %6 : vector<16x30xf32>
    %c0_6 = arith.constant 0 : index
    %c0_7 = arith.constant 0 : index
    %8 = vector.load %arg4[%c0_6, %c0_7] : memref<30x10xf32, #tpu.memory_space<vmem>>, vector<30x10xf32>
    %cst_8 = arith.constant dense<0.000000e+00> : vector<16x10xf32>
    %9 = tpu.matmul %7, %8, %cst_8 {dimension_numbers = #tpu.dot_dimension_numbers<[1], [0], [0], [1], [0, 0, 1, 1], [], []>} : vector<16x30xf32>, vector<30x10xf32>, vector<16x10xf32> -> vector<16x10xf32>
    %c0_9 = arith.constant 0 : index
    %c0_10 = arith.constant 0 : index
    %10 = vector.load %arg5[%c0_9, %c0_10] : memref<1x10xf32, #tpu.memory_space<vmem>>, vector<1x10xf32>
    %11 = vector.broadcast %10 : vector<1x10xf32> to vector<16x10xf32>
    %12 = arith.addf %9, %11 : vector<16x10xf32>
    %13 = vector.shape_cast %12 : vector<16x10xf32> to vector<2x8x10xf32>
    %cst_11 = arith.constant dense<0xFF800000> : vector<2x10xf32>
    %14 = vector.multi_reduction <maximumf>, %13, %cst_11 [1] : vector<2x8x10xf32> to vector<2x10xf32>
    %15 = vector.shape_cast %14 : vector<2x10xf32> to vector<2x1x10xf32>
    %16 = vector.broadcast %15 : vector<2x1x10xf32> to vector<2x8x10xf32>
    %17 = arith.subf %13, %16 : vector<2x8x10xf32>
    %18 = math.exp %17 : vector<2x8x10xf32>
    %cst_12 = arith.constant 0.000000e+00 : f32
    %19 = vector.broadcast %cst_12 : f32 to vector<2x1x10xf32>
    %20 = vector.extract_strided_slice %18 {offsets = [0, 0, 0], sizes = [2, 7, 10], strides = [1, 1, 1]} : vector<2x8x10xf32> to vector<2x7x10xf32>
    %21 = tpu.concatenate %19, %20 in 1 : vector<2x1x10xf32>, vector<2x7x10xf32> -> vector<2x8x10xf32>
    %22 = arith.addf %18, %21 : vector<2x8x10xf32>
    %cst_13 = arith.constant 0.000000e+00 : f32
    %23 = vector.broadcast %cst_13 : f32 to vector<2x2x10xf32>
    %24 = vector.extract_strided_slice %22 {offsets = [0, 0, 0], sizes = [2, 6, 10], strides = [1, 1, 1]} : vector<2x8x10xf32> to vector<2x6x10xf32>
    %25 = tpu.concatenate %23, %24 in 1 : vector<2x2x10xf32>, vector<2x6x10xf32> -> vector<2x8x10xf32>
    %26 = arith.addf %22, %25 : vector<2x8x10xf32>
    %cst_14 = arith.constant 0.000000e+00 : f32
    %27 = vector.broadcast %cst_14 : f32 to vector<2x4x10xf32>
    %28 = vector.extract_strided_slice %26 {offsets = [0, 0, 0], sizes = [2, 4, 10], strides = [1, 1, 1]} : vector<2x8x10xf32> to vector<2x4x10xf32>
    %29 = tpu.concatenate %27, %28 in 1 : vector<2x4x10xf32>, vector<2x4x10xf32> -> vector<2x8x10xf32>
    %30 = arith.addf %26, %29 : vector<2x8x10xf32>
    %cst_15 = arith.constant 1.000000e-30 : f32
    %31 = vector.broadcast %cst_15 : f32 to vector<2x8x10xf32>
    %32 = arith.maximumf %30, %31 : vector<2x8x10xf32>
    %cst_16 = arith.constant 1.000000e+00 : f32
    %33 = vector.broadcast %cst_16 : f32 to vector<2x8x10xf32>
    %34 = arith.divf %33, %32 : vector<2x8x10xf32>
    %35 = tpu.iota {dimensions = array<i32: 0>} : vector<8x8xi32>
    %36 = tpu.iota {dimensions = array<i32: 1>} : vector<8x8xi32>
    %37 = arith.cmpi sle, %36, %35 : vector<8x8xi32>
    "tpu.trace_start"() <{level = 10 : i32, message = "btr,bsr->bts"}> : () -> ()
    %cst_17 = arith.constant dense<0.000000e+00> : vector<2x8x8xf32>
    %38 = tpu.matmul %34, %18, %cst_17 {dimension_numbers = #tpu.dot_dimension_numbers<[2], [2], [1], [1], [0, 0, 0, 1, 1, 1], [0], [0]>} : vector<2x8x10xf32>, vector<2x8x10xf32>, vector<2x8x8xf32> -> vector<2x8x8xf32>
    "tpu.trace_stop"() : () -> ()
    %cst_18 = arith.constant 1.000000e-01 : f32
    %39 = vector.broadcast %cst_18 : f32 to vector<2x8x8xf32>
    %40 = arith.mulf %38, %39 : vector<2x8x8xf32>
    %41 = vector.shape_cast %37 : vector<8x8xi1> to vector<1x8x8xi1>
    %cst_19 = arith.constant 0.000000e+00 : f32
    %42 = vector.shape_cast %41 : vector<1x8x8xi1> to vector<1x8x8xi1>
    %43 = vector.broadcast %42 : vector<1x8x8xi1> to vector<2x8x8xi1>
    %44 = vector.broadcast %cst_19 : f32 to vector<2x8x8xf32>
    %45 = arith.select %43, %40, %44 : vector<2x8x8xi1>, vector<2x8x8xf32>
    "tpu.trace_start"() <{level = 10 : i32, message = "bts,bsd->btd"}> : () -> ()
    %cst_20 = arith.constant dense<0.000000e+00> : vector<2x8x16xf32>
    %46 = tpu.matmul %45, %0, %cst_20 {dimension_numbers = #tpu.dot_dimension_numbers<[2], [1], [1], [2], [0, 0, 0, 1, 1, 2], [0], [0]>} : vector<2x8x8xf32>, vector<2x8x16xf32>, vector<2x8x16xf32> -> vector<2x8x16xf32>
    "tpu.trace_stop"() : () -> ()
    %47 = vector.shape_cast %46 : vector<2x8x16xf32> to vector<16x16xf32>
    %c0_21 = arith.constant 0 : index
    %c0_22 = arith.constant 0 : index
    %48 = vector.load %arg6[%c0_21, %c0_22] : memref<16x128xf32, #tpu.memory_space<vmem>>, vector<16x128xf32>
    %cst_23 = arith.constant dense<0.000000e+00> : vector<16x128xf32>
    %49 = tpu.matmul %47, %48, %cst_23 {dimension_numbers = #tpu.dot_dimension_numbers<[1], [0], [0], [1], [0, 0, 1, 1], [], []>} : vector<16x16xf32>, vector<16x128xf32>, vector<16x128xf32> -> vector<16x128xf32>
    %c0_24 = arith.constant 0 : index
    %c0_25 = arith.constant 0 : index
    %50 = vector.load %arg8[%c0_24, %c0_25] : memref<1x128xf32, #tpu.memory_space<vmem>>, vector<1x128xf32>
    %51 = vector.broadcast %50 : vector<1x128xf32> to vector<16x128xf32>
    %52 = arith.addf %49, %51 : vector<16x128xf32>
    %53 = vector.shape_cast %52 : vector<16x128xf32> to vector<2x8x128xf32>
    %c0_26 = arith.constant 0 : index
    %c0_27 = arith.constant 0 : index
    %c0_28 = arith.constant 0 : index
    %54 = vector.load %arg12[%c0_26, %c0_27, %c0_28] : memref<2x8x128xf32, #tpu.memory_space<vmem>>, vector<2x8x128xf32>
    tpu.vector_store %arg12[%c0_26, %c0_27, %c0_28], %53 {strides = array<i32>} : memref<2x8x128xf32, #tpu.memory_space<vmem>>, vector<2x8x128xf32>,
    %c0_29 = arith.constant 0 : index
    %c0_30 = arith.constant 0 : index
    %55 = vector.load %arg7[%c0_29, %c0_30] : memref<32x128xf32, #tpu.memory_space<vmem>>, vector<32x128xf32>
    %cst_31 = arith.constant 0.000000e+00 : f32
    %56 = vector.broadcast %cst_31 : f32 to vector<2x32xf32>
    %cst_32 = arith.constant 0.000000e+00 : f32
    %57 = vector.broadcast %cst_32 : f32 to vector<2x32xf32>
    %c0_33 = arith.constant 0 : index
    %c0_34 = arith.constant 0 : index
    %c0_35 = arith.constant 0 : index
    %58 = vector.load %arg12[%c0_33, %c0_34, %c0_35] : memref<2x8x128xf32, #tpu.memory_space<vmem>>, vector<2x1x128xf32>
    %59 = vector.shape_cast %58 : vector<2x1x128xf32> to vector<2x128xf32>
    %cst_36 = arith.constant dense<0.000000e+00> : vector<2x128xf32>
    %60 = tpu.matmul %56, %55, %cst_36 {dimension_numbers = #tpu.dot_dimension_numbers<[1], [0], [0], [1], [0, 0, 1, 1], [], []>} : vector<2x32xf32>, vector<32x128xf32>, vector<2x128xf32> -> vector<2x128xf32>
    %61 = arith.addf %59, %60 : vector<2x128xf32>
    %62 = vector.extract_strided_slice %61 {offsets = [0, 0], sizes = [2, 32], strides = [1, 1]} : vector<2x128xf32> to vector<2x32xf32>
    %63 = arith.negf %62 : vector<2x32xf32>
    %64 = math.exp %63 : vector<2x32xf32>
    %cst_37 = arith.constant 1.000000e+00 : f32
    %65 = vector.broadcast %cst_37 : f32 to vector<2x32xf32>
    %66 = arith.addf %65, %64 : vector<2x32xf32>
    %67 = arith.divf %65, %66 : vector<2x32xf32>
    %68 = vector.extract_strided_slice %61 {offsets = [0, 32], sizes = [2, 32], strides = [1, 1]} : vector<2x128xf32> to vector<2x32xf32>
    %69 = arith.negf %68 : vector<2x32xf32>
    %70 = math.exp %69 : vector<2x32xf32>
    %cst_38 = arith.constant 1.000000e+00 : f32
    %71 = vector.broadcast %cst_38 : f32 to vector<2x32xf32>
    %72 = arith.addf %71, %70 : vector<2x32xf32>
    %73 = arith.divf %71, %72 : vector<2x32xf32>
    %74 = vector.extract_strided_slice %61 {offsets = [0, 64], sizes = [2, 32], strides = [1, 1]} : vector<2x128xf32> to vector<2x32xf32>
    %75 = math.tanh %74 : vector<2x32xf32>
    %76 = vector.extract_strided_slice %61 {offsets = [0, 96], sizes = [2, 32], strides = [1, 1]} : vector<2x128xf32> to vector<2x32xf32>
    %77 = arith.negf %76 : vector<2x32xf32>
    %78 = math.exp %77 : vector<2x32xf32>
    %cst_39 = arith.constant 1.000000e+00 : f32
    %79 = vector.broadcast %cst_39 : f32 to vector<2x32xf32>
    %80 = arith.addf %79, %78 : vector<2x32xf32>
    %81 = arith.divf %79, %80 : vector<2x32xf32>
    %82 = arith.mulf %73, %57 : vector<2x32xf32>
    %83 = arith.mulf %67, %75 : vector<2x32xf32>
    %84 = arith.addf %82, %83 : vector<2x32xf32>
    %85 = math.tanh %84 : vector<2x32xf32>
    %86 = arith.mulf %81, %85 : vector<2x32xf32>
    %c0_40 = arith.constant 0 : index
    %c1 = arith.constant 1 : index
    %c0_41 = arith.constant 0 : index
    %87 = vector.load %arg12[%c0_40, %c1, %c0_41] : memref<2x8x128xf32, #tpu.memory_space<vmem>>, vector<2x1x128xf32>
    %88 = vector.shape_cast %87 : vector<2x1x128xf32> to vector<2x128xf32>
    %cst_42 = arith.constant dense<0.000000e+00> : vector<2x128xf32>
    %89 = tpu.matmul %86, %55, %cst_42 {dimension_numbers = #tpu.dot_dimension_numbers<[1], [0], [0], [1], [0, 0, 1, 1], [], []>} : vector<2x32xf32>, vector<32x128xf32>, vector<2x128xf32> -> vector<2x128xf32>
    %90 = arith.addf %88, %89 : vector<2x128xf32>
    %91 = vector.extract_strided_slice %90 {offsets = [0, 0], sizes = [2, 32], strides = [1, 1]} : vector<2x128xf32> to vector<2x32xf32>
    %92 = arith.negf %91 : vector<2x32xf32>
    %93 = math.exp %92 : vector<2x32xf32>
    %cst_43 = arith.constant 1.000000e+00 : f32
    %94 = vector.broadcast %cst_43 : f32 to vector<2x32xf32>
    %95 = arith.addf %94, %93 : vector<2x32xf32>
    %96 = arith.divf %94, %95 : vector<2x32xf32>
    %97 = vector.extract_strided_slice %90 {offsets = [0, 32], sizes = [2, 32], strides = [1, 1]} : vector<2x128xf32> to vector<2x32xf32>
    %98 = arith.negf %97 : vector<2x32xf32>
    %99 = math.exp %98 : vector<2x32xf32>
    %cst_44 = arith.constant 1.000000e+00 : f32
    %100 = vector.broadcast %cst_44 : f32 to vector<2x32xf32>
    %101 = arith.addf %100, %99 : vector<2x32xf32>
    %102 = arith.divf %100, %101 : vector<2x32xf32>
    %103 = vector.extract_strided_slice %90 {offsets = [0, 64], sizes = [2, 32], strides = [1, 1]} : vector<2x128xf32> to vector<2x32xf32>
    %104 = math.tanh %103 : vector<2x32xf32>
    %105 = vector.extract_strided_slice %90 {offsets = [0, 96], sizes = [2, 32], strides = [1, 1]} : vector<2x128xf32> to vector<2x32xf32>
    %106 = arith.negf %105 : vector<2x32xf32>
    %107 = math.exp %106 : vector<2x32xf32>
    %cst_45 = arith.constant 1.000000e+00 : f32
    %108 = vector.broadcast %cst_45 : f32 to vector<2x32xf32>
    %109 = arith.addf %108, %107 : vector<2x32xf32>
    %110 = arith.divf %108, %109 : vector<2x32xf32>
    %111 = arith.mulf %102, %84 : vector<2x32xf32>
    %112 = arith.mulf %96, %104 : vector<2x32xf32>
    %113 = arith.addf %111, %112 : vector<2x32xf32>
    %114 = math.tanh %113 : vector<2x32xf32>
    %115 = arith.mulf %110, %114 : vector<2x32xf32>
    %c0_46 = arith.constant 0 : index
    %c2 = arith.constant 2 : index
    %c0_47 = arith.constant 0 : index
    %116 = vector.load %arg12[%c0_46, %c2, %c0_47] : memref<2x8x128xf32, #tpu.memory_space<vmem>>, vector<2x1x128xf32>
    %117 = vector.shape_cast %116 : vector<2x1x128xf32> to vector<2x128xf32>
    %cst_48 = arith.constant dense<0.000000e+00> : vector<2x128xf32>
    %118 = tpu.matmul %115, %55, %cst_48 {dimension_numbers = #tpu.dot_dimension_numbers<[1], [0], [0], [1], [0, 0, 1, 1], [], []>} : vector<2x32xf32>, vector<32x128xf32>, vector<2x128xf32> -> vector<2x128xf32>
    %119 = arith.addf %117, %118 : vector<2x128xf32>
    %120 = vector.extract_strided_slice %119 {offsets = [0, 0], sizes = [2, 32], strides = [1, 1]} : vector<2x128xf32> to vector<2x32xf32>
    %121 = arith.negf %120 : vector<2x32xf32>
    %122 = math.exp %121 : vector<2x32xf32>
    %cst_49 = arith.constant 1.000000e+00 : f32
    %123 = vector.broadcast %cst_49 : f32 to vector<2x32xf32>
    %124 = arith.addf %123, %122 : vector<2x32xf32>
    %125 = arith.divf %123, %124 : vector<2x32xf32>
    %126 = vector.extract_strided_slice %119 {offsets = [0, 32], sizes = [2, 32], strides = [1, 1]} : vector<2x128xf32> to vector<2x32xf32>
    %127 = arith.negf %126 : vector<2x32xf32>
    %128 = math.exp %127 : vector<2x32xf32>
    %cst_50 = arith.constant 1.000000e+00 : f32
    %129 = vector.broadcast %cst_50 : f32 to vector<2x32xf32>
    %130 = arith.addf %129, %128 : vector<2x32xf32>
    %131 = arith.divf %129, %130 : vector<2x32xf32>
    %132 = vector.extract_strided_slice %119 {offsets = [0, 64], sizes = [2, 32], strides = [1, 1]} : vector<2x128xf32> to vector<2x32xf32>
    %133 = math.tanh %132 : vector<2x32xf32>
    %134 = vector.extract_strided_slice %119 {offsets = [0, 96], sizes = [2, 32], strides = [1, 1]} : vector<2x128xf32> to vector<2x32xf32>
    %135 = arith.negf %134 : vector<2x32xf32>
    %136 = math.exp %135 : vector<2x32xf32>
    %cst_51 = arith.constant 1.000000e+00 : f32
    %137 = vector.broadcast %cst_51 : f32 to vector<2x32xf32>
    %138 = arith.addf %137, %136 : vector<2x32xf32>
    %139 = arith.divf %137, %138 : vector<2x32xf32>
    %140 = arith.mulf %131, %113 : vector<2x32xf32>
    %141 = arith.mulf %125, %133 : vector<2x32xf32>
    %142 = arith.addf %140, %141 : vector<2x32xf32>
    %143 = math.tanh %142 : vector<2x32xf32>
    %144 = arith.mulf %139, %143 : vector<2x32xf32>
    %c0_52 = arith.constant 0 : index
    %c3 = arith.constant 3 : index
    %c0_53 = arith.constant 0 : index
    %145 = vector.load %arg12[%c0_52, %c3, %c0_53] : memref<2x8x128xf32, #tpu.memory_space<vmem>>, vector<2x1x128xf32>
    %146 = vector.shape_cast %145 : vector<2x1x128xf32> to vector<2x128xf32>
    %cst_54 = arith.constant dense<0.000000e+00> : vector<2x128xf32>
    %147 = tpu.matmul %144, %55, %cst_54 {dimension_numbers = #tpu.dot_dimension_numbers<[1], [0], [0], [1], [0, 0, 1, 1], [], []>} : vector<2x32xf32>, vector<32x128xf32>, vector<2x128xf32> -> vector<2x128xf32>
    %148 = arith.addf %146, %147 : vector<2x128xf32>
    %149 = vector.extract_strided_slice %148 {offsets = [0, 0], sizes = [2, 32], strides = [1, 1]} : vector<2x128xf32> to vector<2x32xf32>
    %150 = arith.negf %149 : vector<2x32xf32>
    %151 = math.exp %150 : vector<2x32xf32>
    %cst_55 = arith.constant 1.000000e+00 : f32
    %152 = vector.broadcast %cst_55 : f32 to vector<2x32xf32>
    %153 = arith.addf %152, %151 : vector<2x32xf32>
    %154 = arith.divf %152, %153 : vector<2x32xf32>
    %155 = vector.extract_strided_slice %148 {offsets = [0, 32], sizes = [2, 32], strides = [1, 1]} : vector<2x128xf32> to vector<2x32xf32>
    %156 = arith.negf %155 : vector<2x32xf32>
    %157 = math.exp %156 : vector<2x32xf32>
    %cst_56 = arith.constant 1.000000e+00 : f32
    %158 = vector.broadcast %cst_56 : f32 to vector<2x32xf32>
    %159 = arith.addf %158, %157 : vector<2x32xf32>
    %160 = arith.divf %158, %159 : vector<2x32xf32>
    %161 = vector.extract_strided_slice %148 {offsets = [0, 64], sizes = [2, 32], strides = [1, 1]} : vector<2x128xf32> to vector<2x32xf32>
    %162 = math.tanh %161 : vector<2x32xf32>
    %163 = vector.extract_strided_slice %148 {offsets = [0, 96], sizes = [2, 32], strides = [1, 1]} : vector<2x128xf32> to vector<2x32xf32>
    %164 = arith.negf %163 : vector<2x32xf32>
    %165 = math.exp %164 : vector<2x32xf32>
    %cst_57 = arith.constant 1.000000e+00 : f32
    %166 = vector.broadcast %cst_57 : f32 to vector<2x32xf32>
    %167 = arith.addf %166, %165 : vector<2x32xf32>
    %168 = arith.divf %166, %167 : vector<2x32xf32>
    %169 = arith.mulf %160, %142 : vector<2x32xf32>
    %170 = arith.mulf %154, %162 : vector<2x32xf32>
    %171 = arith.addf %169, %170 : vector<2x32xf32>
    %172 = math.tanh %171 : vector<2x32xf32>
    %173 = arith.mulf %168, %172 : vector<2x32xf32>
    %c0_58 = arith.constant 0 : index
    %c4 = arith.constant 4 : index
    %c0_59 = arith.constant 0 : index
    %174 = vector.load %arg12[%c0_58, %c4, %c0_59] : memref<2x8x128xf32, #tpu.memory_space<vmem>>, vector<2x1x128xf32>
    %175 = vector.shape_cast %174 : vector<2x1x128xf32> to vector<2x128xf32>
    %cst_60 = arith.constant dense<0.000000e+00> : vector<2x128xf32>
    %176 = tpu.matmul %173, %55, %cst_60 {dimension_numbers = #tpu.dot_dimension_numbers<[1], [0], [0], [1], [0, 0, 1, 1], [], []>} : vector<2x32xf32>, vector<32x128xf32>, vector<2x128xf32> -> vector<2x128xf32>
    %177 = arith.addf %175, %176 : vector<2x128xf32>
    %178 = vector.extract_strided_slice %177 {offsets = [0, 0], sizes = [2, 32], strides = [1, 1]} : vector<2x128xf32> to vector<2x32xf32>
    %179 = arith.negf %178 : vector<2x32xf32>
    %180 = math.exp %179 : vector<2x32xf32>
    %cst_61 = arith.constant 1.000000e+00 : f32
    %181 = vector.broadcast %cst_61 : f32 to vector<2x32xf32>
    %182 = arith.addf %181, %180 : vector<2x32xf32>
    %183 = arith.divf %181, %182 : vector<2x32xf32>
    %184 = vector.extract_strided_slice %177 {offsets = [0, 32], sizes = [2, 32], strides = [1, 1]} : vector<2x128xf32> to vector<2x32xf32>
    %185 = arith.negf %184 : vector<2x32xf32>
    %186 = math.exp %185 : vector<2x32xf32>
    %cst_62 = arith.constant 1.000000e+00 : f32
    %187 = vector.broadcast %cst_62 : f32 to vector<2x32xf32>
    %188 = arith.addf %187, %186 : vector<2x32xf32>
    %189 = arith.divf %187, %188 : vector<2x32xf32>
    %190 = vector.extract_strided_slice %177 {offsets = [0, 64], sizes = [2, 32], strides = [1, 1]} : vector<2x128xf32> to vector<2x32xf32>
    %191 = math.tanh %190 : vector<2x32xf32>
    %192 = vector.extract_strided_slice %177 {offsets = [0, 96], sizes = [2, 32], strides = [1, 1]} : vector<2x128xf32> to vector<2x32xf32>
    %193 = arith.negf %192 : vector<2x32xf32>
    %194 = math.exp %193 : vector<2x32xf32>
    %cst_63 = arith.constant 1.000000e+00 : f32
    %195 = vector.broadcast %cst_63 : f32 to vector<2x32xf32>
    %196 = arith.addf %195, %194 : vector<2x32xf32>
    %197 = arith.divf %195, %196 : vector<2x32xf32>
    %198 = arith.mulf %189, %171 : vector<2x32xf32>
    %199 = arith.mulf %183, %191 : vector<2x32xf32>
    %200 = arith.addf %198, %199 : vector<2x32xf32>
    %201 = math.tanh %200 : vector<2x32xf32>
    %202 = arith.mulf %197, %201 : vector<2x32xf32>
    %c0_64 = arith.constant 0 : index
    %c5 = arith.constant 5 : index
    %c0_65 = arith.constant 0 : index
    %203 = vector.load %arg12[%c0_64, %c5, %c0_65] : memref<2x8x128xf32, #tpu.memory_space<vmem>>, vector<2x1x128xf32>
    %204 = vector.shape_cast %203 : vector<2x1x128xf32> to vector<2x128xf32>
    %cst_66 = arith.constant dense<0.000000e+00> : vector<2x128xf32>
    %205 = tpu.matmul %202, %55, %cst_66 {dimension_numbers = #tpu.dot_dimension_numbers<[1], [0], [0], [1], [0, 0, 1, 1], [], []>} : vector<2x32xf32>, vector<32x128xf32>, vector<2x128xf32> -> vector<2x128xf32>
    %206 = arith.addf %204, %205 : vector<2x128xf32>
    %207 = vector.extract_strided_slice %206 {offsets = [0, 0], sizes = [2, 32], strides = [1, 1]} : vector<2x128xf32> to vector<2x32xf32>
    %208 = arith.negf %207 : vector<2x32xf32>
    %209 = math.exp %208 : vector<2x32xf32>
    %cst_67 = arith.constant 1.000000e+00 : f32
    %210 = vector.broadcast %cst_67 : f32 to vector<2x32xf32>
    %211 = arith.addf %210, %209 : vector<2x32xf32>
    %212 = arith.divf %210, %211 : vector<2x32xf32>
    %213 = vector.extract_strided_slice %206 {offsets = [0, 32], sizes = [2, 32], strides = [1, 1]} : vector<2x128xf32> to vector<2x32xf32>
    %214 = arith.negf %213 : vector<2x32xf32>
    %215 = math.exp %214 : vector<2x32xf32>
    %cst_68 = arith.constant 1.000000e+00 : f32
    %216 = vector.broadcast %cst_68 : f32 to vector<2x32xf32>
    %217 = arith.addf %216, %215 : vector<2x32xf32>
    %218 = arith.divf %216, %217 : vector<2x32xf32>
    %219 = vector.extract_strided_slice %206 {offsets = [0, 64], sizes = [2, 32], strides = [1, 1]} : vector<2x128xf32> to vector<2x32xf32>
    %220 = math.tanh %219 : vector<2x32xf32>
    %221 = vector.extract_strided_slice %206 {offsets = [0, 96], sizes = [2, 32], strides = [1, 1]} : vector<2x128xf32> to vector<2x32xf32>
    %222 = arith.negf %221 : vector<2x32xf32>
    %223 = math.exp %222 : vector<2x32xf32>
    %cst_69 = arith.constant 1.000000e+00 : f32
    %224 = vector.broadcast %cst_69 : f32 to vector<2x32xf32>
    %225 = arith.addf %224, %223 : vector<2x32xf32>
    %226 = arith.divf %224, %225 : vector<2x32xf32>
    %227 = arith.mulf %218, %200 : vector<2x32xf32>
    %228 = arith.mulf %212, %220 : vector<2x32xf32>
    %229 = arith.addf %227, %228 : vector<2x32xf32>
    %230 = math.tanh %229 : vector<2x32xf32>
    %231 = arith.mulf %226, %230 : vector<2x32xf32>
    %c0_70 = arith.constant 0 : index
    %c6 = arith.constant 6 : index
    %c0_71 = arith.constant 0 : index
    %232 = vector.load %arg12[%c0_70, %c6, %c0_71] : memref<2x8x128xf32, #tpu.memory_space<vmem>>, vector<2x1x128xf32>
    %233 = vector.shape_cast %232 : vector<2x1x128xf32> to vector<2x128xf32>
    %cst_72 = arith.constant dense<0.000000e+00> : vector<2x128xf32>
    %234 = tpu.matmul %231, %55, %cst_72 {dimension_numbers = #tpu.dot_dimension_numbers<[1], [0], [0], [1], [0, 0, 1, 1], [], []>} : vector<2x32xf32>, vector<32x128xf32>, vector<2x128xf32> -> vector<2x128xf32>
    %235 = arith.addf %233, %234 : vector<2x128xf32>
    %236 = vector.extract_strided_slice %235 {offsets = [0, 0], sizes = [2, 32], strides = [1, 1]} : vector<2x128xf32> to vector<2x32xf32>
    %237 = arith.negf %236 : vector<2x32xf32>
    %238 = math.exp %237 : vector<2x32xf32>
    %cst_73 = arith.constant 1.000000e+00 : f32
    %239 = vector.broadcast %cst_73 : f32 to vector<2x32xf32>
    %240 = arith.addf %239, %238 : vector<2x32xf32>
    %241 = arith.divf %239, %240 : vector<2x32xf32>
    %242 = vector.extract_strided_slice %235 {offsets = [0, 32], sizes = [2, 32], strides = [1, 1]} : vector<2x128xf32> to vector<2x32xf32>
    %243 = arith.negf %242 : vector<2x32xf32>
    %244 = math.exp %243 : vector<2x32xf32>
    %cst_74 = arith.constant 1.000000e+00 : f32
    %245 = vector.broadcast %cst_74 : f32 to vector<2x32xf32>
    %246 = arith.addf %245, %244 : vector<2x32xf32>
    %247 = arith.divf %245, %246 : vector<2x32xf32>
    %248 = vector.extract_strided_slice %235 {offsets = [0, 64], sizes = [2, 32], strides = [1, 1]} : vector<2x128xf32> to vector<2x32xf32>
    %249 = math.tanh %248 : vector<2x32xf32>
    %250 = vector.extract_strided_slice %235 {offsets = [0, 96], sizes = [2, 32], strides = [1, 1]} : vector<2x128xf32> to vector<2x32xf32>
    %251 = arith.negf %250 : vector<2x32xf32>
    %252 = math.exp %251 : vector<2x32xf32>
    %cst_75 = arith.constant 1.000000e+00 : f32
    %253 = vector.broadcast %cst_75 : f32 to vector<2x32xf32>
    %254 = arith.addf %253, %252 : vector<2x32xf32>
    %255 = arith.divf %253, %254 : vector<2x32xf32>
    %256 = arith.mulf %247, %229 : vector<2x32xf32>
    %257 = arith.mulf %241, %249 : vector<2x32xf32>
    %258 = arith.addf %256, %257 : vector<2x32xf32>
    %259 = math.tanh %258 : vector<2x32xf32>
    %260 = arith.mulf %255, %259 : vector<2x32xf32>
    %c0_76 = arith.constant 0 : index
    %c7 = arith.constant 7 : index
    %c0_77 = arith.constant 0 : index
    %261 = vector.load %arg12[%c0_76, %c7, %c0_77] : memref<2x8x128xf32, #tpu.memory_space<vmem>>, vector<2x1x128xf32>
    %262 = vector.shape_cast %261 : vector<2x1x128xf32> to vector<2x128xf32>
    %cst_78 = arith.constant dense<0.000000e+00> : vector<2x128xf32>
    %263 = tpu.matmul %260, %55, %cst_78 {dimension_numbers = #tpu.dot_dimension_numbers<[1], [0], [0], [1], [0, 0, 1, 1], [], []>} : vector<2x32xf32>, vector<32x128xf32>, vector<2x128xf32> -> vector<2x128xf32>
    %264 = arith.addf %262, %263 : vector<2x128xf32>
    %265 = vector.extract_strided_slice %264 {offsets = [0, 0], sizes = [2, 32], strides = [1, 1]} : vector<2x128xf32> to vector<2x32xf32>
    %266 = arith.negf %265 : vector<2x32xf32>
    %267 = math.exp %266 : vector<2x32xf32>
    %cst_79 = arith.constant 1.000000e+00 : f32
    %268 = vector.broadcast %cst_79 : f32 to vector<2x32xf32>
    %269 = arith.addf %268, %267 : vector<2x32xf32>
    %270 = arith.divf %268, %269 : vector<2x32xf32>
    %271 = vector.extract_strided_slice %264 {offsets = [0, 32], sizes = [2, 32], strides = [1, 1]} : vector<2x128xf32> to vector<2x32xf32>
    %272 = arith.negf %271 : vector<2x32xf32>
    %273 = math.exp %272 : vector<2x32xf32>
    %cst_80 = arith.constant 1.000000e+00 : f32
    %274 = vector.broadcast %cst_80 : f32 to vector<2x32xf32>
    %275 = arith.addf %274, %273 : vector<2x32xf32>
    %276 = arith.divf %274, %275 : vector<2x32xf32>
    %277 = vector.extract_strided_slice %264 {offsets = [0, 64], sizes = [2, 32], strides = [1, 1]} : vector<2x128xf32> to vector<2x32xf32>
    %278 = math.tanh %277 : vector<2x32xf32>
    %279 = vector.extract_strided_slice %264 {offsets = [0, 96], sizes = [2, 32], strides = [1, 1]} : vector<2x128xf32> to vector<2x32xf32>
    %280 = arith.negf %279 : vector<2x32xf32>
    %281 = math.exp %280 : vector<2x32xf32>
    %cst_81 = arith.constant 1.000000e+00 : f32
    %282 = vector.broadcast %cst_81 : f32 to vector<2x32xf32>
    %283 = arith.addf %282, %281 : vector<2x32xf32>
    %284 = arith.divf %282, %283 : vector<2x32xf32>
    %285 = arith.mulf %276, %258 : vector<2x32xf32>
    %286 = arith.mulf %270, %278 : vector<2x32xf32>
    %287 = arith.addf %285, %286 : vector<2x32xf32>
    %288 = math.tanh %287 : vector<2x32xf32>
    %289 = arith.mulf %284, %288 : vector<2x32xf32>
    %290 = vector.shape_cast %86 : vector<2x32xf32> to vector<2x1x32xf32>
    %291 = vector.shape_cast %115 : vector<2x32xf32> to vector<2x1x32xf32>
    %292 = vector.shape_cast %144 : vector<2x32xf32> to vector<2x1x32xf32>
    %293 = vector.shape_cast %173 : vector<2x32xf32> to vector<2x1x32xf32>
    %294 = vector.shape_cast %202 : vector<2x32xf32> to vector<2x1x32xf32>
    %295 = vector.shape_cast %231 : vector<2x32xf32> to vector<2x1x32xf32>
    %296 = vector.shape_cast %260 : vector<2x32xf32> to vector<2x1x32xf32>
    %297 = vector.shape_cast %289 : vector<2x32xf32> to vector<2x1x32xf32>
    %298 = tpu.concatenate %290, %291, %292, %293, %294, %295, %296, %297 in 1 : vector<2x1x32xf32>, vector<2x1x32xf32>, vector<2x1x32xf32>, vector<2x1x32xf32>, vector<2x1x32xf32>, vector<2x1x32xf32>, vector<2x1x32xf32>, vector<2x1x32xf32> -> vector<2x8x32xf32>
    %c0_82 = arith.constant 0 : index
    %c0_83 = arith.constant 0 : index
    %c0_84 = arith.constant 0 : index
    %299 = vector.load %arg9[%c0_82, %c0_83, %c0_84] : memref<2x8x32xf32, #tpu.memory_space<vmem>>, vector<2x8x32xf32>
    tpu.vector_store %arg9[%c0_82, %c0_83, %c0_84], %298 {strides = array<i32>} : memref<2x8x32xf32, #tpu.memory_space<vmem>>, vector<2x8x32xf32>,
    %c0_85 = arith.constant 0 : index
    %c0_86 = arith.constant 0 : index
    %300 = vector.load %arg10[%c0_85, %c0_86] : memref<2x32xf32, #tpu.memory_space<vmem>>, vector<2x32xf32>
    tpu.vector_store %arg10[%c0_85, %c0_86], %289 {strides = array<i32>} : memref<2x32xf32, #tpu.memory_space<vmem>>, vector<2x32xf32>,
    %c0_87 = arith.constant 0 : index
    %c0_88 = arith.constant 0 : index
    %301 = vector.load %arg11[%c0_87, %c0_88] : memref<2x32xf32, #tpu.memory_space<vmem>>, vector<2x32xf32>
    tpu.vector_store %arg11[%c0_87, %c0_88], %287 {strides = array<i32>} : memref<2x32xf32, #tpu.memory_space<vmem>>, vector<2x32xf32>,
    return
  }
  func.func @transform_0(%arg0: i32) -> (i32, i32, i32) {
    %c0_i32 = arith.constant 0 : i32
    %c0_i32_0 = arith.constant 0 : i32
    %c0_i32_1 = arith.constant 0 : i32
    return %arg0, %c0_i32, %c0_i32_0 : i32, i32, i32
  }
  func.func @transform_1(%arg0: i32) -> (i32, i32) {
    %c0_i32 = arith.constant 0 : i32
    %c0_i32_0 = arith.constant 0 : i32
    %c0_i32_1 = arith.constant 0 : i32
    return %c0_i32, %c0_i32_0 : i32, i32
  }
  func.func @transform_2(%arg0: i32) -> (i32, i32) {
    %c0_i32 = arith.constant 0 : i32
    %c0_i32_0 = arith.constant 0 : i32
    %c0_i32_1 = arith.constant 0 : i32
    return %c0_i32, %c0_i32_0 : i32, i32
  }
  func.func @transform_3(%arg0: i32) -> (i32, i32) {
    %c0_i32 = arith.constant 0 : i32
    %c0_i32_0 = arith.constant 0 : i32
    %c0_i32_1 = arith.constant 0 : i32
    return %c0_i32, %c0_i32_0 : i32, i32
  }
  func.func @transform_4(%arg0: i32) -> (i32, i32) {
    %c0_i32 = arith.constant 0 : i32
    %c0_i32_0 = arith.constant 0 : i32
    %c0_i32_1 = arith.constant 0 : i32
    return %c0_i32, %c0_i32_0 : i32, i32
  }
  func.func @transform_5(%arg0: i32) -> (i32, i32) {
    %c0_i32 = arith.constant 0 : i32
    %c0_i32_0 = arith.constant 0 : i32
    %c0_i32_1 = arith.constant 0 : i32
    return %c0_i32, %c0_i32_0 : i32, i32
  }
  func.func @transform_6(%arg0: i32) -> (i32, i32) {
    %c0_i32 = arith.constant 0 : i32
    %c0_i32_0 = arith.constant 0 : i32
    %c0_i32_1 = arith.constant 0 : i32
    return %c0_i32, %c0_i32_0 : i32, i32
  }
  func.func @transform_7(%arg0: i32) -> (i32, i32) {
    %c0_i32 = arith.constant 0 : i32
    %c0_i32_0 = arith.constant 0 : i32
    %c0_i32_1 = arith.constant 0 : i32
    return %c0_i32, %c0_i32_0 : i32, i32
  }
  func.func @transform_8(%arg0: i32) -> (i32, i32, i32) {
    %c0_i32 = arith.constant 0 : i32
    %c0_i32_0 = arith.constant 0 : i32
    %c0_i32_1 = arith.constant 0 : i32
    return %arg0, %c0_i32, %c0_i32_0 : i32, i32, i32
  }
  func.func @transform_9(%arg0: i32) -> (i32, i32) {
    %c0_i32 = arith.constant 0 : i32
    %c0_i32_0 = arith.constant 0 : i32
    return %arg0, %c0_i32 : i32, i32
  }
  func.func @transform_10(%arg0: i32) -> (i32, i32) {
    %c0_i32 = arith.constant 0 : i32
    %c0_i32_0 = arith.constant 0 : i32
    return %arg0, %c0_i32 : i32, i32
  }
}

</mosaic_0001>

<bundles_post_ra>
// kernel: tpu_custom_call.1
= control target key start
LH: loop header
LB: loop body
LE: loop exit
PB: predicated region body
PF: predicated region fallthrough
CT: control target
= control target key end

     0   :  { %16 = vsyncpa [#allocation4], 0  ;;  %s2797_s0 = inlined_call_operand.vmem [shape: f32[2,8,16], index: 0, kind: input, shape index: {}]   ;;  %s2798_s1 = inlined_call_operand.hbm [shape: f32[16,30], index: 1, kind: input, shape index: {}]   ;;  %s2799_s2 = inlined_call_operand.vmem [shape: f32[1,30], index: 2, kind: input, shape index: {}]   ;;  %s2800_s3 = inlined_call_operand.vmem [shape: f32[30,10], index: 3, kind: input, shape index: {}]   ;;  %s2801_s4 = inlined_call_operand.vmem [shape: f32[1,10], index: 4, kind: input, shape index: {}]   ;;  %s2802_s5 = inlined_call_operand.hbm [shape: f32[16,128], index: 5, kind: input, shape index: {}]   ;;  %s2803_s6 = inlined_call_operand.vmem [shape: f32[32,128], index: 6, kind: input, shape index: {}]   ;;  %s2804_s7 = inlined_call_operand.vmem [shape: f32[1,128], index: 7, kind: input, shape index: {}]   ;;  %s2805_s8 = inlined_call_operand.hbm [shape: f32[2,8,32], index: 8, kind: output, shape index: {0}]   ;;  %s2806_s9 = inlined_call_operand.hbm [shape: f32[2,32], index: 9, kind: output, shape index: {1}]   ;;  %s2807_s10 = inlined_call_operand.hbm [shape: f32[2,32], index: 10, kind: output, shape index: {2}]  }
   0x1   :  { %17 = vsyncpa [#allocation7], 0 }
   0x2   :  { %18 = vsyncpa [#allocation5], 0 }
   0x3   :  { %19 = vsyncpa [#allocation10], 0  ;;  %s2397_s13 = smov [#allocation3]  }
   0x4   :  { %s27_s14 = sshll.u32 %s2397_s13, 4  ;;  %s28_s14 = int_to_ptr.vmem [resolvable:$true] %s27_s14 }
   0x5   :  { %s2297_s15 = scalar_lea.vmem %s28_s14, 256  ;;  %p2302_p1 = scmp.lt.s32.totalorder %s28_s14, %s28_s14 }
   0x6   :  { %p2298_p0 = scmp.ne.s32.totalorder %s28_s14, %s2297_s15  ;;  %p2303_p2 = scmp.lt.s32.totalorder %s2297_s15, %s2297_s15 }
   0x8   :  { %p2304_p3 = por %p2303_p2, %p2302_p1 }
   0xa   :  { %p2305_p4 = pnand %p2304_p3, %p2298_p0 }
   0xc   :  { %2308 = shalt.err (!%p2305_p4)
}
   0xd   :  { %s2398_s16 = smov 128   ;;  %s2399_s17 = smov 8  }
   0xe   :  { %33 = dma.hbm_to_vmem [thread:$0]  %s2798_s1, 256, %s28_s14, [#allocation4], %s2398_s16, %s2398_s16, %s2399_s17  }
   0xf   :  { %s2400_s20 = smov [#allocation6]  }
  0x10   :  { %s45_s21 = sshll.u32 %s2400_s20, 4  ;;  %s46_s21 = int_to_ptr.vmem [resolvable:$true] %s45_s21 }
  0x11   :  { %s2317_s22 = scalar_lea.vmem %s46_s21, 256  ;;  %p2322_p6 = scmp.lt.s32.totalorder %s46_s21, %s46_s21 }
  0x12   :  { %p2318_p5 = scmp.ne.s32.totalorder %s46_s21, %s2317_s22  ;;  %p2323_p7 = scmp.lt.s32.totalorder %s2317_s22, %s2317_s22 }
  0x14   :  { %p2324_p8 = por %p2323_p7, %p2322_p6 }
  0x16   :  { %p2325_p9 = pnand %p2324_p8, %p2318_p5 }
  0x18   :  { %2328 = shalt.err (!%p2325_p9)
}
  0x19   :  { %51 = dma.hbm_to_vmem [thread:$0]  %s2802_s5, 256, %s46_s21, [#allocation7], %s2398_s16, %s2398_s16, %s2399_s17  }
  0x1a   :  { %2389 = dma.done.wait [#allocation4], 256  }
  0x1b   :  { %2390 = vsyncadd [#allocation4], 4294967040 }
  0x1c   :  { %2391 = dma.done.wait [#allocation7], 256  }
  0x1d   :  { %2392 = vsyncadd [#allocation7], 4294967040  ;;  %vm73_vm0 = vcmask 130048   ;;  %v65_v0 = vld [vmem:[#allocation3 + $0x8] sm:$0xff]  ;;  %v64_v1 = vld [vmem:[#allocation3] sm:$0xff]  ;;  %vm175_vm1 = vcmask 1045504   ;;  %v314_v63 = vlaneseq }
  0x1e   :  { %v62_v2 = vld [vmem:[%s2797_s0] sm:$0xff]  ;;  %2004 = vmatprep.subr.mxu0 %v65_v0  ;;  %v2483_v3 = vld [vmem:[%s2797_s0 + $0x8] sm:$0xff]  ;;  %v160_v4 = vld [vmem:[%s2800_s3 + $0x18] sm:$0x3f]  ;;  %vm168_vm2 = vcmask 244736   ;;  %v2401_v15 = vmov 0.0  }
  0x1f   :  { %2008 = vmatprep.mubr.msk.f32.mxu0 %vm73_vm0, %v62_v2  ;;  %2005 = vmatpush3.msra.mxu0 %v65_v0  ;;  %v159_v5 = vld [vmem:[%s2800_s3 + $0x10] sm:$0xff]  ;;  %v158_v6 = vld [vmem:[%s2800_s3 + $0x8] sm:$0xff]  ;;  %v157_v7 = vld [vmem:[%s2800_s3] sm:$0xff]  ;;  %vm2402_vm3 = vmmov 0   ;;  %vm254_vm4 = vcmask 80896   ;;  %vm281_vm5 = vcmask 1040384  }
  0x20   :  { %2006 = vmatprep.subr.mxu0 %v64_v1  ;;  %2011 = vmatprep.subr.msk.mxu1 %vm175_vm1, %v160_v4  ;;  %v1903_v8 = vld [vmem:[%s2799_s2] ss:$0 sm:$0xff]  ;;  %vm292_vm6 = vcmask 1041408   ;;  %vm303_vm7 = vcmask 1043456   ;;  %v315_v0 = vshrl.u32 %v314_v63, 7  ;;  %vm475_vm9 = vcmask 64512  }
  0x21   :  { %2007 = vmatpush3.msra.mxu0 %v64_v1  ;;  %2012 = vmatpush3.msk.msra.mxu1 %vm175_vm1, %v160_v4  ;;  %v1906_v16 = vld [vmem:[%s2801_s4] ss:$0 sm:$0xff]  ;;  %v317_v1 = vand.u32 127, %v314_v63  ;;  %s2403_s25 = smov 64   ;;  %vm853_vm10 = vcmask 1041409   ;;  %vm720_vm11 = vcmask 261120  }
  0x22   :  { %2009 = vmatmul.mubr.msk.f32.vlgmr.msra.gmra.mxu0 %vm73_vm0, %v2483_v3  ;;  %2013 = vmatprep.subr.mxu1 %v159_v5  ;;  %vm1820_vm12 = vcmask 1042432   ;;  %vm1825_vm13 = vcmask 1044480   ;;  %vm1830_vm14 = vcmask 1046528   ;;  %s2405_s26 = smov 96   ;;  %s2406_s27 = smov [#allocation9]   ;;  %vm1848_vm15 = vcmask 254976  }
  0x23   :  { %2014 = vmatpush3.msra.mxu1 %v159_v5  ;;  %2022 = vmatprep.subr.mxu0 %v2401_v15  ;;  %vm318_vm8 = vcmp.le.s32.totalorder %v317_v1, %v315_v0  ;;  %s1876_s5 = sshll.u32 %s2406_s27, 4  ;;  %s2407_s28 = smov [#allocation11]   ;;  %s1877_s5 = int_to_ptr.vmem [resolvable:$true] %s1876_s5 }
  0x24   :  { %2015 = vmatprep.subr.mxu1 %v158_v6  ;;  %2024 = vmatprep.mubr.msk.f32.mxu0 %vm2402_vm3, %v2401_v15  ;;  %s1886_s29 = sshll.u32 %s2407_s28, 4  ;;  %s2408_s30 = smov [#allocation8]   ;;  %s1887_s29 = int_to_ptr.vmem [resolvable:$true] %s1886_s29 }
  0x25   :  { %2016 = vmatpush3.msra.mxu1 %v158_v6  ;;  %s1863_s0 = sshll.u32 %s2408_s30, 4  ;;  %s2329_s11 = scalar_lea.vmem %s1877_s5, 32  ;;  %s2777_s0 = int_to_ptr.vmem [resolvable:$true] %s1863_s0 }
  0x26   :  { %2017 = vmatprep.subr.mxu1 %v157_v7  ;;  %p2330_p10 = scmp.ne.s32.totalorder %s1877_s5, %s2329_s11  ;;  %p2334_p11 = scmp.lt.s32.totalorder %s1877_s5, %s1877_s5 }
  0x27   :  { %2018 = vmatpush3.msra.mxu1 %v157_v7  ;;  %p2335_p12 = scmp.lt.s32.totalorder %s2329_s11, %s2329_s11 }
  0x28   :  { %2032 = vmatprep.subr.mxu1 %v2401_v15 }
  0x29   :  { %p2336_p13 = por %p2335_p12, %p2334_p11 }
  0x2b   :  { %p2337_p0 = pnand %p2336_p13, %p2330_p10 }
  0xe2   :  { %v2010_v9 = vpop.f32.mrf.mxu0 }
  0xe3   :  { %v152_v10 = vadd.f32 %v2010_v9, %v1903_v8 }
  0xe4   :  { %v146_v11 = vpop.f32.mrf.mxu0 }
  0xe5   :  { %v147_v12 = vadd.f32 %v1903_v8, %v146_v11  ;;  %v622_v11 = vld [vmem:[#allocation6] sm:$0xff] }
  0xe7   :  { %2149 = vtanh.f32 %v147_v12  ;;  %v2538_v12 = vld [vmem:[%s2803_s6 + $0x18] sm:$0xff] }
  0xe8   :  { %2151 = vtanh.f32 %v152_v10 }
  0xf4   :  { %v2150_v13 = vpop.eup %2149 }
  0xf5   :  { %v2152_v14 = vpop.eup %2151  ;;  %2019 = vmatprep.mubr.msk.f32.mxu1 %vm168_vm2, %v2150_v13  ;;  %v2546_v13 = vld [vmem:[%s2803_s6 + $0x10] sm:$0xff] }
  0xf6   :  { %2020 = vmatmul.mubr.msk.f32.vlgmr.msra.gmra.mxu1 %vm168_vm2, %v2152_v14  ;;  %v2551_v14 = vld [vmem:[%s2803_s6 + $0x8] sm:$0xff] }
  0xf7   :  { %2033 = vmatpush3.msra.mxu1 %v62_v2  ;;  %2034 = vmatprep.mubr.msk.f32.mxu1 %vm2402_vm3, %v2401_v15 }
 0x1b6   :  { %v2021_v17 = vpop.f32.mrf.mxu1 }
 0x1b7   :  { %v251_v18 = vadd.f32 %v2021_v17, %v1906_v16 }
 0x1b8   :  { %v245_v19 = vpop.f32.mrf.mxu1 }
 0x1b9   :  { %v262_v20 = vsel %vm254_vm4, %v251_v18, -inf  ;;  %v246_v21 = vadd.f32 %v1906_v16, %v245_v19  ;;  %v2558_v16 = vld [vmem:[%s2803_s6] sm:$0xff] }
 0x1ba   :  { %v263_v22 = vrot.slane %v262_v20, 4 }
 0x1bb   :  { %v255_v23 = vsel %vm254_vm4, %v246_v21, -inf }
 0x1bc   :  { %v264_v24 = vmax.f32 %v262_v20, %v263_v22  ;;  %v256_v25 = vrot.slane %v255_v23, 4 }
 0x1be   :  { %v265_v26 = vrot.slane %v264_v24, 2  ;;  %v257_v27 = vmax.f32 %v255_v23, %v256_v25  ;;  %v1916_v23 = vld [vmem:[%s2804_s7] ss:$0 sm:$0xff]  ;;  %s2404_s7 = smov 32  }
 0x1c0   :  { %v266_v28 = vmax.f32 %v264_v24, %v265_v26  ;;  %v258_v29 = vrot.slane %v257_v27, 2 }
 0x1c2   :  { %v267_v30 = vrot.slane %v266_v28, 1  ;;  %v259_v31 = vmax.f32 %v257_v27, %v258_v29 }
 0x1c4   :  { %v268_v32 = vmax.f32 %v266_v28, %v267_v30  ;;  %v260_v33 = vrot.slane %v259_v31, 1 }
 0x1c6   :  { %v270_v34 = vsub.f32 %v251_v18, %v268_v32  ;;  %v261_v35 = vmax.f32 %v259_v31, %v260_v33 }
 0x1c8   :  { %v273_v36 = vmul.f32 1.442695, %v270_v34  ;;  %v269_v37 = vsub.f32 %v246_v21, %v261_v35 }
 0x1ca   :  { %2153 = vpow2.f32 %v273_v36  ;;  %v271_v38 = vmul.f32 1.442695, %v269_v37 }
 0x1cc   :  { %2155 = vpow2.f32 %v271_v38 }
 0x1d7   :  { %v2154_v39 = vpop.eup %2153 }
 0x1d8   :  { %v278_v40 = vrot.slane %v2154_v39, 7 }
 0x1d9   :  { %v2156_v41 = vpop.eup %2155 }
 0x1da   :  { %v283_v42 = vsel %vm281_vm5, 0.0, %v278_v40  ;;  %v277_v43 = vrot.slane %v2156_v41, 7  ;;  %2023 = vmatpush3.xpose.msk.msra.mxu0 %vm254_vm4, %v2156_v41 }
 0x1db   :  { %v285_v44 = vadd.f32 %v2154_v39, %v283_v42  ;;  %2027 = vmatprep.subr.mxu0 %v2401_v15 }
 0x1dc   :  { %v282_v45 = vsel %vm281_vm5, 0.0, %v277_v43 }
 0x1dd   :  { %v289_v46 = vrot.slane %v285_v44, 6  ;;  %v284_v47 = vadd.f32 %v2156_v41, %v282_v45 }
 0x1df   :  { %v294_v48 = vsel %vm292_vm6, 0.0, %v289_v46  ;;  %v288_v49 = vrot.slane %v284_v47, 6 }
 0x1e0   :  { %v296_v50 = vadd.f32 %v294_v48, %v285_v44 }
 0x1e1   :  { %v293_v51 = vsel %vm292_vm6, 0.0, %v288_v49 }
 0x1e2   :  { %v300_v52 = vrot.slane %v296_v50, 4  ;;  %v295_v53 = vadd.f32 %v293_v51, %v284_v47 }
 0x1e4   :  { %v305_v54 = vsel %vm303_vm7, 0.0, %v300_v52  ;;  %v299_v55 = vrot.slane %v295_v53, 4 }
 0x1e5   :  { %v307_v57 = vadd.f32 %v305_v54, %v296_v50 }
 0x1e6   :  { %v304_v56 = vsel %vm303_vm7, 0.0, %v299_v55 }
 0x1e7   :  { %v306_v58 = vadd.f32 %v304_v56, %v295_v53  ;;  %v309_v60 = vmax.f32 %v307_v57, 1e-30 }
 0x1e9   :  { %v308_v59 = vmax.f32 %v306_v58, 1e-30 }
 0x1eb   :  { %2157 = vrcp.f32 %v308_v59 }
 0x1ec   :  { %2159 = vrcp.f32 %v309_v60 }
 0x1f8   :  { %v2158_v61 = vpop.eup %2157 }
 0x1f9   :  { %2025 = vmatmul.mubr.msk.f32.vlgmr.msra.gmra.mxu0 %vm254_vm4, %v2158_v61  ;;  %v2160_v62 = vpop.eup %2159 }
 0x1fa   :  { %2028 = vmatpush3.xpose.msk.msra.mxu0 %vm254_vm4, %v2154_v39  ;;  %2029 = vmatprep.mubr.msk.f32.mxu0 %vm2402_vm3, %v2401_v15 }
 0x1fb   :  { %2037 = vmatprep.subr.mxu0 %v2401_v15 }
 0x1fd   :  { %2030 = vmatmul.mubr.msk.f32.vlgmr.msra.gmra.mxu0 %vm254_vm4, %v2160_v62 }
 0x1fe   :  { %2038 = vmatpush3.msra.mxu0 %v2483_v3  ;;  %2039 = vmatprep.mubr.msk.f32.mxu0 %vm2402_vm3, %v2401_v15  ;;  %v623_v3 = vld [vmem:[#allocation6 + $0x8] sm:$0xff] }
 0x1ff   :  { %2049 = vmatprep.subr.mxu0 %v2401_v15  ;;  %2042 = vmatprep.subr.mxu1 %v623_v3 }
 0x2b9   :  { %v390_v2 = vpop.f32.mrf.mxu0 }
 0x2ba   :  { %v469_v4 = vmul.f32 0.1, %v390_v2 }
 0x2bb   :  { %v2026_v5 = vpop.f32.mrf.mxu0 }
 0x2bc   :  { %v473_v6 = vsel %vm318_vm8, %v469_v4, 0.0 }
 0x2bd   :  { %v465_v7 = vpop.f32.mrf.mxu0  ;;  %2035 = vmatmul.mubr.msk.f32.vlgmr.msra.gmra.mxu1 %vm475_vm9, %v473_v6 }
 0x2be   :  { %v470_v8 = vmul.f32 0.1, %v465_v7  ;;  %2043 = vmatpush3.msra.mxu1 %v623_v3 }
 0x2bf   :  { %v2031_v9 = vpop.f32.mrf.mxu0  ;;  %2044 = vmatprep.subr.mxu1 %v622_v11 }
 0x2c0   :  { %v474_v10 = vsel %vm318_vm8, %v470_v8, 0.0  ;;  %2045 = vmatpush3.msra.mxu1 %v622_v11 }
 0x2c1   :  { %2040 = vmatmul.mubr.msk.f32.vlgmr.msra.gmra.mxu0 %vm475_vm9, %v474_v10  ;;  %2060 = vmatprep.subr.mxu1 %v2401_v15 }
 0x2c2   :  { %2057 = vmatprep.mubr.msk.f32.mxu0 %vm2402_vm3, %v2401_v15  ;;  %2050 = vmatpush3.msra.mxu0 %v2538_v12 }
 0x2c3   :  { %2051 = vmatprep.subr.mxu0 %v2401_v15 }
 0x2c4   :  { %2052 = vmatpush3.msra.mxu0 %v2546_v13 }
 0x2c5   :  { %2053 = vmatprep.subr.mxu0 %v2401_v15 }
 0x2c6   :  { %2054 = vmatpush3.msra.mxu0 %v2551_v14 }
 0x2c7   :  { %2055 = vmatprep.subr.mxu0 %v2401_v15 }
 0x2c8   :  { %2056 = vmatpush3.msra.mxu0 %v2558_v16 }
 0x2c9   :  { %2058 = vmatmul.mubr.f32.vlgmr.msra.gmra.mxu0 %v2401_v15  ;;  %2071 = vmatprep.subr.mxu0 %v2401_v15 }
 0x2ca   :  { %2072 = vmatpush3.msra.mxu0 %v2538_v12  ;;  %2079 = vmatprep.mubr.msk.f32.mxu0 %vm2402_vm3, %v2401_v15 }
 0x2cb   :  { %2073 = vmatprep.subr.mxu0 %v2401_v15 }
 0x2cc   :  { %2074 = vmatpush3.msra.mxu0 %v2546_v13 }
 0x2cd   :  { %2075 = vmatprep.subr.mxu0 %v2401_v15 }
 0x2ce   :  { %2076 = vmatpush3.msra.mxu0 %v2551_v14 }
 0x2cf   :  { %2077 = vmatprep.subr.mxu0 %v2401_v15 }
 0x2d0   :  { %2078 = vmatpush3.msra.mxu0 %v2558_v16 }
 0x2d1   :  { %2093 = vmatprep.subr.mxu0 %v2401_v15 }
 0x37d   :  { %v545_v17 = vpop.f32.mrf.mxu1 }
 0x37e   :  { %2046 = vmatprep.mubr.msk.f32.mxu1 %vm73_vm0, %v545_v17 }
 0x37f   :  { %v2036_v18 = vpop.f32.mrf.mxu1 }
 0x381   :  { %v618_v19 = vpop.f32.mrf.mxu0 }
 0x382   :  { %2047 = vmatmul.mubr.msk.f32.vlgmr.msra.gmra.mxu1 %vm73_vm0, %v618_v19 }
 0x383   :  { %v2041_v20 = vpop.f32.mrf.mxu0  ;;  %2061 = vmatpush3.msra.mxu1 %v2538_v12  ;;  %2068 = vmatprep.mubr.msk.f32.mxu1 %vm2402_vm3, %v2401_v15 }
 0x384   :  { %2062 = vmatprep.subr.mxu1 %v2401_v15 }
 0x385   :  { %2063 = vmatpush3.msra.mxu1 %v2546_v13 }
 0x386   :  { %2064 = vmatprep.subr.mxu1 %v2401_v15 }
 0x387   :  { %2065 = vmatpush3.msra.mxu1 %v2551_v14 }
 0x388   :  { %2066 = vmatprep.subr.mxu1 %v2401_v15 }
 0x389   :  { %2067 = vmatpush3.msra.mxu1 %v2558_v16  ;;  %v790_v21 = vpop.f32.mrf.mxu0 }
 0x38a   :  { %2082 = vmatprep.subr.mxu1 %v2401_v15  ;;  %v795_v28 = vrot.slane %v790_v21, 1 }
 0x38b   :  { %v2059_v22 = vpop.f32.mrf.mxu0 }
 0x442   :  { %v2048_v24 = vpop.f32.mrf.mxu1 }
 0x443   :  { %v709_v25 = vadd.f32 %v2048_v24, %v1916_v23 }
 0x444   :  { %v703_v26 = vpop.f32.mrf.mxu1 }
 0x445   :  { %713 = vst [vmem:[#allocation2 + $0x8] sm:$0xff] %v709_v25  ;;  %v704_v27 = vadd.f32 %v1916_v23, %v703_v26 }
 0x447   :  { %712 = vst [vmem:[#allocation2] sm:$0xff] %v704_v27 }
 0x44c   :  { %v719_v29 = vld [vmem:[#allocation2 + $0x8] sm:$0x1]  ;;  %v849_v2 = vld [vmem:[#allocation2 + $0x9] sm:$0x1] }
 0x44d   :  { %v799_v30 = vadd.f32 %v795_v28, %v719_v29 }
 0x44e   :  { %v718_v31 = vld [vmem:[#allocation2] sm:$0x1]  ;;  %v848_v62 = vld [vmem:[#allocation2 + $0x1] sm:$0x1] }
 0x44f   :  { %v798_v32 = vadd.f32 %v790_v21, %v718_v31  ;;  %2161 = vtanh.f32 %v799_v30  ;;  %v1920_v35 = vmul.f32 -1.442695, %v799_v30 }
 0x451   :  { %2163 = vtanh.f32 %v798_v32  ;;  %v1919_v36 = vmul.f32 -1.442695, %v798_v32 }
 0x452   :  { %2165 = vpow2.f32 %v1920_v35 }
 0x453   :  { %2167 = vpow2.f32 %v1919_v36 }
 0x45c   :  { %v2162_v33 = vpop.eup %2161 }
 0x45d   :  { %820 = vrot.lane.b32.xlu0 %v2162_v33, %s2403_s25 }
 0x45e   :  { %v2164_v34 = vpop.eup %2163 }
 0x45f   :  { %v2166_v37 = vpop.eup %2165 }
 0x460   :  { %v807_v38 = vadd.f32 1.0, %v2166_v37  ;;  %v2168_v39 = vpop.eup %2167 }
 0x461   :  { %818 = vrot.lane.b32.xlu0 %v2164_v34, %s2403_s25  ;;  %v806_v40 = vadd.f32 1.0, %v2168_v39  ;;  %v983_v39 = vld [vmem:[#allocation2 + $0x2] sm:$0x1] }
 0x462   :  { %2169 = vrcp.f32 %v807_v38 }
 0x463   :  { %2171 = vrcp.f32 %v806_v40 }
 0x46f   :  { %v2170_v41 = vpop.eup %2169 }
 0x470   :  { %v2172_v44 = vpop.eup %2171  ;;  %v815_v47 = vmul.f32 0.0, %v2170_v41 }
 0x471   :  { %v814_v50 = vmul.f32 0.0, %v2172_v44 }
 0x4cf   :  { %v821_v42 = vpop.permute.xlu0 %820 }
 0x4d0   :  { %v825_v43 = vmul.f32 %v2170_v41, %v821_v42 }
 0x4d2   :  { %830 = vrot.lane.b32.xlu1 %v825_v43, %s2404_s7  ;;  %v984_v43 = vld [vmem:[#allocation2 + $0xa] sm:$0x1] }
 0x4d3   :  { %v819_v45 = vpop.permute.xlu0 %818 }
 0x4d4   :  { %v824_v46 = vmul.f32 %v2172_v44, %v819_v45 }
 0x4d6   :  { %828 = vrot.lane.b32.xlu1 %v824_v46, %s2404_s7 }
 0x544   :  { %v831_v48 = vpop.permute.xlu1 %830 }
 0x545   :  { %v2594_v49 = vadd.f32 %v831_v48, %v815_v47 }
 0x547   :  { %2173 = vtanh.f32 %v2594_v49 }
 0x548   :  { %v829_v51 = vpop.permute.xlu1 %828 }
 0x549   :  { %v834_v52 = vadd.f32 %v829_v51, %v814_v50 }
 0x54b   :  { %2175 = vtanh.f32 %v834_v52 }
 0x554   :  { %v2174_v53 = vpop.eup %2173 }
 0x555   :  { %842 = vrot.lane.b32.xlu0 %v2174_v53, %s2403_s25 }
 0x558   :  { %v2176_v54 = vpop.eup %2175 }
 0x559   :  { %840 = vrot.lane.b32.xlu1 %v2176_v54, %s2403_s25 }
 0x5c7   :  { %v843_v55 = vpop.permute.xlu0 %842 }
 0x5c8   :  { %v2599_v56 = vmul.f32 %v2170_v41, %v843_v55 }
 0x5ca   :  { %v852_v58 = vrot.slane %v2599_v56, 7 }
 0x5cb   :  { %v841_v57 = vpop.permute.xlu1 %840 }
 0x5cc   :  { %v2602_v59 = vmul.f32 %v2172_v44, %v841_v57 }
 0x5ce   :  { %v854_v60 = vsel %vm853_vm10, %v852_v58, %v2602_v59 }
 0x5cf   :  { %855 = vrot.lane.b32.xlu0 %v854_v60, %s2404_s7 }
 0x641   :  { %v856_v61 = vpop.permute.xlu0 %855 }
 0x642   :  { %2069 = vmatmul.mubr.msk.f32.vlgmr.msra.gmra.mxu1 %vm720_vm11, %v856_v61 }
 0x643   :  { %2083 = vmatpush3.msra.mxu1 %v2538_v12  ;;  %2090 = vmatprep.mubr.msk.f32.mxu1 %vm2402_vm3, %v2401_v15 }
 0x644   :  { %2084 = vmatprep.subr.mxu1 %v2401_v15 }
 0x645   :  { %2085 = vmatpush3.msra.mxu1 %v2546_v13 }
 0x646   :  { %2086 = vmatprep.subr.mxu1 %v2401_v15 }
 0x647   :  { %2087 = vmatpush3.msra.mxu1 %v2551_v14 }
 0x648   :  { %2088 = vmatprep.subr.mxu1 %v2401_v15 }
 0x649   :  { %2089 = vmatpush3.msra.mxu1 %v2558_v16 }
 0x64a   :  { %2104 = vmatprep.subr.mxu1 %v2401_v15 }
 0x702   :  { %v925_v63 = vpop.f32.mrf.mxu1 }
 0x703   :  { %v930_v0 = vrot.slane %v925_v63, 1  ;;  %v933_v1 = vadd.f32 %v925_v63, %v848_v62 }
 0x704   :  { %v2070_v4 = vpop.f32.mrf.mxu1 }
 0x705   :  { %v934_v5 = vadd.f32 %v930_v0, %v849_v2  ;;  %2177 = vtanh.f32 %v933_v1  ;;  %v1922_v8 = vmul.f32 -1.442695, %v933_v1 }
 0x707   :  { %2179 = vtanh.f32 %v934_v5  ;;  %v1923_v9 = vmul.f32 -1.442695, %v934_v5 }
 0x708   :  { %2181 = vpow2.f32 %v1922_v8 }
 0x709   :  { %2183 = vpow2.f32 %v1923_v9 }
 0x712   :  { %v2178_v6 = vpop.eup %2177 }
 0x713   :  { %953 = vrot.lane.b32.xlu0 %v2178_v6, %s2403_s25 }
 0x714   :  { %v2180_v7 = vpop.eup %2179 }
 0x715   :  { %955 = vrot.lane.b32.xlu1 %v2180_v7, %s2403_s25  ;;  %v2182_v10 = vpop.eup %2181 }
 0x716   :  { %v2184_v3 = vpop.eup %2183  ;;  %v941_v11 = vadd.f32 1.0, %v2182_v10 }
 0x717   :  { %v942_v17 = vadd.f32 1.0, %v2184_v3 }
 0x718   :  { %2185 = vrcp.f32 %v941_v11 }
 0x719   :  { %2187 = vrcp.f32 %v942_v17 }
 0x725   :  { %v2186_v18 = vpop.eup %2185 }
 0x726   :  { %v2188_v21 = vpop.eup %2187  ;;  %v949_v24 = vmul.f32 %v2186_v18, %v834_v52 }
 0x727   :  { %v950_v27 = vmul.f32 %v2188_v21, %v2594_v49 }
 0x785   :  { %v954_v19 = vpop.permute.xlu0 %953 }
 0x786   :  { %v959_v20 = vmul.f32 %v2186_v18, %v954_v19 }
 0x787   :  { %v956_v22 = vpop.permute.xlu1 %955 }
 0x788   :  { %963 = vrot.lane.b32.xlu0 %v959_v20, %s2404_s7  ;;  %v960_v23 = vmul.f32 %v2188_v21, %v956_v22 }
 0x78a   :  { %965 = vrot.lane.b32.xlu1 %v960_v23, %s2404_s7 }
 0x7fa   :  { %v964_v25 = vpop.permute.xlu0 %963 }
 0x7fb   :  { %v969_v26 = vadd.f32 %v964_v25, %v949_v24 }
 0x7fc   :  { %v966_v28 = vpop.permute.xlu1 %965 }
 0x7fd   :  { %2189 = vtanh.f32 %v969_v26  ;;  %v970_v29 = vadd.f32 %v966_v28, %v950_v27  ;;  %v1118_v27 = vld [vmem:[#allocation2 + $0xb] sm:$0x1] }
 0x7ff   :  { %2191 = vtanh.f32 %v970_v29 }
 0x80a   :  { %v2190_v30 = vpop.eup %2189 }
 0x80b   :  { %975 = vrot.lane.b32.xlu0 %v2190_v30, %s2403_s25 }
 0x80c   :  { %v2192_v31 = vpop.eup %2191 }
 0x80d   :  { %977 = vrot.lane.b32.xlu1 %v2192_v31, %s2403_s25 }
 0x87d   :  { %v976_v32 = vpop.permute.xlu0 %975 }
 0x87e   :  { %v2627_v35 = vmul.f32 %v2186_v18, %v976_v32 }
 0x87f   :  { %v978_v33 = vpop.permute.xlu1 %977 }
 0x880   :  { %v2625_v34 = vmul.f32 %v2188_v21, %v978_v33  ;;  %v1787_v7 = vrot.slane %v2627_v35, 7 }
 0x882   :  { %v987_v36 = vrot.slane %v2625_v34, 7  ;;  %v1816_v11 = vsel %vm281_vm5, %v2602_v59, %v1787_v7 }
 0x884   :  { %v988_v37 = vsel %vm853_vm10, %v987_v36, %v2627_v35  ;;  %v1817_v21 = vsel %vm281_vm5, %v2599_v56, %v987_v36  ;;  %v1117_v56 = vld [vmem:[#allocation2 + $0x3] sm:$0x1] }
 0x885   :  { %989 = vrot.lane.b32.xlu1 %v988_v37, %s2404_s7 }
 0x8f7   :  { %v990_v38 = vpop.permute.xlu1 %989 }
 0x8f8   :  { %2080 = vmatmul.mubr.msk.f32.vlgmr.msra.gmra.mxu0 %vm720_vm11, %v990_v38 }
 0x8f9   :  { %2094 = vmatpush3.msra.mxu0 %v2538_v12  ;;  %2101 = vmatprep.mubr.msk.f32.mxu0 %vm2402_vm3, %v2401_v15 }
 0x8fa   :  { %2095 = vmatprep.subr.mxu0 %v2401_v15 }
 0x8fb   :  { %2096 = vmatpush3.msra.mxu0 %v2546_v13 }
 0x8fc   :  { %2097 = vmatprep.subr.mxu0 %v2401_v15 }
 0x8fd   :  { %2098 = vmatpush3.msra.mxu0 %v2551_v14 }
 0x8fe   :  { %2099 = vmatprep.subr.mxu0 %v2401_v15 }
 0x8ff   :  { %2100 = vmatpush3.msra.mxu0 %v2558_v16 }
 0x900   :  { %2115 = vmatprep.subr.mxu0 %v2401_v15 }
 0x9b8   :  { %v1059_v40 = vpop.f32.mrf.mxu0 }
 0x9b9   :  { %v1064_v41 = vrot.slane %v1059_v40, 1  ;;  %v1067_v42 = vadd.f32 %v1059_v40, %v983_v39 }
 0x9ba   :  { %v2081_v44 = vpop.f32.mrf.mxu0 }
 0x9bb   :  { %v1068_v45 = vadd.f32 %v1064_v41, %v984_v43  ;;  %2193 = vtanh.f32 %v1067_v42  ;;  %v1925_v48 = vmul.f32 -1.442695, %v1067_v42 }
 0x9bd   :  { %2195 = vtanh.f32 %v1068_v45  ;;  %v1926_v49 = vmul.f32 -1.442695, %v1068_v45 }
 0x9be   :  { %2197 = vpow2.f32 %v1925_v48 }
 0x9bf   :  { %2199 = vpow2.f32 %v1926_v49 }
 0x9c8   :  { %v2194_v46 = vpop.eup %2193 }
 0x9c9   :  { %1087 = vrot.lane.b32.xlu1 %v2194_v46, %s2403_s25 }
 0x9ca   :  { %v2196_v47 = vpop.eup %2195 }
 0x9cb   :  { %1089 = vrot.lane.b32.xlu0 %v2196_v47, %s2403_s25  ;;  %v2198_v50 = vpop.eup %2197 }
 0x9cc   :  { %v2200_v51 = vpop.eup %2199  ;;  %v1075_v52 = vadd.f32 1.0, %v2198_v50 }
 0x9cd   :  { %v1076_v53 = vadd.f32 1.0, %v2200_v51 }
 0x9ce   :  { %2201 = vrcp.f32 %v1075_v52 }
 0x9cf   :  { %2203 = vrcp.f32 %v1076_v53 }
 0x9db   :  { %v2202_v54 = vpop.eup %2201 }
 0x9dc   :  { %v2204_v58 = vpop.eup %2203  ;;  %v1083_v62 = vmul.f32 %v2202_v54, %v969_v26 }
 0x9dd   :  { %v1084_v1 = vmul.f32 %v2204_v58, %v970_v29 }
 0xa3b   :  { %v1088_v55 = vpop.permute.xlu1 %1087 }
 0xa3c   :  { %v1093_v57 = vmul.f32 %v2202_v54, %v1088_v55 }
 0xa3d   :  { %v1090_v60 = vpop.permute.xlu0 %1089 }
 0xa3e   :  { %1097 = vrot.lane.b32.xlu1 %v1093_v57, %s2404_s7  ;;  %v1094_v61 = vmul.f32 %v2204_v58, %v1090_v60 }
 0xa40   :  { %1099 = vrot.lane.b32.xlu0 %v1094_v61, %s2404_s7 }
 0xab0   :  { %v1098_v63 = vpop.permute.xlu1 %1097 }
 0xab1   :  { %v2650_v0 = vadd.f32 %v1098_v63, %v1083_v62 }
 0xab2   :  { %v1100_v2 = vpop.permute.xlu0 %1099 }
 0xab3   :  { %2205 = vtanh.f32 %v2650_v0  ;;  %v2653_v4 = vadd.f32 %v1100_v2, %v1084_v1  ;;  %v1251_v1 = vld [vmem:[#allocation2 + $0x4] sm:$0x1] }
 0xab5   :  { %2207 = vtanh.f32 %v2653_v4 }
 0xac0   :  { %v2206_v5 = vpop.eup %2205 }
 0xac1   :  { %1109 = vrot.lane.b32.xlu1 %v2206_v5, %s2403_s25 }
 0xac2   :  { %v2208_v6 = vpop.eup %2207 }
 0xac3   :  { %1111 = vrot.lane.b32.xlu0 %v2208_v6, %s2403_s25  ;;  %v1252_v6 = vld [vmem:[#allocation2 + $0xc] sm:$0x1] }
 0xb33   :  { %v1110_v8 = vpop.permute.xlu1 %1109 }
 0xb34   :  { %v1115_v9 = vmul.f32 %v2202_v54, %v1110_v8 }
 0xb35   :  { %v1112_v3 = vpop.permute.xlu0 %1111 }
 0xb36   :  { %v1790_v10 = vrot.slane %v1115_v9, 6  ;;  %v1116_v17 = vmul.f32 %v2204_v58, %v1112_v3 }
 0xb38   :  { %v2662_v18 = vsel %vm292_vm6, %v1816_v11, %v1790_v10  ;;  %v1121_v19 = vrot.slane %v1116_v17, 7  ;;  %v1791_v20 = vrot.slane %v1116_v17, 6 }
 0xb3a   :  { %v2669_v22 = vsel %vm292_vm6, %v1817_v21, %v1791_v20  ;;  %v1122_v23 = vsel %vm853_vm10, %v1121_v19, %v1115_v9 }
 0xb3b   :  { %1123 = vrot.lane.b32.xlu0 %v1122_v23, %s2404_s7 }
 0xbad   :  { %v1124_v24 = vpop.permute.xlu0 %1123 }
 0xbae   :  { %2091 = vmatmul.mubr.msk.f32.vlgmr.msra.gmra.mxu1 %vm720_vm11, %v1124_v24 }
 0xbaf   :  { %2105 = vmatpush3.msra.mxu1 %v2538_v12  ;;  %2112 = vmatprep.mubr.msk.f32.mxu1 %vm2402_vm3, %v2401_v15 }
 0xbb0   :  { %2106 = vmatprep.subr.mxu1 %v2401_v15 }
 0xbb1   :  { %2107 = vmatpush3.msra.mxu1 %v2546_v13 }
 0xbb2   :  { %2108 = vmatprep.subr.mxu1 %v2401_v15 }
 0xbb3   :  { %2109 = vmatpush3.msra.mxu1 %v2551_v14 }
 0xbb4   :  { %2110 = vmatprep.subr.mxu1 %v2401_v15 }
 0xbb5   :  { %2111 = vmatpush3.msra.mxu1 %v2558_v16 }
 0xbb6   :  { %2126 = vmatprep.subr.mxu1 %v2401_v15 }
 0xc6e   :  { %v1193_v59 = vpop.f32.mrf.mxu1 }
 0xc6f   :  { %v1198_v25 = vrot.slane %v1193_v59, 1  ;;  %v1201_v26 = vadd.f32 %v1193_v59, %v1117_v56 }
 0xc70   :  { %v2092_v28 = vpop.f32.mrf.mxu1 }
 0xc71   :  { %v1202_v29 = vadd.f32 %v1198_v25, %v1118_v27  ;;  %2209 = vtanh.f32 %v1201_v26  ;;  %v1928_v32 = vmul.f32 -1.442695, %v1201_v26 }
 0xc73   :  { %2211 = vtanh.f32 %v1202_v29  ;;  %v1929_v33 = vmul.f32 -1.442695, %v1202_v29 }
 0xc74   :  { %2213 = vpow2.f32 %v1928_v32 }
 0xc75   :  { %2215 = vpow2.f32 %v1929_v33 }
 0xc7e   :  { %v2210_v30 = vpop.eup %2209 }
 0xc7f   :  { %1221 = vrot.lane.b32.xlu0 %v2210_v30, %s2403_s25 }
 0xc80   :  { %v2212_v31 = vpop.eup %2211 }
 0xc81   :  { %1223 = vrot.lane.b32.xlu1 %v2212_v31, %s2403_s25  ;;  %v2214_v34 = vpop.eup %2213 }
 0xc82   :  { %v2216_v35 = vpop.eup %2215  ;;  %v1209_v36 = vadd.f32 1.0, %v2214_v34 }
 0xc83   :  { %v1210_v37 = vadd.f32 1.0, %v2216_v35 }
 0xc84   :  { %2217 = vrcp.f32 %v1209_v36 }
 0xc85   :  { %2219 = vrcp.f32 %v1210_v37 }
 0xc91   :  { %v2218_v38 = vpop.eup %2217 }
 0xc92   :  { %v2220_v41 = vpop.eup %2219  ;;  %v1217_v44 = vmul.f32 %v2218_v38, %v2650_v0 }
 0xc93   :  { %v1218_v47 = vmul.f32 %v2220_v41, %v2653_v4 }
 0xcf1   :  { %v1222_v39 = vpop.permute.xlu0 %1221 }
 0xcf2   :  { %v1227_v40 = vmul.f32 %v2218_v38, %v1222_v39 }
 0xcf3   :  { %v1224_v42 = vpop.permute.xlu1 %1223 }
 0xcf4   :  { %1231 = vrot.lane.b32.xlu0 %v1227_v40, %s2404_s7  ;;  %v1228_v43 = vmul.f32 %v2220_v41, %v1224_v42 }
 0xcf6   :  { %1233 = vrot.lane.b32.xlu1 %v1228_v43, %s2404_s7 }
 0xd66   :  { %v1232_v45 = vpop.permute.xlu0 %1231 }
 0xd67   :  { %v2689_v46 = vadd.f32 %v1232_v45, %v1217_v44  ;;  %v1385_v44 = vld [vmem:[#allocation2 + $0x5] sm:$0x1] }
 0xd68   :  { %v1234_v48 = vpop.permute.xlu1 %1233 }
 0xd69   :  { %2221 = vtanh.f32 %v2689_v46  ;;  %v1238_v49 = vadd.f32 %v1234_v48, %v1218_v47 }
 0xd6b   :  { %2223 = vtanh.f32 %v1238_v49 }
 0xd76   :  { %v2222_v50 = vpop.eup %2221 }
 0xd77   :  { %1243 = vrot.lane.b32.xlu0 %v2222_v50, %s2403_s25 }
 0xd78   :  { %v2224_v51 = vpop.eup %2223 }
 0xd79   :  { %1245 = vrot.lane.b32.xlu1 %v2224_v51, %s2403_s25 }
 0xde9   :  { %v1244_v52 = vpop.permute.xlu0 %1243 }
 0xdea   :  { %v1249_v53 = vmul.f32 %v2218_v38, %v1244_v52 }
 0xdeb   :  { %v1246_v55 = vpop.permute.xlu1 %1245 }
 0xdec   :  { %v1794_v54 = vrot.slane %v1249_v53, 5  ;;  %v1250_v57 = vmul.f32 %v2220_v41, %v1246_v55 }
 0xdee   :  { %v2696_v58 = vsel %vm1820_vm12, %v2662_v18, %v1794_v54  ;;  %v1255_v60 = vrot.slane %v1250_v57, 7  ;;  %v1795_v61 = vrot.slane %v1250_v57, 5 }
 0xdf0   :  { %v2699_v62 = vsel %vm1820_vm12, %v2669_v22, %v1795_v61  ;;  %v1256_v63 = vsel %vm853_vm10, %v1255_v60, %v1249_v53 }
 0xdf1   :  { %1257 = vrot.lane.b32.xlu1 %v1256_v63, %s2404_s7 }
 0xe63   :  { %v1258_v0 = vpop.permute.xlu1 %1257 }
 0xe64   :  { %2102 = vmatmul.mubr.msk.f32.vlgmr.msra.gmra.mxu0 %vm720_vm11, %v1258_v0 }
 0xe65   :  { %2116 = vmatpush3.msra.mxu0 %v2538_v12  ;;  %2123 = vmatprep.mubr.msk.f32.mxu0 %vm2402_vm3, %v2401_v15 }
 0xe66   :  { %2117 = vmatprep.subr.mxu0 %v2401_v15 }
 0xe67   :  { %2118 = vmatpush3.msra.mxu0 %v2546_v13 }
 0xe68   :  { %2119 = vmatprep.subr.mxu0 %v2401_v15 }
 0xe69   :  { %2120 = vmatpush3.msra.mxu0 %v2551_v14 }
 0xe6a   :  { %2121 = vmatprep.subr.mxu0 %v2401_v15 }
 0xe6b   :  { %2122 = vmatpush3.msra.mxu0 %v2558_v16 }
 0xf24   :  { %v1327_v2 = vpop.f32.mrf.mxu0 }
 0xf25   :  { %v1332_v4 = vrot.slane %v1327_v2, 1  ;;  %v1335_v5 = vadd.f32 %v1327_v2, %v1251_v1 }
 0xf26   :  { %v2103_v7 = vpop.f32.mrf.mxu0 }
 0xf27   :  { %v1336_v8 = vadd.f32 %v1332_v4, %v1252_v6  ;;  %2225 = vtanh.f32 %v1335_v5  ;;  %v1931_v3 = vmul.f32 -1.442695, %v1335_v5 }
 0xf29   :  { %2227 = vtanh.f32 %v1336_v8  ;;  %v1932_v11 = vmul.f32 -1.442695, %v1336_v8 }
 0xf2a   :  { %2229 = vpow2.f32 %v1931_v3 }
 0xf2b   :  { %2231 = vpow2.f32 %v1932_v11 }
 0xf34   :  { %v2226_v9 = vpop.eup %2225 }
 0xf35   :  { %1355 = vrot.lane.b32.xlu1 %v2226_v9, %s2403_s25 }
 0xf36   :  { %v2228_v10 = vpop.eup %2227 }
 0xf37   :  { %1357 = vrot.lane.b32.xlu0 %v2228_v10, %s2403_s25  ;;  %v2230_v17 = vpop.eup %2229 }
 0xf38   :  { %v2232_v18 = vpop.eup %2231  ;;  %v1343_v19 = vadd.f32 1.0, %v2230_v17 }
 0xf39   :  { %v1344_v20 = vadd.f32 1.0, %v2232_v18 }
 0xf3a   :  { %2233 = vrcp.f32 %v1343_v19 }
 0xf3b   :  { %2235 = vrcp.f32 %v1344_v20 }
 0xf47   :  { %v2234_v21 = vpop.eup %2233 }
 0xf48   :  { %v2236_v24 = vpop.eup %2235  ;;  %v1351_v25 = vmul.f32 %v2234_v21, %v2689_v46 }
 0xf49   :  { %v1352_v28 = vmul.f32 %v2236_v24, %v1238_v49 }
 0xfa7   :  { %v1356_v22 = vpop.permute.xlu1 %1355 }
 0xfa8   :  { %v1361_v23 = vmul.f32 %v2234_v21, %v1356_v22  ;;  %v1519_v22 = vld [vmem:[#allocation2 + $0x6] sm:$0x1] }
 0xfa9   :  { %v1358_v56 = vpop.permute.xlu0 %1357 }
 0xfaa   :  { %1365 = vrot.lane.b32.xlu1 %v1361_v23, %s2404_s7  ;;  %v1362_v59 = vmul.f32 %v2236_v24, %v1358_v56 }
 0xfac   :  { %1367 = vrot.lane.b32.xlu0 %v1362_v59, %s2404_s7  ;;  %v1520_v59 = vld [vmem:[#allocation2 + $0xe] sm:$0x1] }
0x101c   :  { %v1366_v26 = vpop.permute.xlu1 %1365 }
0x101d   :  { %v1371_v27 = vadd.f32 %v1366_v26, %v1351_v25 }
0x101e   :  { %v1368_v29 = vpop.permute.xlu0 %1367 }
0x101f   :  { %2237 = vtanh.f32 %v1371_v27  ;;  %v1372_v30 = vadd.f32 %v1368_v29, %v1352_v28 }
0x1021   :  { %2239 = vtanh.f32 %v1372_v30 }
0x102c   :  { %v2238_v31 = vpop.eup %2237 }
0x102d   :  { %1377 = vrot.lane.b32.xlu1 %v2238_v31, %s2403_s25 }
0x102e   :  { %v2240_v32 = vpop.eup %2239 }
0x102f   :  { %1379 = vrot.lane.b32.xlu0 %v2240_v32, %s2403_s25 }
0x109f   :  { %v1378_v33 = vpop.permute.xlu1 %1377 }
0x10a0   :  { %v1383_v34 = vmul.f32 %v2234_v21, %v1378_v33 }
0x10a1   :  { %v1380_v36 = vpop.permute.xlu0 %1379 }
0x10a2   :  { %v1798_v35 = vrot.slane %v1383_v34, 4  ;;  %v1384_v37 = vmul.f32 %v2236_v24, %v1380_v36 }
0x10a4   :  { %v2722_v38 = vsel %vm303_vm7, %v2696_v58, %v1798_v35  ;;  %v1389_v39 = vrot.slane %v1384_v37, 7  ;;  %v1799_v40 = vrot.slane %v1384_v37, 4 }
0x10a6   :  { %v2726_v41 = vsel %vm303_vm7, %v2699_v62, %v1799_v40  ;;  %v1390_v42 = vsel %vm853_vm10, %v1389_v39, %v1383_v34 }
0x10a7   :  { %1391 = vrot.lane.b32.xlu0 %v1390_v42, %s2404_s7 }
0x1119   :  { %v1392_v43 = vpop.permute.xlu0 %1391 }
0x111a   :  { %2113 = vmatmul.mubr.msk.f32.vlgmr.msra.gmra.mxu1 %vm720_vm11, %v1392_v43 }
0x111b   :  { %2127 = vmatpush3.msra.mxu1 %v2538_v12  ;;  %2134 = vmatprep.mubr.msk.f32.mxu1 %vm2402_vm3, %v2401_v15  ;;  %v1386_v12 = vld [vmem:[#allocation2 + $0xd] sm:$0x1] }
0x111c   :  { %2128 = vmatprep.subr.mxu1 %v2401_v15 }
0x111d   :  { %2129 = vmatpush3.msra.mxu1 %v2546_v13 }
0x111e   :  { %2130 = vmatprep.subr.mxu1 %v2401_v15 }
0x111f   :  { %2131 = vmatpush3.msra.mxu1 %v2551_v14 }
0x1120   :  { %2132 = vmatprep.subr.mxu1 %v2401_v15 }
0x1121   :  { %2133 = vmatpush3.msra.mxu1 %v2558_v16 }
0x11da   :  { %v1461_v45 = vpop.f32.mrf.mxu1 }
0x11db   :  { %v1466_v46 = vrot.slane %v1461_v45, 1  ;;  %v1469_v47 = vadd.f32 %v1461_v45, %v1385_v44 }
0x11dc   :  { %v2114_v48 = vpop.f32.mrf.mxu1 }
0x11dd   :  { %v1470_v49 = vadd.f32 %v1466_v46, %v1386_v12  ;;  %2241 = vtanh.f32 %v1469_v47  ;;  %v1934_v14 = vmul.f32 -1.442695, %v1469_v47 }
0x11df   :  { %2243 = vtanh.f32 %v1470_v49  ;;  %v1935_v51 = vmul.f32 -1.442695, %v1470_v49 }
0x11e0   :  { %2245 = vpow2.f32 %v1934_v14 }
0x11e1   :  { %2247 = vpow2.f32 %v1935_v51 }
0x11ea   :  { %v2242_v50 = vpop.eup %2241 }
0x11eb   :  { %1489 = vrot.lane.b32.xlu0 %v2242_v50, %s2403_s25 }
0x11ec   :  { %v2244_v13 = vpop.eup %2243 }
0x11ed   :  { %1491 = vrot.lane.b32.xlu1 %v2244_v13, %s2403_s25  ;;  %v2246_v15 = vpop.eup %2245 }
0x11ee   :  { %v2248_v16 = vpop.eup %2247  ;;  %v1477_v52 = vadd.f32 1.0, %v2246_v15 }
0x11ef   :  { %v1478_v53 = vadd.f32 1.0, %v2248_v16 }
0x11f0   :  { %2249 = vrcp.f32 %v1477_v52 }
0x11f1   :  { %2251 = vrcp.f32 %v1478_v53 }
0x11fd   :  { %v2250_v54 = vpop.eup %2249 }
0x11fe   :  { %v2252_v58 = vpop.eup %2251  ;;  %v1485_v62 = vmul.f32 %v2250_v54, %v1371_v27 }
0x11ff   :  { %v1486_v1 = vmul.f32 %v2252_v58, %v1372_v30 }
0x125d   :  { %v1490_v55 = vpop.permute.xlu0 %1489 }
0x125e   :  { %v1495_v57 = vmul.f32 %v2250_v54, %v1490_v55  ;;  %v1653_v55 = vld [vmem:[#allocation2 + $0x7] sm:$0x1] }
0x125f   :  { %v1492_v60 = vpop.permute.xlu1 %1491 }
0x1260   :  { %1499 = vrot.lane.b32.xlu0 %v1495_v57, %s2404_s7  ;;  %v1496_v61 = vmul.f32 %v2252_v58, %v1492_v60 }
0x1262   :  { %1501 = vrot.lane.b32.xlu1 %v1496_v61, %s2404_s7  ;;  %v1654_v61 = vld [vmem:[#allocation2 + $0xf] sm:$0x1] }
0x12d2   :  { %v1500_v63 = vpop.permute.xlu0 %1499 }
0x12d3   :  { %v1505_v0 = vadd.f32 %v1500_v63, %v1485_v62 }
0x12d4   :  { %v1502_v2 = vpop.permute.xlu1 %1501 }
0x12d5   :  { %2253 = vtanh.f32 %v1505_v0  ;;  %v1506_v4 = vadd.f32 %v1502_v2, %v1486_v1 }
0x12d7   :  { %2255 = vtanh.f32 %v1506_v4 }
0x12e2   :  { %v2254_v5 = vpop.eup %2253 }
0x12e3   :  { %1511 = vrot.lane.b32.xlu0 %v2254_v5, %s2403_s25 }
0x12e4   :  { %v2256_v6 = vpop.eup %2255 }
0x12e5   :  { %1513 = vrot.lane.b32.xlu1 %v2256_v6, %s2403_s25 }
0x1355   :  { %v1512_v7 = vpop.permute.xlu0 %1511 }
0x1356   :  { %v1517_v8 = vmul.f32 %v2250_v54, %v1512_v7 }
0x1357   :  { %v1514_v10 = vpop.permute.xlu1 %1513 }
0x1358   :  { %v1802_v9 = vrot.slane %v1517_v8, 3  ;;  %v1518_v3 = vmul.f32 %v2252_v58, %v1514_v10 }
0x135a   :  { %v1826_v11 = vsel %vm1825_vm13, %v2722_v38, %v1802_v9  ;;  %v1523_v17 = vrot.slane %v1518_v3, 7  ;;  %v1803_v18 = vrot.slane %v1518_v3, 3 }
0x135c   :  { %v1524_v19 = vsel %vm853_vm10, %v1523_v17, %v1517_v8  ;;  %v1827_v20 = vsel %vm1825_vm13, %v2726_v41, %v1803_v18 }
0x135d   :  { %1525 = vrot.lane.b32.xlu1 %v1524_v19, %s2404_s7 }
0x13cf   :  { %v1526_v21 = vpop.permute.xlu1 %1525 }
0x13d0   :  { %2124 = vmatmul.mubr.msk.f32.vlgmr.msra.gmra.mxu0 %vm720_vm11, %v1526_v21 }
0x1490   :  { %v1595_v23 = vpop.f32.mrf.mxu0 }
0x1491   :  { %v1600_v24 = vrot.slane %v1595_v23, 1  ;;  %v1603_v56 = vadd.f32 %v1595_v23, %v1519_v22 }
0x1492   :  { %v2125_v25 = vpop.f32.mrf.mxu0 }
0x1493   :  { %v1604_v26 = vadd.f32 %v1600_v24, %v1520_v59  ;;  %2257 = vtanh.f32 %v1603_v56  ;;  %v1937_v29 = vmul.f32 -1.442695, %v1603_v56 }
0x1495   :  { %2259 = vtanh.f32 %v1604_v26  ;;  %v1938_v30 = vmul.f32 -1.442695, %v1604_v26 }
0x1496   :  { %2261 = vpow2.f32 %v1937_v29 }
0x1497   :  { %2263 = vpow2.f32 %v1938_v30 }
0x14a0   :  { %v2258_v27 = vpop.eup %2257 }
0x14a1   :  { %1623 = vrot.lane.b32.xlu1 %v2258_v27, %s2403_s25 }
0x14a2   :  { %v2260_v28 = vpop.eup %2259 }
0x14a3   :  { %1625 = vrot.lane.b32.xlu0 %v2260_v28, %s2403_s25  ;;  %v2262_v31 = vpop.eup %2261 }
0x14a4   :  { %v2264_v32 = vpop.eup %2263  ;;  %v1611_v33 = vadd.f32 1.0, %v2262_v31 }
0x14a5   :  { %v1612_v34 = vadd.f32 1.0, %v2264_v32 }
0x14a6   :  { %2265 = vrcp.f32 %v1611_v33 }
0x14a7   :  { %2267 = vrcp.f32 %v1612_v34 }
0x14b3   :  { %v2266_v35 = vpop.eup %2265 }
0x14b4   :  { %v2268_v38 = vpop.eup %2267  ;;  %v1619_v41 = vmul.f32 %v2266_v35, %v1505_v0 }
0x14b5   :  { %v1620_v44 = vmul.f32 %v2268_v38, %v1506_v4 }
0x1513   :  { %v1624_v36 = vpop.permute.xlu1 %1623 }
0x1514   :  { %v1629_v37 = vmul.f32 %v2266_v35, %v1624_v36 }
0x1515   :  { %v1626_v39 = vpop.permute.xlu0 %1625 }
0x1516   :  { %1633 = vrot.lane.b32.xlu1 %v1629_v37, %s2404_s7  ;;  %v1630_v40 = vmul.f32 %v2268_v38, %v1626_v39 }
0x1518   :  { %1635 = vrot.lane.b32.xlu0 %v1630_v40, %s2404_s7 }
0x1588   :  { %v1634_v42 = vpop.permute.xlu1 %1633 }
0x1589   :  { %v1639_v43 = vadd.f32 %v1634_v42, %v1619_v41 }
0x158a   :  { %v1636_v45 = vpop.permute.xlu0 %1635 }
0x158b   :  { %2269 = vtanh.f32 %v1639_v43  ;;  %v1640_v46 = vadd.f32 %v1636_v45, %v1620_v44 }
0x158d   :  { %2271 = vtanh.f32 %v1640_v46 }
0x1598   :  { %v2270_v47 = vpop.eup %2269 }
0x1599   :  { %1645 = vrot.lane.b32.xlu1 %v2270_v47, %s2403_s25 }
0x159a   :  { %v2272_v12 = vpop.eup %2271 }
0x159b   :  { %1647 = vrot.lane.b32.xlu0 %v2272_v12, %s2403_s25 }
0x160b   :  { %v1646_v48 = vpop.permute.xlu1 %1645 }
0x160c   :  { %v1651_v49 = vmul.f32 %v2266_v35, %v1646_v48 }
0x160d   :  { %v1648_v13 = vpop.permute.xlu0 %1647 }
0x160e   :  { %v1806_v50 = vrot.slane %v1651_v49, 2  ;;  %v1652_v14 = vmul.f32 %v2268_v38, %v1648_v13 }
0x1610   :  { %v1828_v51 = vsel %vm175_vm1, %v1826_v11, %v1806_v50  ;;  %v1657_v15 = vrot.slane %v1652_v14, 7  ;;  %v1807_v16 = vrot.slane %v1652_v14, 2 }
0x1612   :  { %v1658_v52 = vsel %vm853_vm10, %v1657_v15, %v1651_v49  ;;  %v2760_v53 = vsel %vm175_vm1, %v1827_v20, %v1807_v16 }
0x1613   :  { %1659 = vrot.lane.b32.xlu0 %v1658_v52, %s2404_s7 }
0x1685   :  { %v1660_v54 = vpop.permute.xlu0 %1659 }
0x1686   :  { %2135 = vmatmul.mubr.msk.f32.vlgmr.msra.gmra.mxu1 %vm720_vm11, %v1660_v54 }
0x1746   :  { %v1729_v57 = vpop.f32.mrf.mxu1 }
0x1747   :  { %v1734_v58 = vrot.slane %v1729_v57, 1  ;;  %v1737_v60 = vadd.f32 %v1729_v57, %v1653_v55 }
0x1748   :  { %v2136_v62 = vpop.f32.mrf.mxu1 }
0x1749   :  { %v1738_v63 = vadd.f32 %v1734_v58, %v1654_v61  ;;  %2273 = vtanh.f32 %v1737_v60  ;;  %v1940_v2 = vmul.f32 -1.442695, %v1737_v60 }
0x174b   :  { %2275 = vtanh.f32 %v1738_v63  ;;  %v1941_v4 = vmul.f32 -1.442695, %v1738_v63 }
0x174c   :  { %2277 = vpow2.f32 %v1940_v2 }
0x174d   :  { %2279 = vpow2.f32 %v1941_v4 }
0x1756   :  { %v2274_v0 = vpop.eup %2273 }
0x1757   :  { %1757 = vrot.lane.b32.xlu0 %v2274_v0, %s2403_s25 }
0x1758   :  { %v2276_v1 = vpop.eup %2275 }
0x1759   :  { %1759 = vrot.lane.b32.xlu1 %v2276_v1, %s2403_s25  ;;  %v2278_v5 = vpop.eup %2277 }
0x175a   :  { %v2280_v6 = vpop.eup %2279  ;;  %v1745_v7 = vadd.f32 1.0, %v2278_v5 }
0x175b   :  { %v1746_v8 = vadd.f32 1.0, %v2280_v6 }
0x175c   :  { %2281 = vrcp.f32 %v1745_v7 }
0x175d   :  { %2283 = vrcp.f32 %v1746_v8 }
0x1769   :  { %v2282_v9 = vpop.eup %2281 }
0x176a   :  { %v2284_v11 = vpop.eup %2283  ;;  %v1753_v19 = vmul.f32 %v2282_v9, %v1639_v43 }
0x176b   :  { %v1754_v22 = vmul.f32 %v2284_v11, %v1640_v46 }
0x17c9   :  { %v1758_v10 = vpop.permute.xlu0 %1757 }
0x17ca   :  { %v1763_v3 = vmul.f32 %v2282_v9, %v1758_v10 }
0x17cb   :  { %v1760_v17 = vpop.permute.xlu1 %1759 }
0x17cc   :  { %1767 = vrot.lane.b32.xlu0 %v1763_v3, %s2404_s7  ;;  %v1764_v18 = vmul.f32 %v2284_v11, %v1760_v17 }
0x17ce   :  { %1769 = vrot.lane.b32.xlu1 %v1764_v18, %s2404_s7 }
0x183e   :  { %v1768_v20 = vpop.permute.xlu0 %1767 }
0x183f   :  { %v1773_v21 = vadd.f32 %v1768_v20, %v1753_v19 }
0x1840   :  { %v1770_v23 = vpop.permute.xlu1 %1769 }
0x1841   :  { %2285 = vtanh.f32 %v1773_v21  ;;  %v1774_v24 = vadd.f32 %v1770_v23, %v1754_v22 }
0x1843   :  { %2287 = vtanh.f32 %v1774_v24  ;;  %v1852_v56 = vrot.slane %v1774_v24, 7 }
0x1845   :  { %v1853_v59 = vsel %vm853_vm10, %v1852_v56, %v1773_v21 }
0x184e   :  { %v2286_v25 = vpop.eup %2285 }
0x184f   :  { %1779 = vrot.lane.b32.xlu0 %v2286_v25, %s2403_s25 }
0x1850   :  { %v2288_v26 = vpop.eup %2287 }
0x1851   :  { %1781 = vrot.lane.b32.xlu1 %v2288_v26, %s2403_s25 }
0x18c1   :  { %v1780_v27 = vpop.permute.xlu0 %1779 }
0x18c2   :  { %v1785_v28 = vmul.f32 %v2282_v9, %v1780_v27 }
0x18c3   :  { %v1782_v30 = vpop.permute.xlu1 %1781 }
0x18c4   :  { %v1812_v29 = vrot.slane %v1785_v28, 1  ;;  %v1786_v31 = vmul.f32 %v2284_v11, %v1782_v30 }
0x18c6   :  { %v1831_v32 = vsel %vm1830_vm14, %v1828_v51, %v1812_v29  ;;  %v1843_v33 = vrot.slane %v1786_v31, 7  ;;  %v1813_v34 = vrot.slane %v1786_v31, 1 }
0x18c7   :  { %1835 = vrot.lane.b32.xlu0 %v1831_v32, %s2404_s7 }
0x18c8   :  { %v1844_v35 = vsel %vm853_vm10, %v1843_v33, %v1785_v28  ;;  %v1832_v36 = vsel %vm1830_vm14, %v2760_v53, %v1813_v34 }
0x18c9   :  { %1845 = vrot.lane.b32.xlu1 %v1844_v35, %s2404_s7 }
0x18cb   :  { %1854 = vrot.lane.b32.xlu0 %v1853_v59, %s2405_s26 }
0x18cd   :  { %1837 = vrot.lane.b32.xlu1 %v1832_v36, %s2404_s7 }
0x1939   :  { %v1836_v37 = vpop.permute.xlu0 %1835 }
0x193a   :  { %1841 = vst.msk [vmem:[#allocation8] sm:$0xff] %vm720_vm11, %v1836_v37 }
0x193b   :  { %v1846_v38 = vpop.permute.xlu1 %1845 }
0x193c   :  { %1849 = vst.msk [vmem:[#allocation9] sm:$0x3] %vm1848_vm15, %v1846_v38 }
0x193d   :  { %v1855_v39 = vpop.permute.xlu0 %1854 }
0x193e   :  { %1857 = vst.msk [vmem:[#allocation11] sm:$0x3] %vm1848_vm15, %v1855_v39 }
0x193f   :  { %2340 = shalt.err (!%p2337_p0)
}
0x1940   :  { %1879 = dma.vmem_to_hbm [thread:$0]  %s1877_s5, 32, %s2806_s9, [#allocation10]  }
0x1941   :  { %s2349_s14 = scalar_lea.vmem %s1887_s29, 32  ;;  %p2354_p2 = scmp.lt.s32.totalorder %s1887_s29, %s1887_s29 }
0x1942   :  { %p2350_p1 = scmp.ne.s32.totalorder %s1887_s29, %s2349_s14  ;;  %p2355_p3 = scmp.lt.s32.totalorder %s2349_s14, %s2349_s14 }
0x1944   :  { %p2356_p4 = por %p2355_p3, %p2354_p2 }
0x1946   :  { %p2357_p5 = pnand %p2356_p4, %p2350_p1 }
0x1948   :  { %2360 = shalt.err (!%p2357_p5)
}
0x1949   :  { %1889 = dma.vmem_to_hbm [thread:$0]  %s1887_s29, 32, %s2807_s10, [#allocation10]   ;;  %v1838_v40 = vpop.permute.xlu1 %1837 }
0x194a   :  { %1842 = vst.msk [vmem:[#allocation8 + $0x8] sm:$0xff] %vm720_vm11, %v1838_v40  ;;  %s2369_s3 = scalar_lea.vmem %s2777_s0, 256  ;;  %p2374_p7 = scmp.lt.s32.totalorder %s2777_s0, %s2777_s0 }
0x194b   :  { %p2370_p6 = scmp.ne.s32.totalorder %s2777_s0, %s2369_s3  ;;  %p2375_p8 = scmp.lt.s32.totalorder %s2369_s3, %s2369_s3 }
0x194d   :  { %p2376_p9 = por %p2375_p8, %p2374_p7 }
0x194f   :  { %p2377_p10 = pnand %p2376_p9, %p2370_p6 }
0x1951   :  { %2380 = shalt.err (!%p2377_p10)
}
0x1952   :  { %1869 = dma.vmem_to_hbm [thread:$0]  %s2777_s0, 256, %s2805_s8, [#allocation5], %s2398_s16, %s2398_s16, %s2399_s17  }
0x1953   :  { %2393 = dma.done.wait [#allocation5], 256  }
0x1954   :  { %2394 = vsyncadd [#allocation5], 4294967040 }
0x1955   :  { %2395 = dma.done.wait [#allocation10], 64  }
0x1956   :  { %2396 = vsyncadd [#allocation10], 4294967232 }
0x1957   :  { %1899 = vsyncpa [#allocation4], 1 }
0x1958   :  { %1900 = vsyncpa [#allocation7], 1 }
0x1959   :  { %1901 = vsyncpa [#allocation5], 1 }
0x195a   :  { %1902 = vsyncpa [#allocation10], 1 }

// kernel: tpu_custom_call.1
= control target key start
LH: loop header
LB: loop body
LE: loop exit
PB: predicated region body
PF: predicated region fallthrough
CT: control target
= control target key end

     0   :  { %16 = vsyncpa [#allocation4], 0  ;;  %s2797_s0 = inlined_call_operand.vmem [shape: f32[2,8,16], index: 0, kind: input, shape index: {}]   ;;  %s2798_s1 = inlined_call_operand.hbm [shape: f32[16,30], index: 1, kind: input, shape index: {}]   ;;  %s2799_s2 = inlined_call_operand.vmem [shape: f32[1,30], index: 2, kind: input, shape index: {}]   ;;  %s2800_s3 = inlined_call_operand.vmem [shape: f32[30,10], index: 3, kind: input, shape index: {}]   ;;  %s2801_s4 = inlined_call_operand.vmem [shape: f32[1,10], index: 4, kind: input, shape index: {}]   ;;  %s2802_s5 = inlined_call_operand.hbm [shape: f32[16,128], index: 5, kind: input, shape index: {}]   ;;  %s2803_s6 = inlined_call_operand.vmem [shape: f32[32,128], index: 6, kind: input, shape index: {}]   ;;  %s2804_s7 = inlined_call_operand.vmem [shape: f32[1,128], index: 7, kind: input, shape index: {}]   ;;  %s2805_s8 = inlined_call_operand.hbm [shape: f32[2,8,32], index: 8, kind: output, shape index: {0}]   ;;  %s2806_s9 = inlined_call_operand.hbm [shape: f32[2,32], index: 9, kind: output, shape index: {1}]   ;;  %s2807_s10 = inlined_call_operand.hbm [shape: f32[2,32], index: 10, kind: output, shape index: {2}]  }
   0x1   :  { %17 = vsyncpa [#allocation7], 0 }
   0x2   :  { %18 = vsyncpa [#allocation5], 0 }
   0x3   :  { %19 = vsyncpa [#allocation10], 0  ;;  %s2397_s13 = smov [#allocation3]  }
   0x4   :  { %s27_s14 = sshll.u32 %s2397_s13, 4  ;;  %s28_s14 = int_to_ptr.vmem [resolvable:$true] %s27_s14 }
   0x5   :  { %s2297_s15 = scalar_lea.vmem %s28_s14, 256  ;;  %p2302_p1 = scmp.lt.s32.totalorder %s28_s14, %s28_s14 }
   0x6   :  { %p2298_p0 = scmp.ne.s32.totalorder %s28_s14, %s2297_s15  ;;  %p2303_p2 = scmp.lt.s32.totalorder %s2297_s15, %s2297_s15 }
   0x8   :  { %p2304_p3 = por %p2303_p2, %p2302_p1 }
   0xa   :  { %p2305_p4 = pnand %p2304_p3, %p2298_p0 }
   0xc   :  { %2308 = shalt.err (!%p2305_p4)
}
   0xd   :  { %s2398_s16 = smov 128   ;;  %s2399_s17 = smov 8  }
   0xe   :  { %33 = dma.hbm_to_vmem [thread:$0]  %s2798_s1, 256, %s28_s14, [#allocation4], %s2398_s16, %s2398_s16, %s2399_s17  }
   0xf   :  { %s2400_s20 = smov [#allocation6]  }
  0x10   :  { %s45_s21 = sshll.u32 %s2400_s20, 4  ;;  %s46_s21 = int_to_ptr.vmem [resolvable:$true] %s45_s21 }
  0x11   :  { %s2317_s22 = scalar_lea.vmem %s46_s21, 256  ;;  %p2322_p6 = scmp.lt.s32.totalorder %s46_s21, %s46_s21 }
  0x12   :  { %p2318_p5 = scmp.ne.s32.totalorder %s46_s21, %s2317_s22  ;;  %p2323_p7 = scmp.lt.s32.totalorder %s2317_s22, %s2317_s22 }
  0x14   :  { %p2324_p8 = por %p2323_p7, %p2322_p6 }
  0x16   :  { %p2325_p9 = pnand %p2324_p8, %p2318_p5 }
  0x18   :  { %2328 = shalt.err (!%p2325_p9)
}
  0x19   :  { %51 = dma.hbm_to_vmem [thread:$0]  %s2802_s5, 256, %s46_s21, [#allocation7], %s2398_s16, %s2398_s16, %s2399_s17  }
  0x1a   :  { %2389 = dma.done.wait [#allocation4], 256  }
  0x1b   :  { %2390 = vsyncadd [#allocation4], 4294967040 }
  0x1c   :  { %2391 = dma.done.wait [#allocation7], 256  }
  0x1d   :  { %2392 = vsyncadd [#allocation7], 4294967040  ;;  %vm73_vm0 = vcmask 130048   ;;  %v65_v0 = vld [vmem:[#allocation3 + $0x8] sm:$0xff]  ;;  %v64_v1 = vld [vmem:[#allocation3] sm:$0xff]  ;;  %vm175_vm1 = vcmask 1045504   ;;  %v314_v63 = vlaneseq }
  0x1e   :  { %v62_v2 = vld [vmem:[%s2797_s0] sm:$0xff]  ;;  %2004 = vmatprep.subr.mxu0 %v65_v0  ;;  %v2483_v3 = vld [vmem:[%s2797_s0 + $0x8] sm:$0xff]  ;;  %v160_v4 = vld [vmem:[%s2800_s3 + $0x18] sm:$0x3f]  ;;  %vm168_vm2 = vcmask 244736   ;;  %v2401_v15 = vmov 0.0  }
  0x1f   :  { %2008 = vmatprep.mubr.msk.f32.mxu0 %vm73_vm0, %v62_v2  ;;  %2005 = vmatpush3.msra.mxu0 %v65_v0  ;;  %v159_v5 = vld [vmem:[%s2800_s3 + $0x10] sm:$0xff]  ;;  %v158_v6 = vld [vmem:[%s2800_s3 + $0x8] sm:$0xff]  ;;  %v157_v7 = vld [vmem:[%s2800_s3] sm:$0xff]  ;;  %vm2402_vm3 = vmmov 0   ;;  %vm254_vm4 = vcmask 80896   ;;  %vm281_vm5 = vcmask 1040384  }
  0x20   :  { %2006 = vmatprep.subr.mxu0 %v64_v1  ;;  %2011 = vmatprep.subr.msk.mxu1 %vm175_vm1, %v160_v4  ;;  %v1903_v8 = vld [vmem:[%s2799_s2] ss:$0 sm:$0xff]  ;;  %vm292_vm6 = vcmask 1041408   ;;  %vm303_vm7 = vcmask 1043456   ;;  %v315_v0 = vshrl.u32 %v314_v63, 7  ;;  %vm475_vm9 = vcmask 64512  }
  0x21   :  { %2007 = vmatpush3.msra.mxu0 %v64_v1  ;;  %2012 = vmatpush3.msk.msra.mxu1 %vm175_vm1, %v160_v4  ;;  %v1906_v16 = vld [vmem:[%s2801_s4] ss:$0 sm:$0xff]  ;;  %v317_v1 = vand.u32 127, %v314_v63  ;;  %s2403_s25 = smov 64   ;;  %vm853_vm10 = vcmask 1041409   ;;  %vm720_vm11 = vcmask 261120  }
  0x22   :  { %2009 = vmatmul.mubr.msk.f32.vlgmr.msra.gmra.mxu0 %vm73_vm0, %v2483_v3  ;;  %2013 = vmatprep.subr.mxu1 %v159_v5  ;;  %vm1820_vm12 = vcmask 1042432   ;;  %vm1825_vm13 = vcmask 1044480   ;;  %vm1830_vm14 = vcmask 1046528   ;;  %s2405_s26 = smov 96   ;;  %s2406_s27 = smov [#allocation9]   ;;  %vm1848_vm15 = vcmask 254976  }
  0x23   :  { %2014 = vmatpush3.msra.mxu1 %v159_v5  ;;  %2022 = vmatprep.subr.mxu0 %v2401_v15  ;;  %vm318_vm8 = vcmp.le.s32.totalorder %v317_v1, %v315_v0  ;;  %s1876_s5 = sshll.u32 %s2406_s27, 4  ;;  %s2407_s28 = smov [#allocation11]   ;;  %s1877_s5 = int_to_ptr.vmem [resolvable:$true] %s1876_s5 }
  0x24   :  { %2015 = vmatprep.subr.mxu1 %v158_v6  ;;  %2024 = vmatprep.mubr.msk.f32.mxu0 %vm2402_vm3, %v2401_v15  ;;  %s1886_s29 = sshll.u32 %s2407_s28, 4  ;;  %s2408_s30 = smov [#allocation8]   ;;  %s1887_s29 = int_to_ptr.vmem [resolvable:$true] %s1886_s29 }
  0x25   :  { %2016 = vmatpush3.msra.mxu1 %v158_v6  ;;  %s1863_s0 = sshll.u32 %s2408_s30, 4  ;;  %s2329_s11 = scalar_lea.vmem %s1877_s5, 32  ;;  %s2777_s0 = int_to_ptr.vmem [resolvable:$true] %s1863_s0 }
  0x26   :  { %2017 = vmatprep.subr.mxu1 %v157_v7  ;;  %p2330_p10 = scmp.ne.s32.totalorder %s1877_s5, %s2329_s11  ;;  %p2334_p11 = scmp.lt.s32.totalorder %s1877_s5, %s1877_s5 }
  0x27   :  { %2018 = vmatpush3.msra.mxu1 %v157_v7  ;;  %p2335_p12 = scmp.lt.s32.totalorder %s2329_s11, %s2329_s11 }
  0x28   :  { %2032 = vmatprep.subr.mxu1 %v2401_v15 }
  0x29   :  { %p2336_p13 = por %p2335_p12, %p2334_p11 }
  0x2b   :  { %p2337_p0 = pnand %p2336_p13, %p2330_p10 }
  0xe2   :  { %v2010_v9 = vpop.f32.mrf.mxu0 }
  0xe3   :  { %v152_v10 = vadd.f32 %v2010_v9, %v1903_v8 }
  0xe4   :  { %v146_v11 = vpop.f32.mrf.mxu0 }
  0xe5   :  { %v147_v12 = vadd.f32 %v1903_v8, %v146_v11  ;;  %v622_v11 = vld [vmem:[#allocation6] sm:$0xff] }
  0xe7   :  { %2149 = vtanh.f32 %v147_v12  ;;  %v2538_v12 = vld [vmem:[%s2803_s6 + $0x18] sm:$0xff] }
  0xe8   :  { %2151 = vtanh.f32 %v152_v10 }
  0xf4   :  { %v2150_v13 = vpop.eup %2149 }
  0xf5   :  { %v2152_v14 = vpop.eup %2151  ;;  %2019 = vmatprep.mubr.msk.f32.mxu1 %vm168_vm2, %v2150_v13  ;;  %v2546_v13 = vld [vmem:[%s2803_s6 + $0x10] sm:$0xff] }
  0xf6   :  { %2020 = vmatmul.mubr.msk.f32.vlgmr.msra.gmra.mxu1 %vm168_vm2, %v2152_v14  ;;  %v2551_v14 = vld [vmem:[%s2803_s6 + $0x8] sm:$0xff] }
  0xf7   :  { %2033 = vmatpush3.msra.mxu1 %v62_v2  ;;  %2034 = vmatprep.mubr.msk.f32.mxu1 %vm2402_vm3, %v2401_v15 }
 0x1b6   :  { %v2021_v17 = vpop.f32.mrf.mxu1 }
 0x1b7   :  { %v251_v18 = vadd.f32 %v2021_v17, %v1906_v16 }
 0x1b8   :  { %v245_v19 = vpop.f32.mrf.mxu1 }
 0x1b9   :  { %v262_v20 = vsel %vm254_vm4, %v251_v18, -inf  ;;  %v246_v21 = vadd.f32 %v1906_v16, %v245_v19  ;;  %v2558_v16 = vld [vmem:[%s2803_s6] sm:$0xff] }
 0x1ba   :  { %v263_v22 = vrot.slane %v262_v20, 4 }
 0x1bb   :  { %v255_v23 = vsel %vm254_vm4, %v246_v21, -inf }
 0x1bc   :  { %v264_v24 = vmax.f32 %v262_v20, %v263_v22  ;;  %v256_v25 = vrot.slane %v255_v23, 4 }
 0x1be   :  { %v265_v26 = vrot.slane %v264_v24, 2  ;;  %v257_v27 = vmax.f32 %v255_v23, %v256_v25  ;;  %v1916_v23 = vld [vmem:[%s2804_s7] ss:$0 sm:$0xff]  ;;  %s2404_s7 = smov 32  }
 0x1c0   :  { %v266_v28 = vmax.f32 %v264_v24, %v265_v26  ;;  %v258_v29 = vrot.slane %v257_v27, 2 }
 0x1c2   :  { %v267_v30 = vrot.slane %v266_v28, 1  ;;  %v259_v31 = vmax.f32 %v257_v27, %v258_v29 }
 0x1c4   :  { %v268_v32 = vmax.f32 %v266_v28, %v267_v30  ;;  %v260_v33 = vrot.slane %v259_v31, 1 }
 0x1c6   :  { %v270_v34 = vsub.f32 %v251_v18, %v268_v32  ;;  %v261_v35 = vmax.f32 %v259_v31, %v260_v33 }
 0x1c8   :  { %v273_v36 = vmul.f32 1.442695, %v270_v34  ;;  %v269_v37 = vsub.f32 %v246_v21, %v261_v35 }
 0x1ca   :  { %2153 = vpow2.f32 %v273_v36  ;;  %v271_v38 = vmul.f32 1.442695, %v269_v37 }
 0x1cc   :  { %2155 = vpow2.f32 %v271_v38 }
 0x1d7   :  { %v2154_v39 = vpop.eup %2153 }
 0x1d8   :  { %v278_v40 = vrot.slane %v2154_v39, 7 }
 0x1d9   :  { %v2156_v41 = vpop.eup %2155 }
 0x1da   :  { %v283_v42 = vsel %vm281_vm5, 0.0, %v278_v40  ;;  %v277_v43 = vrot.slane %v2156_v41, 7  ;;  %2023 = vmatpush3.xpose.msk.msra.mxu0 %vm254_vm4, %v2156_v41 }
 0x1db   :  { %v285_v44 = vadd.f32 %v2154_v39, %v283_v42  ;;  %2027 = vmatprep.subr.mxu0 %v2401_v15 }
 0x1dc   :  { %v282_v45 = vsel %vm281_vm5, 0.0, %v277_v43 }
 0x1dd   :  { %v289_v46 = vrot.slane %v285_v44, 6  ;;  %v284_v47 = vadd.f32 %v2156_v41, %v282_v45 }
 0x1df   :  { %v294_v48 = vsel %vm292_vm6, 0.0, %v289_v46  ;;  %v288_v49 = vrot.slane %v284_v47, 6 }
 0x1e0   :  { %v296_v50 = vadd.f32 %v294_v48, %v285_v44 }
 0x1e1   :  { %v293_v51 = vsel %vm292_vm6, 0.0, %v288_v49 }
 0x1e2   :  { %v300_v52 = vrot.slane %v296_v50, 4  ;;  %v295_v53 = vadd.f32 %v293_v51, %v284_v47 }
 0x1e4   :  { %v305_v54 = vsel %vm303_vm7, 0.0, %v300_v52  ;;  %v299_v55 = vrot.slane %v295_v53, 4 }
 0x1e5   :  { %v307_v57 = vadd.f32 %v305_v54, %v296_v50 }
 0x1e6   :  { %v304_v56 = vsel %vm303_vm7, 0.0, %v299_v55 }
 0x1e7   :  { %v306_v58 = vadd.f32 %v304_v56, %v295_v53  ;;  %v309_v60 = vmax.f32 %v307_v57, 1e-30 }
 0x1e9   :  { %v308_v59 = vmax.f32 %v306_v58, 1e-30 }
 0x1eb   :  { %2157 = vrcp.f32 %v308_v59 }
 0x1ec   :  { %2159 = vrcp.f32 %v309_v60 }
 0x1f8   :  { %v2158_v61 = vpop.eup %2157 }
 0x1f9   :  { %2025 = vmatmul.mubr.msk.f32.vlgmr.msra.gmra.mxu0 %vm254_vm4, %v2158_v61  ;;  %v2160_v62 = vpop.eup %2159 }
 0x1fa   :  { %2028 = vmatpush3.xpose.msk.msra.mxu0 %vm254_vm4, %v2154_v39  ;;  %2029 = vmatprep.mubr.msk.f32.mxu0 %vm2402_vm3, %v2401_v15 }
 0x1fb   :  { %2037 = vmatprep.subr.mxu0 %v2401_v15 }
 0x1fd   :  { %2030 = vmatmul.mubr.msk.f32.vlgmr.msra.gmra.mxu0 %vm254_vm4, %v2160_v62 }
 0x1fe   :  { %2038 = vmatpush3.msra.mxu0 %v2483_v3  ;;  %2039 = vmatprep.mubr.msk.f32.mxu0 %vm2402_vm3, %v2401_v15  ;;  %v623_v3 = vld [vmem:[#allocation6 + $0x8] sm:$0xff] }
 0x1ff   :  { %2049 = vmatprep.subr.mxu0 %v2401_v15  ;;  %2042 = vmatprep.subr.mxu1 %v623_v3 }
 0x2b9   :  { %v390_v2 = vpop.f32.mrf.mxu0 }
 0x2ba   :  { %v469_v4 = vmul.f32 0.1, %v390_v2 }
 0x2bb   :  { %v2026_v5 = vpop.f32.mrf.mxu0 }
 0x2bc   :  { %v473_v6 = vsel %vm318_vm8, %v469_v4, 0.0 }
 0x2bd   :  { %v465_v7 = vpop.f32.mrf.mxu0  ;;  %2035 = vmatmul.mubr.msk.f32.vlgmr.msra.gmra.mxu1 %vm475_vm9, %v473_v6 }
 0x2be   :  { %v470_v8 = vmul.f32 0.1, %v465_v7  ;;  %2043 = vmatpush3.msra.mxu1 %v623_v3 }
 0x2bf   :  { %v2031_v9 = vpop.f32.mrf.mxu0  ;;  %2044 = vmatprep.subr.mxu1 %v622_v11 }
 0x2c0   :  { %v474_v10 = vsel %vm318_vm8, %v470_v8, 0.0  ;;  %2045 = vmatpush3.msra.mxu1 %v622_v11 }
 0x2c1   :  { %2040 = vmatmul.mubr.msk.f32.vlgmr.msra.gmra.mxu0 %vm475_vm9, %v474_v10  ;;  %2060 = vmatprep.subr.mxu1 %v2401_v15 }
 0x2c2   :  { %2057 = vmatprep.mubr.msk.f32.mxu0 %vm2402_vm3, %v2401_v15  ;;  %2050 = vmatpush3.msra.mxu0 %v2538_v12 }
 0x2c3   :  { %2051 = vmatprep.subr.mxu0 %v2401_v15 }
 0x2c4   :  { %2052 = vmatpush3.msra.mxu0 %v2546_v13 }
 0x2c5   :  { %2053 = vmatprep.subr.mxu0 %v2401_v15 }
 0x2c6   :  { %2054 = vmatpush3.msra.mxu0 %v2551_v14 }
 0x2c7   :  { %2055 = vmatprep.subr.mxu0 %v2401_v15 }
 0x2c8   :  { %2056 = vmatpush3.msra.mxu0 %v2558_v16 }
 0x2c9   :  { %2058 = vmatmul.mubr.f32.vlgmr.msra.gmra.mxu0 %v2401_v15  ;;  %2071 = vmatprep.subr.mxu0 %v2401_v15 }
 0x2ca   :  { %2072 = vmatpush3.msra.mxu0 %v2538_v12  ;;  %2079 = vmatprep.mubr.msk.f32.mxu0 %vm2402_vm3, %v2401_v15 }
 0x2cb   :  { %2073 = vmatprep.subr.mxu0 %v2401_v15 }
 0x2cc   :  { %2074 = vmatpush3.msra.mxu0 %v2546_v13 }
 0x2cd   :  { %2075 = vmatprep.subr.mxu0 %v2401_v15 }
 0x2ce   :  { %2076 = vmatpush3.msra.mxu0 %v2551_v14 }
 0x2cf   :  { %2077 = vmatprep.subr.mxu0 %v2401_v15 }
 0x2d0   :  { %2078 = vmatpush3.msra.mxu0 %v2558_v16 }
 0x2d1   :  { %2093 = vmatprep.subr.mxu0 %v2401_v15 }
 0x37d   :  { %v545_v17 = vpop.f32.mrf.mxu1 }
 0x37e   :  { %2046 = vmatprep.mubr.msk.f32.mxu1 %vm73_vm0, %v545_v17 }
 0x37f   :  { %v2036_v18 = vpop.f32.mrf.mxu1 }
 0x381   :  { %v618_v19 = vpop.f32.mrf.mxu0 }
 0x382   :  { %2047 = vmatmul.mubr.msk.f32.vlgmr.msra.gmra.mxu1 %vm73_vm0, %v618_v19 }
 0x383   :  { %v2041_v20 = vpop.f32.mrf.mxu0  ;;  %2061 = vmatpush3.msra.mxu1 %v2538_v12  ;;  %2068 = vmatprep.mubr.msk.f32.mxu1 %vm2402_vm3, %v2401_v15 }
 0x384   :  { %2062 = vmatprep.subr.mxu1 %v2401_v15 }
 0x385   :  { %2063 = vmatpush3.msra.mxu1 %v2546_v13 }
 0x386   :  { %2064 = vmatprep.subr.mxu1 %v2401_v15 }
 0x387   :  { %2065 = vmatpush3.msra.mxu1 %v2551_v14 }
 0x388   :  { %2066 = vmatprep.subr.mxu1 %v2401_v15 }
 0x389   :  { %2067 = vmatpush3.msra.mxu1 %v2558_v16  ;;  %v790_v21 = vpop.f32.mrf.mxu0 }
 0x38a   :  { %2082 = vmatprep.subr.mxu1 %v2401_v15  ;;  %v795_v28 = vrot.slane %v790_v21, 1 }
 0x38b   :  { %v2059_v22 = vpop.f32.mrf.mxu0 }
 0x442   :  { %v2048_v24 = vpop.f32.mrf.mxu1 }
 0x443   :  { %v709_v25 = vadd.f32 %v2048_v24, %v1916_v23 }
 0x444   :  { %v703_v26 = vpop.f32.mrf.mxu1 }
 0x445   :  { %713 = vst [vmem:[#allocation2 + $0x8] sm:$0xff] %v709_v25  ;;  %v704_v27 = vadd.f32 %v1916_v23, %v703_v26 }
 0x447   :  { %712 = vst [vmem:[#allocation2] sm:$0xff] %v704_v27 }
 0x44c   :  { %v719_v29 = vld [vmem:[#allocation2 + $0x8] sm:$0x1]  ;;  %v849_v2 = vld [vmem:[#allocation2 + $0x9] sm:$0x1] }
 0x44d   :  { %v799_v30 = vadd.f32 %v795_v28, %v719_v29 }
 0x44e   :  { %v718_v31 = vld [vmem:[#allocation2] sm:$0x1]  ;;  %v848_v62 = vld [vmem:[#allocation2 + $0x1] sm:$0x1] }
 0x44f   :  { %v798_v32 = vadd.f32 %v790_v21, %v718_v31  ;;  %2161 = vtanh.f32 %v799_v30  ;;  %v1920_v35 = vmul.f32 -1.442695, %v799_v30 }
 0x451   :  { %2163 = vtanh.f32 %v798_v32  ;;  %v1919_v36 = vmul.f32 -1.442695, %v798_v32 }
 0x452   :  { %2165 = vpow2.f32 %v1920_v35 }
 0x453   :  { %2167 = vpow2.f32 %v1919_v36 }
 0x45c   :  { %v2162_v33 = vpop.eup %2161 }
 0x45d   :  { %820 = vrot.lane.b32.xlu0 %v2162_v33, %s2403_s25 }
 0x45e   :  { %v2164_v34 = vpop.eup %2163 }
 0x45f   :  { %v2166_v37 = vpop.eup %2165 }
 0x460   :  { %v807_v38 = vadd.f32 1.0, %v2166_v37  ;;  %v2168_v39 = vpop.eup %2167 }
 0x461   :  { %818 = vrot.lane.b32.xlu0 %v2164_v34, %s2403_s25  ;;  %v806_v40 = vadd.f32 1.0, %v2168_v39  ;;  %v983_v39 = vld [vmem:[#allocation2 + $0x2] sm:$0x1] }
 0x462   :  { %2169 = vrcp.f32 %v807_v38 }
 0x463   :  { %2171 = vrcp.f32 %v806_v40 }
 0x46f   :  { %v2170_v41 = vpop.eup %2169 }
 0x470   :  { %v2172_v44 = vpop.eup %2171  ;;  %v815_v47 = vmul.f32 0.0, %v2170_v41 }
 0x471   :  { %v814_v50 = vmul.f32 0.0, %v2172_v44 }
 0x4cf   :  { %v821_v42 = vpop.permute.xlu0 %820 }
 0x4d0   :  { %v825_v43 = vmul.f32 %v2170_v41, %v821_v42 }
 0x4d2   :  { %830 = vrot.lane.b32.xlu1 %v825_v43, %s2404_s7  ;;  %v984_v43 = vld [vmem:[#allocation2 + $0xa] sm:$0x1] }
 0x4d3   :  { %v819_v45 = vpop.permute.xlu0 %818 }
 0x4d4   :  { %v824_v46 = vmul.f32 %v2172_v44, %v819_v45 }
 0x4d6   :  { %828 = vrot.lane.b32.xlu1 %v824_v46, %s2404_s7 }
 0x544   :  { %v831_v48 = vpop.permute.xlu1 %830 }
 0x545   :  { %v2594_v49 = vadd.f32 %v831_v48, %v815_v47 }
 0x547   :  { %2173 = vtanh.f32 %v2594_v49 }
 0x548   :  { %v829_v51 = vpop.permute.xlu1 %828 }
 0x549   :  { %v834_v52 = vadd.f32 %v829_v51, %v814_v50 }
 0x54b   :  { %2175 = vtanh.f32 %v834_v52 }
 0x554   :  { %v2174_v53 = vpop.eup %2173 }
 0x555   :  { %842 = vrot.lane.b32.xlu0 %v2174_v53, %s2403_s25 }
 0x558   :  { %v2176_v54 = vpop.eup %2175 }
 0x559   :  { %840 = vrot.lane.b32.xlu1 %v2176_v54, %s2403_s25 }
 0x5c7   :  { %v843_v55 = vpop.permute.xlu0 %842 }
 0x5c8   :  { %v2599_v56 = vmul.f32 %v2170_v41, %v843_v55 }
 0x5ca   :  { %v852_v58 = vrot.slane %v2599_v56, 7 }
 0x5cb   :  { %v841_v57 = vpop.permute.xlu1 %840 }
 0x5cc   :  { %v2602_v59 = vmul.f32 %v2172_v44, %v841_v57 }
 0x5ce   :  { %v854_v60 = vsel %vm853_vm10, %v852_v58, %v2602_v59 }
 0x5cf   :  { %855 = vrot.lane.b32.xlu0 %v854_v60, %s2404_s7 }
 0x641   :  { %v856_v61 = vpop.permute.xlu0 %855 }
 0x642   :  { %2069 = vmatmul.mubr.msk.f32.vlgmr.msra.gmra.mxu1 %vm720_vm11, %v856_v61 }
 0x643   :  { %2083 = vmatpush3.msra.mxu1 %v2538_v12  ;;  %2090 = vmatprep.mubr.msk.f32.mxu1 %vm2402_vm3, %v2401_v15 }
 0x644   :  { %2084 = vmatprep.subr.mxu1 %v2401_v15 }
 0x645   :  { %2085 = vmatpush3.msra.mxu1 %v2546_v13 }
 0x646   :  { %2086 = vmatprep.subr.mxu1 %v2401_v15 }
 0x647   :  { %2087 = vmatpush3.msra.mxu1 %v2551_v14 }
 0x648   :  { %2088 = vmatprep.subr.mxu1 %v2401_v15 }
 0x649   :  { %2089 = vmatpush3.msra.mxu1 %v2558_v16 }
 0x64a   :  { %2104 = vmatprep.subr.mxu1 %v2401_v15 }
 0x702   :  { %v925_v63 = vpop.f32.mrf.mxu1 }
 0x703   :  { %v930_v0 = vrot.slane %v925_v63, 1  ;;  %v933_v1 = vadd.f32 %v925_v63, %v848_v62 }
 0x704   :  { %v2070_v4 = vpop.f32.mrf.mxu1 }
 0x705   :  { %v934_v5 = vadd.f32 %v930_v0, %v849_v2  ;;  %2177 = vtanh.f32 %v933_v1  ;;  %v1922_v8 = vmul.f32 -1.442695, %v933_v1 }
 0x707   :  { %2179 = vtanh.f32 %v934_v5  ;;  %v1923_v9 = vmul.f32 -1.442695, %v934_v5 }
 0x708   :  { %2181 = vpow2.f32 %v1922_v8 }
 0x709   :  { %2183 = vpow2.f32 %v1923_v9 }
 0x712   :  { %v2178_v6 = vpop.eup %2177 }
 0x713   :  { %953 = vrot.lane.b32.xlu0 %v2178_v6, %s2403_s25 }
 0x714   :  { %v2180_v7 = vpop.eup %2179 }
 0x715   :  { %955 = vrot.lane.b32.xlu1 %v2180_v7, %s2403_s25  ;;  %v2182_v10 = vpop.eup %2181 }
 0x716   :  { %v2184_v3 = vpop.eup %2183  ;;  %v941_v11 = vadd.f32 1.0, %v2182_v10 }
 0x717   :  { %v942_v17 = vadd.f32 1.0, %v2184_v3 }
 0x718   :  { %2185 = vrcp.f32 %v941_v11 }
 0x719   :  { %2187 = vrcp.f32 %v942_v17 }
 0x725   :  { %v2186_v18 = vpop.eup %2185 }
 0x726   :  { %v2188_v21 = vpop.eup %2187  ;;  %v949_v24 = vmul.f32 %v2186_v18, %v834_v52 }
 0x727   :  { %v950_v27 = vmul.f32 %v2188_v21, %v2594_v49 }
 0x785   :  { %v954_v19 = vpop.permute.xlu0 %953 }
 0x786   :  { %v959_v20 = vmul.f32 %v2186_v18, %v954_v19 }
 0x787   :  { %v956_v22 = vpop.permute.xlu1 %955 }
 0x788   :  { %963 = vrot.lane.b32.xlu0 %v959_v20, %s2404_s7  ;;  %v960_v23 = vmul.f32 %v2188_v21, %v956_v22 }
 0x78a   :  { %965 = vrot.lane.b32.xlu1 %v960_v23, %s2404_s7 }
 0x7fa   :  { %v964_v25 = vpop.permute.xlu0 %963 }
 0x7fb   :  { %v969_v26 = vadd.f32 %v964_v25, %v949_v24 }
 0x7fc   :  { %v966_v28 = vpop.permute.xlu1 %965 }
 0x7fd   :  { %2189 = vtanh.f32 %v969_v26  ;;  %v970_v29 = vadd.f32 %v966_v28, %v950_v27  ;;  %v1118_v27 = vld [vmem:[#allocation2 + $0xb] sm:$0x1] }
 0x7ff   :  { %2191 = vtanh.f32 %v970_v29 }
 0x80a   :  { %v2190_v30 = vpop.eup %2189 }
 0x80b   :  { %975 = vrot.lane.b32.xlu0 %v2190_v30, %s2403_s25 }
 0x80c   :  { %v2192_v31 = vpop.eup %2191 }
 0x80d   :  { %977 = vrot.lane.b32.xlu1 %v2192_v31, %s2403_s25 }
 0x87d   :  { %v976_v32 = vpop.permute.xlu0 %975 }
 0x87e   :  { %v2627_v35 = vmul.f32 %v2186_v18, %v976_v32 }
 0x87f   :  { %v978_v33 = vpop.permute.xlu1 %977 }
 0x880   :  { %v2625_v34 = vmul.f32 %v2188_v21, %v978_v33  ;;  %v1787_v7 = vrot.slane %v2627_v35, 7 }
 0x882   :  { %v987_v36 = vrot.slane %v2625_v34, 7  ;;  %v1816_v11 = vsel %vm281_vm5, %v2602_v59, %v1787_v7 }
 0x884   :  { %v988_v37 = vsel %vm853_vm10, %v987_v36, %v2627_v35  ;;  %v1817_v21 = vsel %vm281_vm5, %v2599_v56, %v987_v36  ;;  %v1117_v56 = vld [vmem:[#allocation2 + $0x3] sm:$0x1] }
 0x885   :  { %989 = vrot.lane.b32.xlu1 %v988_v37, %s2404_s7 }
 0x8f7   :  { %v990_v38 = vpop.permute.xlu1 %989 }
 0x8f8   :  { %2080 = vmatmul.mubr.msk.f32.vlgmr.msra.gmra.mxu0 %vm720_vm11, %v990_v38 }
 0x8f9   :  { %2094 = vmatpush3.msra.mxu0 %v2538_v12  ;;  %2101 = vmatprep.mubr.msk.f32.mxu0 %vm2402_vm3, %v2401_v15 }
 0x8fa   :  { %2095 = vmatprep.subr.mxu0 %v2401_v15 }
 0x8fb   :  { %2096 = vmatpush3.msra.mxu0 %v2546_v13 }
 0x8fc   :  { %2097 = vmatprep.subr.mxu0 %v2401_v15 }
 0x8fd   :  { %2098 = vmatpush3.msra.mxu0 %v2551_v14 }
 0x8fe   :  { %2099 = vmatprep.subr.mxu0 %v2401_v15 }
 0x8ff   :  { %2100 = vmatpush3.msra.mxu0 %v2558_v16 }
 0x900   :  { %2115 = vmatprep.subr.mxu0 %v2401_v15 }
 0x9b8   :  { %v1059_v40 = vpop.f32.mrf.mxu0 }
 0x9b9   :  { %v1064_v41 = vrot.slane %v1059_v40, 1  ;;  %v1067_v42 = vadd.f32 %v1059_v40, %v983_v39 }
 0x9ba   :  { %v2081_v44 = vpop.f32.mrf.mxu0 }
 0x9bb   :  { %v1068_v45 = vadd.f32 %v1064_v41, %v984_v43  ;;  %2193 = vtanh.f32 %v1067_v42  ;;  %v1925_v48 = vmul.f32 -1.442695, %v1067_v42 }
 0x9bd   :  { %2195 = vtanh.f32 %v1068_v45  ;;  %v1926_v49 = vmul.f32 -1.442695, %v1068_v45 }
 0x9be   :  { %2197 = vpow2.f32 %v1925_v48 }
 0x9bf   :  { %2199 = vpow2.f32 %v1926_v49 }
 0x9c8   :  { %v2194_v46 = vpop.eup %2193 }
 0x9c9   :  { %1087 = vrot.lane.b32.xlu1 %v2194_v46, %s2403_s25 }
 0x9ca   :  { %v2196_v47 = vpop.eup %2195 }
 0x9cb   :  { %1089 = vrot.lane.b32.xlu0 %v2196_v47, %s2403_s25  ;;  %v2198_v50 = vpop.eup %2197 }
 0x9cc   :  { %v2200_v51 = vpop.eup %2199  ;;  %v1075_v52 = vadd.f32 1.0, %v2198_v50 }
 0x9cd   :  { %v1076_v53 = vadd.f32 1.0, %v2200_v51 }
 0x9ce   :  { %2201 = vrcp.f32 %v1075_v52 }
 0x9cf   :  { %2203 = vrcp.f32 %v1076_v53 }
 0x9db   :  { %v2202_v54 = vpop.eup %2201 }
 0x9dc   :  { %v2204_v58 = vpop.eup %2203  ;;  %v1083_v62 = vmul.f32 %v2202_v54, %v969_v26 }
 0x9dd   :  { %v1084_v1 = vmul.f32 %v2204_v58, %v970_v29 }
 0xa3b   :  { %v1088_v55 = vpop.permute.xlu1 %1087 }
 0xa3c   :  { %v1093_v57 = vmul.f32 %v2202_v54, %v1088_v55 }
 0xa3d   :  { %v1090_v60 = vpop.permute.xlu0 %1089 }
 0xa3e   :  { %1097 = vrot.lane.b32.xlu1 %v1093_v57, %s2404_s7  ;;  %v1094_v61 = vmul.f32 %v2204_v58, %v1090_v60 }
 0xa40   :  { %1099 = vrot.lane.b32.xlu0 %v1094_v61, %s2404_s7 }
 0xab0   :  { %v1098_v63 = vpop.permute.xlu1 %1097 }
 0xab1   :  { %v2650_v0 = vadd.f32 %v1098_v63, %v1083_v62 }
 0xab2   :  { %v1100_v2 = vpop.permute.xlu0 %1099 }
 0xab3   :  { %2205 = vtanh.f32 %v2650_v0  ;;  %v2653_v4 = vadd.f32 %v1100_v2, %v1084_v1  ;;  %v1251_v1 = vld [vmem:[#allocation2 + $0x4] sm:$0x1] }
 0xab5   :  { %2207 = vtanh.f32 %v2653_v4 }
 0xac0   :  { %v2206_v5 = vpop.eup %2205 }
 0xac1   :  { %1109 = vrot.lane.b32.xlu1 %v2206_v5, %s2403_s25 }
 0xac2   :  { %v2208_v6 = vpop.eup %2207 }
 0xac3   :  { %1111 = vrot.lane.b32.xlu0 %v2208_v6, %s2403_s25  ;;  %v1252_v6 = vld [vmem:[#allocation2 + $0xc] sm:$0x1] }
 0xb33   :  { %v1110_v8 = vpop.permute.xlu1 %1109 }
 0xb34   :  { %v1115_v9 = vmul.f32 %v2202_v54, %v1110_v8 }
 0xb35   :  { %v1112_v3 = vpop.permute.xlu0 %1111 }
 0xb36   :  { %v1790_v10 = vrot.slane %v1115_v9, 6  ;;  %v1116_v17 = vmul.f32 %v2204_v58, %v1112_v3 }
 0xb38   :  { %v2662_v18 = vsel %vm292_vm6, %v1816_v11, %v1790_v10  ;;  %v1121_v19 = vrot.slane %v1116_v17, 7  ;;  %v1791_v20 = vrot.slane %v1116_v17, 6 }
 0xb3a   :  { %v2669_v22 = vsel %vm292_vm6, %v1817_v21, %v1791_v20  ;;  %v1122_v23 = vsel %vm853_vm10, %v1121_v19, %v1115_v9 }
 0xb3b   :  { %1123 = vrot.lane.b32.xlu0 %v1122_v23, %s2404_s7 }
 0xbad   :  { %v1124_v24 = vpop.permute.xlu0 %1123 }
 0xbae   :  { %2091 = vmatmul.mubr.msk.f32.vlgmr.msra.gmra.mxu1 %vm720_vm11, %v1124_v24 }
 0xbaf   :  { %2105 = vmatpush3.msra.mxu1 %v2538_v12  ;;  %2112 = vmatprep.mubr.msk.f32.mxu1 %vm2402_vm3, %v2401_v15 }
 0xbb0   :  { %2106 = vmatprep.subr.mxu1 %v2401_v15 }
 0xbb1   :  { %2107 = vmatpush3.msra.mxu1 %v2546_v13 }
 0xbb2   :  { %2108 = vmatprep.subr.mxu1 %v2401_v15 }
 0xbb3   :  { %2109 = vmatpush3.msra.mxu1 %v2551_v14 }
 0xbb4   :  { %2110 = vmatprep.subr.mxu1 %v2401_v15 }
 0xbb5   :  { %2111 = vmatpush3.msra.mxu1 %v2558_v16 }
 0xbb6   :  { %2126 = vmatprep.subr.mxu1 %v2401_v15 }
 0xc6e   :  { %v1193_v59 = vpop.f32.mrf.mxu1 }
 0xc6f   :  { %v1198_v25 = vrot.slane %v1193_v59, 1  ;;  %v1201_v26 = vadd.f32 %v1193_v59, %v1117_v56 }
 0xc70   :  { %v2092_v28 = vpop.f32.mrf.mxu1 }
 0xc71   :  { %v1202_v29 = vadd.f32 %v1198_v25, %v1118_v27  ;;  %2209 = vtanh.f32 %v1201_v26  ;;  %v1928_v32 = vmul.f32 -1.442695, %v1201_v26 }
 0xc73   :  { %2211 = vtanh.f32 %v1202_v29  ;;  %v1929_v33 = vmul.f32 -1.442695, %v1202_v29 }
 0xc74   :  { %2213 = vpow2.f32 %v1928_v32 }
 0xc75   :  { %2215 = vpow2.f32 %v1929_v33 }
 0xc7e   :  { %v2210_v30 = vpop.eup %2209 }
 0xc7f   :  { %1221 = vrot.lane.b32.xlu0 %v2210_v30, %s2403_s25 }
 0xc80   :  { %v2212_v31 = vpop.eup %2211 }
 0xc81   :  { %1223 = vrot.lane.b32.xlu1 %v2212_v31, %s2403_s25  ;;  %v2214_v34 = vpop.eup %2213 }
 0xc82   :  { %v2216_v35 = vpop.eup %2215  ;;  %v1209_v36 = vadd.f32 1.0, %v2214_v34 }
 0xc83   :  { %v1210_v37 = vadd.f32 1.0, %v2216_v35 }
 0xc84   :  { %2217 = vrcp.f32 %v1209_v36 }
 0xc85   :  { %2219 = vrcp.f32 %v1210_v37 }
 0xc91   :  { %v2218_v38 = vpop.eup %2217 }
 0xc92   :  { %v2220_v41 = vpop.eup %2219  ;;  %v1217_v44 = vmul.f32 %v2218_v38, %v2650_v0 }
 0xc93   :  { %v1218_v47 = vmul.f32 %v2220_v41, %v2653_v4 }
 0xcf1   :  { %v1222_v39 = vpop.permute.xlu0 %1221 }
 0xcf2   :  { %v1227_v40 = vmul.f32 %v2218_v38, %v1222_v39 }
 0xcf3   :  { %v1224_v42 = vpop.permute.xlu1 %1223 }
 0xcf4   :  { %1231 = vrot.lane.b32.xlu0 %v1227_v40, %s2404_s7  ;;  %v1228_v43 = vmul.f32 %v2220_v41, %v1224_v42 }
 0xcf6   :  { %1233 = vrot.lane.b32.xlu1 %v1228_v43, %s2404_s7 }
 0xd66   :  { %v1232_v45 = vpop.permute.xlu0 %1231 }
 0xd67   :  { %v2689_v46 = vadd.f32 %v1232_v45, %v1217_v44  ;;  %v1385_v44 = vld [vmem:[#allocation2 + $0x5] sm:$0x1] }
 0xd68   :  { %v1234_v48 = vpop.permute.xlu1 %1233 }
 0xd69   :  { %2221 = vtanh.f32 %v2689_v46  ;;  %v1238_v49 = vadd.f32 %v1234_v48, %v1218_v47 }
 0xd6b   :  { %2223 = vtanh.f32 %v1238_v49 }
 0xd76   :  { %v2222_v50 = vpop.eup %2221 }
 0xd77   :  { %1243 = vrot.lane.b32.xlu0 %v2222_v50, %s2403_s25 }
 0xd78   :  { %v2224_v51 = vpop.eup %2223 }
 0xd79   :  { %1245 = vrot.lane.b32.xlu1 %v2224_v51, %s2403_s25 }
 0xde9   :  { %v1244_v52 = vpop.permute.xlu0 %1243 }
 0xdea   :  { %v1249_v53 = vmul.f32 %v2218_v38, %v1244_v52 }
 0xdeb   :  { %v1246_v55 = vpop.permute.xlu1 %1245 }
 0xdec   :  { %v1794_v54 = vrot.slane %v1249_v53, 5  ;;  %v1250_v57 = vmul.f32 %v2220_v41, %v1246_v55 }
 0xdee   :  { %v2696_v58 = vsel %vm1820_vm12, %v2662_v18, %v1794_v54  ;;  %v1255_v60 = vrot.slane %v1250_v57, 7  ;;  %v1795_v61 = vrot.slane %v1250_v57, 5 }
 0xdf0   :  { %v2699_v62 = vsel %vm1820_vm12, %v2669_v22, %v1795_v61  ;;  %v1256_v63 = vsel %vm853_vm10, %v1255_v60, %v1249_v53 }
 0xdf1   :  { %1257 = vrot.lane.b32.xlu1 %v1256_v63, %s2404_s7 }
 0xe63   :  { %v1258_v0 = vpop.permute.xlu1 %1257 }
 0xe64   :  { %2102 = vmatmul.mubr.msk.f32.vlgmr.msra.gmra.mxu0 %vm720_vm11, %v1258_v0 }
 0xe65   :  { %2116 = vmatpush3.msra.mxu0 %v2538_v12  ;;  %2123 = vmatprep.mubr.msk.f32.mxu0 %vm2402_vm3, %v2401_v15 }
 0xe66   :  { %2117 = vmatprep.subr.mxu0 %v2401_v15 }
 0xe67   :  { %2118 = vmatpush3.msra.mxu0 %v2546_v13 }
 0xe68   :  { %2119 = vmatprep.subr.mxu0 %v2401_v15 }
 0xe69   :  { %2120 = vmatpush3.msra.mxu0 %v2551_v14 }
 0xe6a   :  { %2121 = vmatprep.subr.mxu0 %v2401_v15 }
 0xe6b   :  { %2122 = vmatpush3.msra.mxu0 %v2558_v16 }
 0xf24   :  { %v1327_v2 = vpop.f32.mrf.mxu0 }
 0xf25   :  { %v1332_v4 = vrot.slane %v1327_v2, 1  ;;  %v1335_v5 = vadd.f32 %v1327_v2, %v1251_v1 }
 0xf26   :  { %v2103_v7 = vpop.f32.mrf.mxu0 }
 0xf27   :  { %v1336_v8 = vadd.f32 %v1332_v4, %v1252_v6  ;;  %2225 = vtanh.f32 %v1335_v5  ;;  %v1931_v3 = vmul.f32 -1.442695, %v1335_v5 }
 0xf29   :  { %2227 = vtanh.f32 %v1336_v8  ;;  %v1932_v11 = vmul.f32 -1.442695, %v1336_v8 }
 0xf2a   :  { %2229 = vpow2.f32 %v1931_v3 }
 0xf2b   :  { %2231 = vpow2.f32 %v1932_v11 }
 0xf34   :  { %v2226_v9 = vpop.eup %2225 }
 0xf35   :  { %1355 = vrot.lane.b32.xlu1 %v2226_v9, %s2403_s25 }
 0xf36   :  { %v2228_v10 = vpop.eup %2227 }
 0xf37   :  { %1357 = vrot.lane.b32.xlu0 %v2228_v10, %s2403_s25  ;;  %v2230_v17 = vpop.eup %2229 }
 0xf38   :  { %v2232_v18 = vpop.eup %2231  ;;  %v1343_v19 = vadd.f32 1.0, %v2230_v17 }
 0xf39   :  { %v1344_v20 = vadd.f32 1.0, %v2232_v18 }
 0xf3a   :  { %2233 = vrcp.f32 %v1343_v19 }
 0xf3b   :  { %2235 = vrcp.f32 %v1344_v20 }
 0xf47   :  { %v2234_v21 = vpop.eup %2233 }
 0xf48   :  { %v2236_v24 = vpop.eup %2235  ;;  %v1351_v25 = vmul.f32 %v2234_v21, %v2689_v46 }
 0xf49   :  { %v1352_v28 = vmul.f32 %v2236_v24, %v1238_v49 }
 0xfa7   :  { %v1356_v22 = vpop.permute.xlu1 %1355 }
 0xfa8   :  { %v1361_v23 = vmul.f32 %v2234_v21, %v1356_v22  ;;  %v1519_v22 = vld [vmem:[#allocation2 + $0x6] sm:$0x1] }
 0xfa9   :  { %v1358_v56 = vpop.permute.xlu0 %1357 }
 0xfaa   :  { %1365 = vrot.lane.b32.xlu1 %v1361_v23, %s2404_s7  ;;  %v1362_v59 = vmul.f32 %v2236_v24, %v1358_v56 }
 0xfac   :  { %1367 = vrot.lane.b32.xlu0 %v1362_v59, %s2404_s7  ;;  %v1520_v59 = vld [vmem:[#allocation2 + $0xe] sm:$0x1] }
0x101c   :  { %v1366_v26 = vpop.permute.xlu1 %1365 }
0x101d   :  { %v1371_v27 = vadd.f32 %v1366_v26, %v1351_v25 }
0x101e   :  { %v1368_v29 = vpop.permute.xlu0 %1367 }
0x101f   :  { %2237 = vtanh.f32 %v1371_v27  ;;  %v1372_v30 = vadd.f32 %v1368_v29, %v1352_v28 }
0x1021   :  { %2239 = vtanh.f32 %v1372_v30 }
0x102c   :  { %v2238_v31 = vpop.eup %2237 }
0x102d   :  { %1377 = vrot.lane.b32.xlu1 %v2238_v31, %s2403_s25 }
0x102e   :  { %v2240_v32 = vpop.eup %2239 }
0x102f   :  { %1379 = vrot.lane.b32.xlu0 %v2240_v32, %s2403_s25 }
0x109f   :  { %v1378_v33 = vpop.permute.xlu1 %1377 }
0x10a0   :  { %v1383_v34 = vmul.f32 %v2234_v21, %v1378_v33 }
0x10a1   :  { %v1380_v36 = vpop.permute.xlu0 %1379 }
0x10a2   :  { %v1798_v35 = vrot.slane %v1383_v34, 4  ;;  %v1384_v37 = vmul.f32 %v2236_v24, %v1380_v36 }
0x10a4   :  { %v2722_v38 = vsel %vm303_vm7, %v2696_v58, %v1798_v35  ;;  %v1389_v39 = vrot.slane %v1384_v37, 7  ;;  %v1799_v40 = vrot.slane %v1384_v37, 4 }
0x10a6   :  { %v2726_v41 = vsel %vm303_vm7, %v2699_v62, %v1799_v40  ;;  %v1390_v42 = vsel %vm853_vm10, %v1389_v39, %v1383_v34 }
0x10a7   :  { %1391 = vrot.lane.b32.xlu0 %v1390_v42, %s2404_s7 }
0x1119   :  { %v1392_v43 = vpop.permute.xlu0 %1391 }
0x111a   :  { %2113 = vmatmul.mubr.msk.f32.vlgmr.msra.gmra.mxu1 %vm720_vm11, %v1392_v43 }
0x111b   :  { %2127 = vmatpush3.msra.mxu1 %v2538_v12  ;;  %2134 = vmatprep.mubr.msk.f32.mxu1 %vm2402_vm3, %v2401_v15  ;;  %v1386_v12 = vld [vmem:[#allocation2 + $0xd] sm:$0x1] }
0x111c   :  { %2128 = vmatprep.subr.mxu1 %v2401_v15 }
0x111d   :  { %2129 = vmatpush3.msra.mxu1 %v2546_v13 }
0x111e   :  { %2130 = vmatprep.subr.mxu1 %v2401_v15 }
0x111f   :  { %2131 = vmatpush3.msra.mxu1 %v2551_v14 }
0x1120   :  { %2132 = vmatprep.subr.mxu1 %v2401_v15 }
0x1121   :  { %2133 = vmatpush3.msra.mxu1 %v2558_v16 }
0x11da   :  { %v1461_v45 = vpop.f32.mrf.mxu1 }
0x11db   :  { %v1466_v46 = vrot.slane %v1461_v45, 1  ;;  %v1469_v47 = vadd.f32 %v1461_v45, %v1385_v44 }
0x11dc   :  { %v2114_v48 = vpop.f32.mrf.mxu1 }
0x11dd   :  { %v1470_v49 = vadd.f32 %v1466_v46, %v1386_v12  ;;  %2241 = vtanh.f32 %v1469_v47  ;;  %v1934_v14 = vmul.f32 -1.442695, %v1469_v47 }
0x11df   :  { %2243 = vtanh.f32 %v1470_v49  ;;  %v1935_v51 = vmul.f32 -1.442695, %v1470_v49 }
0x11e0   :  { %2245 = vpow2.f32 %v1934_v14 }
0x11e1   :  { %2247 = vpow2.f32 %v1935_v51 }
0x11ea   :  { %v2242_v50 = vpop.eup %2241 }
0x11eb   :  { %1489 = vrot.lane.b32.xlu0 %v2242_v50, %s2403_s25 }
0x11ec   :  { %v2244_v13 = vpop.eup %2243 }
0x11ed   :  { %1491 = vrot.lane.b32.xlu1 %v2244_v13, %s2403_s25  ;;  %v2246_v15 = vpop.eup %2245 }
0x11ee   :  { %v2248_v16 = vpop.eup %2247  ;;  %v1477_v52 = vadd.f32 1.0, %v2246_v15 }
0x11ef   :  { %v1478_v53 = vadd.f32 1.0, %v2248_v16 }
0x11f0   :  { %2249 = vrcp.f32 %v1477_v52 }
0x11f1   :  { %2251 = vrcp.f32 %v1478_v53 }
0x11fd   :  { %v2250_v54 = vpop.eup %2249 }
0x11fe   :  { %v2252_v58 = vpop.eup %2251  ;;  %v1485_v62 = vmul.f32 %v2250_v54, %v1371_v27 }
0x11ff   :  { %v1486_v1 = vmul.f32 %v2252_v58, %v1372_v30 }
0x125d   :  { %v1490_v55 = vpop.permute.xlu0 %1489 }
0x125e   :  { %v1495_v57 = vmul.f32 %v2250_v54, %v1490_v55  ;;  %v1653_v55 = vld [vmem:[#allocation2 + $0x7] sm:$0x1] }
0x125f   :  { %v1492_v60 = vpop.permute.xlu1 %1491 }
0x1260   :  { %1499 = vrot.lane.b32.xlu0 %v1495_v57, %s2404_s7  ;;  %v1496_v61 = vmul.f32 %v2252_v58, %v1492_v60 }
0x1262   :  { %1501 = vrot.lane.b32.xlu1 %v1496_v61, %s2404_s7  ;;  %v1654_v61 = vld [vmem:[#allocation2 + $0xf] sm:$0x1] }
0x12d2   :  { %v1500_v63 = vpop.permute.xlu0 %1499 }
0x12d3   :  { %v1505_v0 = vadd.f32 %v1500_v63, %v1485_v62 }
0x12d4   :  { %v1502_v2 = vpop.permute.xlu1 %1501 }
0x12d5   :  { %2253 = vtanh.f32 %v1505_v0  ;;  %v1506_v4 = vadd.f32 %v1502_v2, %v1486_v1 }
0x12d7   :  { %2255 = vtanh.f32 %v1506_v4 }
0x12e2   :  { %v2254_v5 = vpop.eup %2253 }
0x12e3   :  { %1511 = vrot.lane.b32.xlu0 %v2254_v5, %s2403_s25 }
0x12e4   :  { %v2256_v6 = vpop.eup %2255 }
0x12e5   :  { %1513 = vrot.lane.b32.xlu1 %v2256_v6, %s2403_s25 }
0x1355   :  { %v1512_v7 = vpop.permute.xlu0 %1511 }
0x1356   :  { %v1517_v8 = vmul.f32 %v2250_v54, %v1512_v7 }
0x1357   :  { %v1514_v10 = vpop.permute.xlu1 %1513 }
0x1358   :  { %v1802_v9 = vrot.slane %v1517_v8, 3  ;;  %v1518_v3 = vmul.f32 %v2252_v58, %v1514_v10 }
0x135a   :  { %v1826_v11 = vsel %vm1825_vm13, %v2722_v38, %v1802_v9  ;;  %v1523_v17 = vrot.slane %v1518_v3, 7  ;;  %v1803_v18 = vrot.slane %v1518_v3, 3 }
0x135c   :  { %v1524_v19 = vsel %vm853_vm10, %v1523_v17, %v1517_v8  ;;  %v1827_v20 = vsel %vm1825_vm13, %v2726_v41, %v1803_v18 }
0x135d   :  { %1525 = vrot.lane.b32.xlu1 %v1524_v19, %s2404_s7 }
0x13cf   :  { %v1526_v21 = vpop.permute.xlu1 %1525 }
0x13d0   :  { %2124 = vmatmul.mubr.msk.f32.vlgmr.msra.gmra.mxu0 %vm720_vm11, %v1526_v21 }
0x1490   :  { %v1595_v23 = vpop.f32.mrf.mxu0 }
0x1491   :  { %v1600_v24 = vrot.slane %v1595_v23, 1  ;;  %v1603_v56 = vadd.f32 %v1595_v23, %v1519_v22 }
0x1492   :  { %v2125_v25 = vpop.f32.mrf.mxu0 }
0x1493   :  { %v1604_v26 = vadd.f32 %v1600_v24, %v1520_v59  ;;  %2257 = vtanh.f32 %v1603_v56  ;;  %v1937_v29 = vmul.f32 -1.442695, %v1603_v56 }
0x1495   :  { %2259 = vtanh.f32 %v1604_v26  ;;  %v1938_v30 = vmul.f32 -1.442695, %v1604_v26 }
0x1496   :  { %2261 = vpow2.f32 %v1937_v29 }
0x1497   :  { %2263 = vpow2.f32 %v1938_v30 }
0x14a0   :  { %v2258_v27 = vpop.eup %2257 }
0x14a1   :  { %1623 = vrot.lane.b32.xlu1 %v2258_v27, %s2403_s25 }
0x14a2   :  { %v2260_v28 = vpop.eup %2259 }
0x14a3   :  { %1625 = vrot.lane.b32.xlu0 %v2260_v28, %s2403_s25  ;;  %v2262_v31 = vpop.eup %2261 }
0x14a4   :  { %v2264_v32 = vpop.eup %2263  ;;  %v1611_v33 = vadd.f32 1.0, %v2262_v31 }
0x14a5   :  { %v1612_v34 = vadd.f32 1.0, %v2264_v32 }
0x14a6   :  { %2265 = vrcp.f32 %v1611_v33 }
0x14a7   :  { %2267 = vrcp.f32 %v1612_v34 }
0x14b3   :  { %v2266_v35 = vpop.eup %2265 }
0x14b4   :  { %v2268_v38 = vpop.eup %2267  ;;  %v1619_v41 = vmul.f32 %v2266_v35, %v1505_v0 }
0x14b5   :  { %v1620_v44 = vmul.f32 %v2268_v38, %v1506_v4 }
0x1513   :  { %v1624_v36 = vpop.permute.xlu1 %1623 }
0x1514   :  { %v1629_v37 = vmul.f32 %v2266_v35, %v1624_v36 }
0x1515   :  { %v1626_v39 = vpop.permute.xlu0 %1625 }
0x1516   :  { %1633 = vrot.lane.b32.xlu1 %v1629_v37, %s2404_s7  ;;  %v1630_v40 = vmul.f32 %v2268_v38, %v1626_v39 }
0x1518   :  { %1635 = vrot.lane.b32.xlu0 %v1630_v40, %s2404_s7 }
0x1588   :  { %v1634_v42 = vpop.permute.xlu1 %1633 }
0x1589   :  { %v1639_v43 = vadd.f32 %v1634_v42, %v1619_v41 }
0x158a   :  { %v1636_v45 = vpop.permute.xlu0 %1635 }
0x158b   :  { %2269 = vtanh.f32 %v1639_v43  ;;  %v1640_v46 = vadd.f32 %v1636_v45, %v1620_v44 }
0x158d   :  { %2271 = vtanh.f32 %v1640_v46 }
0x1598   :  { %v2270_v47 = vpop.eup %2269 }
0x1599   :  { %1645 = vrot.lane.b32.xlu1 %v2270_v47, %s2403_s25 }
0x159a   :  { %v2272_v12 = vpop.eup %2271 }
0x159b   :  { %1647 = vrot.lane.b32.xlu0 %v2272_v12, %s2403_s25 }
0x160b   :  { %v1646_v48 = vpop.permute.xlu1 %1645 }
0x160c   :  { %v1651_v49 = vmul.f32 %v2266_v35, %v1646_v48 }
0x160d   :  { %v1648_v13 = vpop.permute.xlu0 %1647 }
0x160e   :  { %v1806_v50 = vrot.slane %v1651_v49, 2  ;;  %v1652_v14 = vmul.f32 %v2268_v38, %v1648_v13 }
0x1610   :  { %v1828_v51 = vsel %vm175_vm1, %v1826_v11, %v1806_v50  ;;  %v1657_v15 = vrot.slane %v1652_v14, 7  ;;  %v1807_v16 = vrot.slane %v1652_v14, 2 }
0x1612   :  { %v1658_v52 = vsel %vm853_vm10, %v1657_v15, %v1651_v49  ;;  %v2760_v53 = vsel %vm175_vm1, %v1827_v20, %v1807_v16 }
0x1613   :  { %1659 = vrot.lane.b32.xlu0 %v1658_v52, %s2404_s7 }
0x1685   :  { %v1660_v54 = vpop.permute.xlu0 %1659 }
0x1686   :  { %2135 = vmatmul.mubr.msk.f32.vlgmr.msra.gmra.mxu1 %vm720_vm11, %v1660_v54 }
0x1746   :  { %v1729_v57 = vpop.f32.mrf.mxu1 }
0x1747   :  { %v1734_v58 = vrot.slane %v1729_v57, 1  ;;  %v1737_v60 = vadd.f32 %v1729_v57, %v1653_v55 }
0x1748   :  { %v2136_v62 = vpop.f32.mrf.mxu1 }
0x1749   :  { %v1738_v63 = vadd.f32 %v1734_v58, %v1654_v61  ;;  %2273 = vtanh.f32 %v1737_v60  ;;  %v1940_v2 = vmul.f32 -1.442695, %v1737_v60 }
0x174b   :  { %2275 = vtanh.f32 %v1738_v63  ;;  %v1941_v4 = vmul.f32 -1.442695, %v1738_v63 }
0x174c   :  { %2277 = vpow2.f32 %v1940_v2 }
0x174d   :  { %2279 = vpow2.f32 %v1941_v4 }
0x1756   :  { %v2274_v0 = vpop.eup %2273 }
0x1757   :  { %1757 = vrot.lane.b32.xlu0 %v2274_v0, %s2403_s25 }
0x1758   :  { %v2276_v1 = vpop.eup %2275 }
0x1759   :  { %1759 = vrot.lane.b32.xlu1 %v2276_v1, %s2403_s25  ;;  %v2278_v5 = vpop.eup %2277 }
0x175a   :  { %v2280_v6 = vpop.eup %2279  ;;  %v1745_v7 = vadd.f32 1.0, %v2278_v5 }
0x175b   :  { %v1746_v8 = vadd.f32 1.0, %v2280_v6 }
0x175c   :  { %2281 = vrcp.f32 %v1745_v7 }
0x175d   :  { %2283 = vrcp.f32 %v1746_v8 }
0x1769   :  { %v2282_v9 = vpop.eup %2281 }
0x176a   :  { %v2284_v11 = vpop.eup %2283  ;;  %v1753_v19 = vmul.f32 %v2282_v9, %v1639_v43 }
0x176b   :  { %v1754_v22 = vmul.f32 %v2284_v11, %v1640_v46 }
0x17c9   :  { %v1758_v10 = vpop.permute.xlu0 %1757 }
0x17ca   :  { %v1763_v3 = vmul.f32 %v2282_v9, %v1758_v10 }
0x17cb   :  { %v1760_v17 = vpop.permute.xlu1 %1759 }
0x17cc   :  { %1767 = vrot.lane.b32.xlu0 %v1763_v3, %s2404_s7  ;;  %v1764_v18 = vmul.f32 %v2284_v11, %v1760_v17 }
0x17ce   :  { %1769 = vrot.lane.b32.xlu1 %v1764_v18, %s2404_s7 }
0x183e   :  { %v1768_v20 = vpop.permute.xlu0 %1767 }
0x183f   :  { %v1773_v21 = vadd.f32 %v1768_v20, %v1753_v19 }
0x1840   :  { %v1770_v23 = vpop.permute.xlu1 %1769 }
0x1841   :  { %2285 = vtanh.f32 %v1773_v21  ;;  %v1774_v24 = vadd.f32 %v1770_v23, %v1754_v22 }
0x1843   :  { %2287 = vtanh.f32 %v1774_v24  ;;  %v1852_v56 = vrot.slane %v1774_v24, 7 }
0x1845   :  { %v1853_v59 = vsel %vm853_vm10, %v1852_v56, %v1773_v21 }
0x184e   :  { %v2286_v25 = vpop.eup %2285 }
0x184f   :  { %1779 = vrot.lane.b32.xlu0 %v2286_v25, %s2403_s25 }
0x1850   :  { %v2288_v26 = vpop.eup %2287 }
0x1851   :  { %1781 = vrot.lane.b32.xlu1 %v2288_v26, %s2403_s25 }
0x18c1   :  { %v1780_v27 = vpop.permute.xlu0 %1779 }
0x18c2   :  { %v1785_v28 = vmul.f32 %v2282_v9, %v1780_v27 }
0x18c3   :  { %v1782_v30 = vpop.permute.xlu1 %1781 }
0x18c4   :  { %v1812_v29 = vrot.slane %v1785_v28, 1  ;;  %v1786_v31 = vmul.f32 %v2284_v11, %v1782_v30 }
0x18c6   :  { %v1831_v32 = vsel %vm1830_vm14, %v1828_v51, %v1812_v29  ;;  %v1843_v33 = vrot.slane %v1786_v31, 7  ;;  %v1813_v34 = vrot.slane %v1786_v31, 1 }
0x18c7   :  { %1835 = vrot.lane.b32.xlu0 %v1831_v32, %s2404_s7 }
0x18c8   :  { %v1844_v35 = vsel %vm853_vm10, %v1843_v33, %v1785_v28  ;;  %v1832_v36 = vsel %vm1830_vm14, %v2760_v53, %v1813_v34 }
0x18c9   :  { %1845 = vrot.lane.b32.xlu1 %v1844_v35, %s2404_s7 }
0x18cb   :  { %1854 = vrot.lane.b32.xlu0 %v1853_v59, %s2405_s26 }
0x18cd   :  { %1837 = vrot.lane.b32.xlu1 %v1832_v36, %s2404_s7 }
0x1939   :  { %v1836_v37 = vpop.permute.xlu0 %1835 }
0x193a   :  { %1841 = vst.msk [vmem:[#allocation8] sm:$0xff] %vm720_vm11, %v1836_v37 }
0x193b   :  { %v1846_v38 = vpop.permute.xlu1 %1845 }
0x193c   :  { %1849 = vst.msk [vmem:[#allocation9] sm:$0x3] %vm1848_vm15, %v1846_v38 }
0x193d   :  { %v1855_v39 = vpop.permute.xlu0 %1854 }
0x193e   :  { %1857 = vst.msk [vmem:[#allocation11] sm:$0x3] %vm1848_vm15, %v1855_v39 }
0x193f   :  { %2340 = shalt.err (!%p2337_p0)
}
0x1940   :  { %1879 = dma.vmem_to_hbm [thread:$0]  %s1877_s5, 32, %s2806_s9, [#allocation10]  }
0x1941   :  { %s2349_s14 = scalar_lea.vmem %s1887_s29, 32  ;;  %p2354_p2 = scmp.lt.s32.totalorder %s1887_s29, %s1887_s29 }
0x1942   :  { %p2350_p1 = scmp.ne.s32.totalorder %s1887_s29, %s2349_s14  ;;  %p2355_p3 = scmp.lt.s32.totalorder %s2349_s14, %s2349_s14 }
0x1944   :  { %p2356_p4 = por %p2355_p3, %p2354_p2 }
0x1946   :  { %p2357_p5 = pnand %p2356_p4, %p2350_p1 }
0x1948   :  { %2360 = shalt.err (!%p2357_p5)
}
0x1949   :  { %1889 = dma.vmem_to_hbm [thread:$0]  %s1887_s29, 32, %s2807_s10, [#allocation10]   ;;  %v1838_v40 = vpop.permute.xlu1 %1837 }
0x194a   :  { %1842 = vst.msk [vmem:[#allocation8 + $0x8] sm:$0xff] %vm720_vm11, %v1838_v40  ;;  %s2369_s3 = scalar_lea.vmem %s2777_s0, 256  ;;  %p2374_p7 = scmp.lt.s32.totalorder %s2777_s0, %s2777_s0 }
0x194b   :  { %p2370_p6 = scmp.ne.s32.totalorder %s2777_s0, %s2369_s3  ;;  %p2375_p8 = scmp.lt.s32.totalorder %s2369_s3, %s2369_s3 }
0x194d   :  { %p2376_p9 = por %p2375_p8, %p2374_p7 }
0x194f   :  { %p2377_p10 = pnand %p2376_p9, %p2370_p6 }
0x1951   :  { %2380 = shalt.err (!%p2377_p10)
}
0x1952   :  { %1869 = dma.vmem_to_hbm [thread:$0]  %s2777_s0, 256, %s2805_s8, [#allocation5], %s2398_s16, %s2398_s16, %s2399_s17  }
0x1953   :  { %2393 = dma.done.wait [#allocation5], 256  }
0x1954   :  { %2394 = vsyncadd [#allocation5], 4294967040 }
0x1955   :  { %2395 = dma.done.wait [#allocation10], 64  }
0x1956   :  { %2396 = vsyncadd [#allocation10], 4294967232 }
0x1957   :  { %1899 = vsyncpa [#allocation4], 1 }
0x1958   :  { %1900 = vsyncpa [#allocation7], 1 }
0x1959   :  { %1901 = vsyncpa [#allocation5], 1 }
0x195a   :  { %1902 = vsyncpa [#allocation10], 1 }

</bundles_post_ra>
